<compile_context>
chip_gen: v7x
topology: tpu7x:2x2x1
jax: 0.10.0
libtpu: 0.0.40
codegen_flags: <defaults>
</compile_context>

<pallas_src>
import jax
import jax.numpy as jnp
from jax.experimental import pallas as pl
from jax.experimental.pallas import tpu as pltpu

# Keep XLA-side matmuls (the once-only precomputes and the pure-JAX reference check)
# at full f32 so they match the kernel's f32 MXU accumulation.
jax.config.update("jax_default_matmul_precision", "highest")

# ----------------------------- model sizes (small) -----------------------------
B = 2          # batch
S_SRC = 8      # source sequence length
S_TRG = 8      # target sequence length
EMB = 32       # embedding dim
HID = 32       # GRU hidden dim
V_SRC = 50     # source vocab
V_TRG = 64     # target vocab (decoder.voca_size)


# ------------------------------- kernel helpers --------------------------------
def _gru_gates(gi, gh, h):
    """PyTorch GRU gate math (r, z, n order); gi/gh already include their biases."""
    H = h.shape[-1]
    r = jax.nn.sigmoid(gi[:, :H] + gh[:, :H])
    z = jax.nn.sigmoid(gi[:, H:2 * H] + gh[:, H:2 * H])
    n = jnp.tanh(gi[:, 2 * H:] + r * gh[:, 2 * H:])
    return (1.0 - z) * n + z * h


# -------------------------------- fused kernel ----------------------------------
def _seq2seq_kernel(gi_all_ref, mask_ref, trg0_ref,
                    enc_whh_ref, enc_bhh_ref,
                    dec_m_ref, dec_whh_ref, dec_bih_ref, dec_bhh_ref,
                    dec_wout_ref, dec_bout_ref,
                    out_ref):
    S, Bq, _ = gi_all_ref.shape
    H = enc_whh_ref.shape[0]
    T, _, V = out_ref.shape

    # ----- encoder recurrence (fully unrolled; everything VMEM-resident) -----
    enc_whh = enc_whh_ref[...]                       # (H, 3H)
    enc_bhh = enc_bhh_ref[...]                       # (1, 3H)
    h = jnp.zeros((Bq, H), jnp.float32)
    for t in range(S):                               # static trip count -> full unroll
        gi = gi_all_ref[t]                           # (B, 3H); b_ih folded in outside
        gh = jnp.dot(h, enc_whh, preferred_element_type=jnp.float32) + enc_bhh
        h_new = _gru_gates(gi, gh, h)
        # pack_padded_sequence emulation: rows with t >= length keep their old hidden.
        m = mask_ref[t]                              # (B, 1) precomputed f32 mask
        h = m * h_new + (1.0 - m) * h

    # ----- greedy decode: T-1 steps, logits written into the resident output -----
    dec_m = dec_m_ref[...]                           # (V, 3H) = dec_emb @ W_ih
    dec_whh = dec_whh_ref[...]                       # (H, 3H)
    dec_bih = dec_bih_ref[...]                       # (1, 3H)
    dec_bhh = dec_bhh_ref[...]                       # (1, 3H)
    dec_wout = dec_wout_ref[...]                     # (H, V)
    dec_bout = dec_bout_ref[...]                     # (1, V)

    col = jax.lax.broadcasted_iota(jnp.int32, (Bq, V), 1)
    colf = col.astype(jnp.float32)
    oh = (col == trg0_ref[...]).astype(jnp.float32)  # start-token one-hot (B, V)

    out_ref[0] = jnp.zeros((Bq, V), jnp.float32)     # outputs[:, 0, :] = 0
    for t in range(1, T):                            # static trip count -> full unroll
        gi = jnp.dot(oh, dec_m, preferred_element_type=jnp.float32) + dec_bih
        gh = jnp.dot(h, dec_whh, preferred_element_type=jnp.float32) + dec_bhh
        h = _gru_gates(gi, gh, h)
        logits = jnp.dot(h, dec_wout, preferred_element_type=jnp.float32) + dec_bout
        out_ref[t] = logits
        # greedy argmax -> one-hot for next step (first-max tie-break, like torch.max)
        mx = jnp.max(logits, axis=-1, keepdims=True)
        idx = jnp.min(jnp.where(logits == mx, colf, jnp.float32(V)),
                      axis=-1, keepdims=True)
        oh = (colf == idx).astype(jnp.float32)


# ------------------------------ pallas_call wrapper ------------------------------
def seq2seq_pallas(gi_all, mask, trg0, enc_whh, enc_bhh,
                   dec_m, dec_whh, dec_bih, dec_bhh, dec_wout, dec_bout,
                   trg_max_length):
    _, Bq, _ = gi_all.shape
    V = dec_wout.shape[1]
    vmem = pl.BlockSpec(memory_space=pltpu.MemorySpace.VMEM)
    return pl.pallas_call(
        _seq2seq_kernel,
        out_shape=jax.ShapeDtypeStruct((trg_max_length, Bq, V), jnp.float32),
        in_specs=[vmem] * 11,
        out_specs=vmem,
    )(gi_all, mask, trg0, enc_whh, enc_bhh,
      dec_m, dec_whh, dec_bih, dec_bhh, dec_wout, dec_bout)


# ------------------------------ model components -------------------------------
def init_params(key):
    ks = jax.random.split(key, 12)
    s = 0.1

    def rnd(k, shape):
        return (s * jax.random.normal(k, shape)).astype(jnp.float32)

    return {
        # encoder
        "enc_emb": rnd(ks[0], (V_SRC, EMB)),
        "enc_wih": rnd(ks[1], (EMB, 3 * HID)),
        "enc_whh": rnd(ks[2], (HID, 3 * HID)),
        "enc_bih": rnd(ks[3], (1, 3 * HID)),
        "enc_bhh": rnd(ks[4], (1, 3 * HID)),
        # decoder
        "dec_emb": rnd(ks[5], (V_TRG, EMB)),
        "dec_wih": rnd(ks[6], (EMB, 3 * HID)),
        "dec_whh": rnd(ks[7], (HID, 3 * HID)),
        "dec_bih": rnd(ks[8], (1, 3 * HID)),
        "dec_bhh": rnd(ks[9], (1, 3 * HID)),
        "dec_wout": rnd(ks[10], (HID, V_TRG)),
        "dec_bout": rnd(ks[11], (1, V_TRG)),
    }


@jax.jit
def seq2seq_forward(p, src, trg, per_src_length):
    """Mirrors Seq2Seq.forward: encoder (packed lengths) + greedy decode T-1 steps."""
    bsz, trg_max_length = trg.shape
    S = src.shape[1]

    # --- one-time precomputes hoisted out of the recurrence (all tiny) ---
    emb = jnp.take(p["enc_emb"], src, axis=0)                        # (B, S, E) gather
    gi_all = (jnp.einsum("bse,eg->sbg", emb, p["enc_wih"])
              + p["enc_bih"][None]).astype(jnp.float32)              # (S, B, 3H)
    mask = (jnp.arange(S)[:, None, None]
            < per_src_length.astype(jnp.int32)[None, :, None]
            ).astype(jnp.float32)                                    # (S, B, 1)
    trg0 = trg[:, :1].astype(jnp.int32)                              # (B, 1) start tokens
    dec_m = (p["dec_emb"] @ p["dec_wih"]).astype(jnp.float32)        # (V, 3H) emb folded into W_ih

    out_tb = seq2seq_pallas(gi_all, mask, trg0,
                            p["enc_whh"], p["enc_bhh"],
                            dec_m, p["dec_whh"], p["dec_bih"], p["dec_bhh"],
                            p["dec_wout"], p["dec_bout"],
                            trg_max_length)                          # (T, B, V)
    return jnp.transpose(out_tb, (1, 0, 2))                          # (B, T, V)


# ------------------------- pure-JAX reference (first step) ----------------------
def _ref_gru(x, h, wih, whh, bih, bhh):
    gi = x @ wih + bih
    gh = h @ whh + bhh
    H = h.shape[-1]
    r = jax.nn.sigmoid(gi[:, :H] + gh[:, :H])
    z = jax.nn.sigmoid(gi[:, H:2 * H] + gh[:, H:2 * H])
    n = jnp.tanh(gi[:, 2 * H:] + r * gh[:, 2 * H:])
    return (1.0 - z) * n + z * h


def _reference_first_step_logits(p, src, trg, per_src_length):
    emb = jnp.take(p["enc_emb"], src, axis=0)
    h = jnp.zeros((src.shape[0], HID), jnp.float32)
    for t in range(src.shape[1]):
        m = (t < per_src_length).astype(jnp.float32)[:, None]
        h_new = _ref_gru(emb[:, t], h, p["enc_wih"], p["enc_whh"],
                         p["enc_bih"], p["enc_bhh"])
        h = m * h_new + (1.0 - m) * h
    x = jnp.take(p["dec_emb"], trg[:, 0], axis=0)
    h1 = _ref_gru(x, h, p["dec_wih"], p["dec_whh"], p["dec_bih"], p["dec_bhh"])
    return h1 @ p["dec_wout"] + p["dec_bout"]


# ------------------------------------ main --------------------------------------
if __name__ == "__main__":
    root = jax.random.PRNGKey(0)
    k_param, k_src, k_trg = jax.random.split(root, 3)

    params = init_params(k_param)
    src = jax.random.randint(k_src, (B, S_SRC), 0, V_SRC, dtype=jnp.int32)
    trg = jax.random.randint(k_trg, (B, S_TRG), 0, V_TRG, dtype=jnp.int32)
    per_src_length = jnp.array([S_SRC, S_SRC - 3], dtype=jnp.int32)

    out = seq2seq_forward(params, src, trg, per_src_length)
    jax.block_until_ready(out)
    assert out.shape == (B, S_TRG, V_TRG)
    assert bool(jnp.all(out[:, 0, :] == 0.0))

    # Correctness spot-check (no greedy feedback involved yet at t=1).
    ref1 = _reference_first_step_logits(params, src, trg, per_src_length)
    assert float(jnp.max(jnp.abs(out[:, 1, :] - ref1))) < 2e-3

    print("KERNEL_OK")
</pallas_src>

<mosaic_0001>
module attributes {stable_mosaic.version = 11 : i64} {
  func.func @_seq2seq_kernel(%arg0: memref<8x2x96xf32, #tpu.memory_space<vmem>>, %arg1: memref<8x2x1xf32, #tpu.memory_space<vmem>>, %arg2: memref<2x1xi32, #tpu.memory_space<vmem>>, %arg3: memref<32x96xf32, #tpu.memory_space<vmem>>, %arg4: memref<1x96xf32, #tpu.memory_space<vmem>>, %arg5: memref<64x96xf32, #tpu.memory_space<vmem>>, %arg6: memref<32x96xf32, #tpu.memory_space<vmem>>, %arg7: memref<1x96xf32, #tpu.memory_space<vmem>>, %arg8: memref<1x96xf32, #tpu.memory_space<vmem>>, %arg9: memref<32x64xf32, #tpu.memory_space<vmem>>, %arg10: memref<1x64xf32, #tpu.memory_space<vmem>>, %arg11: memref<8x2x64xf32, #tpu.memory_space<vmem>>) attributes {dimension_semantics = [], scalar_prefetch = 0 : i64, scratch_operands = 0 : i64, tpu.core_type = #tpu.core_type<tc>} {
    %c0 = arith.constant 0 : index
    %c0_0 = arith.constant 0 : index
    %0 = vector.load %arg3[%c0, %c0_0] : memref<32x96xf32, #tpu.memory_space<vmem>>, vector<32x96xf32>
    %c0_1 = arith.constant 0 : index
    %c0_2 = arith.constant 0 : index
    %1 = vector.load %arg4[%c0_1, %c0_2] : memref<1x96xf32, #tpu.memory_space<vmem>>, vector<1x96xf32>
    %cst = arith.constant 0.000000e+00 : f32
    %2 = vector.broadcast %cst : f32 to vector<2x32xf32>
    %c0_3 = arith.constant 0 : index
    %c0_4 = arith.constant 0 : index
    %c0_5 = arith.constant 0 : index
    %3 = vector.load %arg0[%c0_3, %c0_4, %c0_5] : memref<8x2x96xf32, #tpu.memory_space<vmem>>, vector<1x2x96xf32>
    %4 = vector.shape_cast %3 : vector<1x2x96xf32> to vector<2x96xf32>
    %cst_6 = arith.constant dense<0.000000e+00> : vector<2x96xf32>
    %5 = tpu.matmul %2, %0, %cst_6 {dimension_numbers = #tpu.dot_dimension_numbers<[1], [0], [0], [1], [0, 0, 1, 1], [], []>, precision = #tpu.contract_precision<fp32>} : vector<2x32xf32>, vector<32x96xf32>, vector<2x96xf32> -> vector<2x96xf32>
    %6 = vector.broadcast %1 : vector<1x96xf32> to vector<2x96xf32>
    %7 = arith.addf %5, %6 : vector<2x96xf32>
    %8 = vector.extract_strided_slice %4 {offsets = [0, 0], sizes = [2, 32], strides = [1, 1]} : vector<2x96xf32> to vector<2x32xf32>
    %9 = vector.extract_strided_slice %7 {offsets = [0, 0], sizes = [2, 32], strides = [1, 1]} : vector<2x96xf32> to vector<2x32xf32>
    %10 = arith.addf %8, %9 : vector<2x32xf32>
    %11 = arith.negf %10 : vector<2x32xf32>
    %12 = math.exp %11 : vector<2x32xf32>
    %cst_7 = arith.constant 1.000000e+00 : f32
    %13 = vector.broadcast %cst_7 : f32 to vector<2x32xf32>
    %14 = arith.addf %13, %12 : vector<2x32xf32>
    %15 = arith.divf %13, %14 : vector<2x32xf32>
    %16 = vector.extract_strided_slice %4 {offsets = [0, 32], sizes = [2, 32], strides = [1, 1]} : vector<2x96xf32> to vector<2x32xf32>
    %17 = vector.extract_strided_slice %7 {offsets = [0, 32], sizes = [2, 32], strides = [1, 1]} : vector<2x96xf32> to vector<2x32xf32>
    %18 = arith.addf %16, %17 : vector<2x32xf32>
    %19 = arith.negf %18 : vector<2x32xf32>
    %20 = math.exp %19 : vector<2x32xf32>
    %cst_8 = arith.constant 1.000000e+00 : f32
    %21 = vector.broadcast %cst_8 : f32 to vector<2x32xf32>
    %22 = arith.addf %21, %20 : vector<2x32xf32>
    %23 = arith.divf %21, %22 : vector<2x32xf32>
    %24 = vector.extract_strided_slice %4 {offsets = [0, 64], sizes = [2, 32], strides = [1, 1]} : vector<2x96xf32> to vector<2x32xf32>
    %25 = vector.extract_strided_slice %7 {offsets = [0, 64], sizes = [2, 32], strides = [1, 1]} : vector<2x96xf32> to vector<2x32xf32>
    %26 = arith.mulf %15, %25 : vector<2x32xf32>
    %27 = arith.addf %24, %26 : vector<2x32xf32>
    %28 = math.tanh %27 : vector<2x32xf32>
    %cst_9 = arith.constant 1.000000e+00 : f32
    %29 = vector.broadcast %cst_9 : f32 to vector<2x32xf32>
    %30 = arith.subf %29, %23 : vector<2x32xf32>
    %31 = arith.mulf %30, %28 : vector<2x32xf32>
    %32 = arith.mulf %23, %2 : vector<2x32xf32>
    %33 = arith.addf %31, %32 : vector<2x32xf32>
    %c0_10 = arith.constant 0 : index
    %c0_11 = arith.constant 0 : index
    %c0_12 = arith.constant 0 : index
    %34 = vector.load %arg1[%c0_10, %c0_11, %c0_12] : memref<8x2x1xf32, #tpu.memory_space<vmem>>, vector<1x2x1xf32>
    %35 = vector.shape_cast %34 : vector<1x2x1xf32> to vector<2x1xf32>
    %36 = vector.broadcast %35 : vector<2x1xf32> to vector<2x32xf32>
    %37 = arith.mulf %36, %33 : vector<2x32xf32>
    %cst_13 = arith.constant 1.000000e+00 : f32
    %38 = vector.broadcast %cst_13 : f32 to vector<2x1xf32>
    %39 = arith.subf %38, %35 : vector<2x1xf32>
    %40 = vector.broadcast %39 : vector<2x1xf32> to vector<2x32xf32>
    %41 = arith.mulf %40, %2 : vector<2x32xf32>
    %42 = arith.addf %37, %41 : vector<2x32xf32>
    %c1 = arith.constant 1 : index
    %c0_14 = arith.constant 0 : index
    %c0_15 = arith.constant 0 : index
    %43 = vector.load %arg0[%c1, %c0_14, %c0_15] : memref<8x2x96xf32, #tpu.memory_space<vmem>>, vector<1x2x96xf32>
    %44 = vector.shape_cast %43 : vector<1x2x96xf32> to vector<2x96xf32>
    %cst_16 = arith.constant dense<0.000000e+00> : vector<2x96xf32>
    %45 = tpu.matmul %42, %0, %cst_16 {dimension_numbers = #tpu.dot_dimension_numbers<[1], [0], [0], [1], [0, 0, 1, 1], [], []>, precision = #tpu.contract_precision<fp32>} : vector<2x32xf32>, vector<32x96xf32>, vector<2x96xf32> -> vector<2x96xf32>
    %46 = vector.broadcast %1 : vector<1x96xf32> to vector<2x96xf32>
    %47 = arith.addf %45, %46 : vector<2x96xf32>
    %48 = vector.extract_strided_slice %44 {offsets = [0, 0], sizes = [2, 32], strides = [1, 1]} : vector<2x96xf32> to vector<2x32xf32>
    %49 = vector.extract_strided_slice %47 {offsets = [0, 0], sizes = [2, 32], strides = [1, 1]} : vector<2x96xf32> to vector<2x32xf32>
    %50 = arith.addf %48, %49 : vector<2x32xf32>
    %51 = arith.negf %50 : vector<2x32xf32>
    %52 = math.exp %51 : vector<2x32xf32>
    %cst_17 = arith.constant 1.000000e+00 : f32
    %53 = vector.broadcast %cst_17 : f32 to vector<2x32xf32>
    %54 = arith.addf %53, %52 : vector<2x32xf32>
    %55 = arith.divf %53, %54 : vector<2x32xf32>
    %56 = vector.extract_strided_slice %44 {offsets = [0, 32], sizes = [2, 32], strides = [1, 1]} : vector<2x96xf32> to vector<2x32xf32>
    %57 = vector.extract_strided_slice %47 {offsets = [0, 32], sizes = [2, 32], strides = [1, 1]} : vector<2x96xf32> to vector<2x32xf32>
    %58 = arith.addf %56, %57 : vector<2x32xf32>
    %59 = arith.negf %58 : vector<2x32xf32>
    %60 = math.exp %59 : vector<2x32xf32>
    %cst_18 = arith.constant 1.000000e+00 : f32
    %61 = vector.broadcast %cst_18 : f32 to vector<2x32xf32>
    %62 = arith.addf %61, %60 : vector<2x32xf32>
    %63 = arith.divf %61, %62 : vector<2x32xf32>
    %64 = vector.extract_strided_slice %44 {offsets = [0, 64], sizes = [2, 32], strides = [1, 1]} : vector<2x96xf32> to vector<2x32xf32>
    %65 = vector.extract_strided_slice %47 {offsets = [0, 64], sizes = [2, 32], strides = [1, 1]} : vector<2x96xf32> to vector<2x32xf32>
    %66 = arith.mulf %55, %65 : vector<2x32xf32>
    %67 = arith.addf %64, %66 : vector<2x32xf32>
    %68 = math.tanh %67 : vector<2x32xf32>
    %cst_19 = arith.constant 1.000000e+00 : f32
    %69 = vector.broadcast %cst_19 : f32 to vector<2x32xf32>
    %70 = arith.subf %69, %63 : vector<2x32xf32>
    %71 = arith.mulf %70, %68 : vector<2x32xf32>
    %72 = arith.mulf %63, %42 : vector<2x32xf32>
    %73 = arith.addf %71, %72 : vector<2x32xf32>
    %c1_20 = arith.constant 1 : index
    %c0_21 = arith.constant 0 : index
    %c0_22 = arith.constant 0 : index
    %74 = vector.load %arg1[%c1_20, %c0_21, %c0_22] : memref<8x2x1xf32, #tpu.memory_space<vmem>>, vector<1x2x1xf32>
    %75 = vector.shape_cast %74 : vector<1x2x1xf32> to vector<2x1xf32>
    %76 = vector.broadcast %75 : vector<2x1xf32> to vector<2x32xf32>
    %77 = arith.mulf %76, %73 : vector<2x32xf32>
    %cst_23 = arith.constant 1.000000e+00 : f32
    %78 = vector.broadcast %cst_23 : f32 to vector<2x1xf32>
    %79 = arith.subf %78, %75 : vector<2x1xf32>
    %80 = vector.broadcast %79 : vector<2x1xf32> to vector<2x32xf32>
    %81 = arith.mulf %80, %42 : vector<2x32xf32>
    %82 = arith.addf %77, %81 : vector<2x32xf32>
    %c2 = arith.constant 2 : index
    %c0_24 = arith.constant 0 : index
    %c0_25 = arith.constant 0 : index
    %83 = vector.load %arg0[%c2, %c0_24, %c0_25] : memref<8x2x96xf32, #tpu.memory_space<vmem>>, vector<1x2x96xf32>
    %84 = vector.shape_cast %83 : vector<1x2x96xf32> to vector<2x96xf32>
    %cst_26 = arith.constant dense<0.000000e+00> : vector<2x96xf32>
    %85 = tpu.matmul %82, %0, %cst_26 {dimension_numbers = #tpu.dot_dimension_numbers<[1], [0], [0], [1], [0, 0, 1, 1], [], []>, precision = #tpu.contract_precision<fp32>} : vector<2x32xf32>, vector<32x96xf32>, vector<2x96xf32> -> vector<2x96xf32>
    %86 = vector.broadcast %1 : vector<1x96xf32> to vector<2x96xf32>
    %87 = arith.addf %85, %86 : vector<2x96xf32>
    %88 = vector.extract_strided_slice %84 {offsets = [0, 0], sizes = [2, 32], strides = [1, 1]} : vector<2x96xf32> to vector<2x32xf32>
    %89 = vector.extract_strided_slice %87 {offsets = [0, 0], sizes = [2, 32], strides = [1, 1]} : vector<2x96xf32> to vector<2x32xf32>
    %90 = arith.addf %88, %89 : vector<2x32xf32>
    %91 = arith.negf %90 : vector<2x32xf32>
    %92 = math.exp %91 : vector<2x32xf32>
    %cst_27 = arith.constant 1.000000e+00 : f32
    %93 = vector.broadcast %cst_27 : f32 to vector<2x32xf32>
    %94 = arith.addf %93, %92 : vector<2x32xf32>
    %95 = arith.divf %93, %94 : vector<2x32xf32>
    %96 = vector.extract_strided_slice %84 {offsets = [0, 32], sizes = [2, 32], strides = [1, 1]} : vector<2x96xf32> to vector<2x32xf32>
    %97 = vector.extract_strided_slice %87 {offsets = [0, 32], sizes = [2, 32], strides = [1, 1]} : vector<2x96xf32> to vector<2x32xf32>
    %98 = arith.addf %96, %97 : vector<2x32xf32>
    %99 = arith.negf %98 : vector<2x32xf32>
    %100 = math.exp %99 : vector<2x32xf32>
    %cst_28 = arith.constant 1.000000e+00 : f32
    %101 = vector.broadcast %cst_28 : f32 to vector<2x32xf32>
    %102 = arith.addf %101, %100 : vector<2x32xf32>
    %103 = arith.divf %101, %102 : vector<2x32xf32>
    %104 = vector.extract_strided_slice %84 {offsets = [0, 64], sizes = [2, 32], strides = [1, 1]} : vector<2x96xf32> to vector<2x32xf32>
    %105 = vector.extract_strided_slice %87 {offsets = [0, 64], sizes = [2, 32], strides = [1, 1]} : vector<2x96xf32> to vector<2x32xf32>
    %106 = arith.mulf %95, %105 : vector<2x32xf32>
    %107 = arith.addf %104, %106 : vector<2x32xf32>
    %108 = math.tanh %107 : vector<2x32xf32>
    %cst_29 = arith.constant 1.000000e+00 : f32
    %109 = vector.broadcast %cst_29 : f32 to vector<2x32xf32>
    %110 = arith.subf %109, %103 : vector<2x32xf32>
    %111 = arith.mulf %110, %108 : vector<2x32xf32>
    %112 = arith.mulf %103, %82 : vector<2x32xf32>
    %113 = arith.addf %111, %112 : vector<2x32xf32>
    %c2_30 = arith.constant 2 : index
    %c0_31 = arith.constant 0 : index
    %c0_32 = arith.constant 0 : index
    %114 = vector.load %arg1[%c2_30, %c0_31, %c0_32] : memref<8x2x1xf32, #tpu.memory_space<vmem>>, vector<1x2x1xf32>
    %115 = vector.shape_cast %114 : vector<1x2x1xf32> to vector<2x1xf32>
    %116 = vector.broadcast %115 : vector<2x1xf32> to vector<2x32xf32>
    %117 = arith.mulf %116, %113 : vector<2x32xf32>
    %cst_33 = arith.constant 1.000000e+00 : f32
    %118 = vector.broadcast %cst_33 : f32 to vector<2x1xf32>
    %119 = arith.subf %118, %115 : vector<2x1xf32>
    %120 = vector.broadcast %119 : vector<2x1xf32> to vector<2x32xf32>
    %121 = arith.mulf %120, %82 : vector<2x32xf32>
    %122 = arith.addf %117, %121 : vector<2x32xf32>
    %c3 = arith.constant 3 : index
    %c0_34 = arith.constant 0 : index
    %c0_35 = arith.constant 0 : index
    %123 = vector.load %arg0[%c3, %c0_34, %c0_35] : memref<8x2x96xf32, #tpu.memory_space<vmem>>, vector<1x2x96xf32>
    %124 = vector.shape_cast %123 : vector<1x2x96xf32> to vector<2x96xf32>
    %cst_36 = arith.constant dense<0.000000e+00> : vector<2x96xf32>
    %125 = tpu.matmul %122, %0, %cst_36 {dimension_numbers = #tpu.dot_dimension_numbers<[1], [0], [0], [1], [0, 0, 1, 1], [], []>, precision = #tpu.contract_precision<fp32>} : vector<2x32xf32>, vector<32x96xf32>, vector<2x96xf32> -> vector<2x96xf32>
    %126 = vector.broadcast %1 : vector<1x96xf32> to vector<2x96xf32>
    %127 = arith.addf %125, %126 : vector<2x96xf32>
    %128 = vector.extract_strided_slice %124 {offsets = [0, 0], sizes = [2, 32], strides = [1, 1]} : vector<2x96xf32> to vector<2x32xf32>
    %129 = vector.extract_strided_slice %127 {offsets = [0, 0], sizes = [2, 32], strides = [1, 1]} : vector<2x96xf32> to vector<2x32xf32>
    %130 = arith.addf %128, %129 : vector<2x32xf32>
    %131 = arith.negf %130 : vector<2x32xf32>
    %132 = math.exp %131 : vector<2x32xf32>
    %cst_37 = arith.constant 1.000000e+00 : f32
    %133 = vector.broadcast %cst_37 : f32 to vector<2x32xf32>
    %134 = arith.addf %133, %132 : vector<2x32xf32>
    %135 = arith.divf %133, %134 : vector<2x32xf32>
    %136 = vector.extract_strided_slice %124 {offsets = [0, 32], sizes = [2, 32], strides = [1, 1]} : vector<2x96xf32> to vector<2x32xf32>
    %137 = vector.extract_strided_slice %127 {offsets = [0, 32], sizes = [2, 32], strides = [1, 1]} : vector<2x96xf32> to vector<2x32xf32>
    %138 = arith.addf %136, %137 : vector<2x32xf32>
    %139 = arith.negf %138 : vector<2x32xf32>
    %140 = math.exp %139 : vector<2x32xf32>
    %cst_38 = arith.constant 1.000000e+00 : f32
    %141 = vector.broadcast %cst_38 : f32 to vector<2x32xf32>
    %142 = arith.addf %141, %140 : vector<2x32xf32>
    %143 = arith.divf %141, %142 : vector<2x32xf32>
    %144 = vector.extract_strided_slice %124 {offsets = [0, 64], sizes = [2, 32], strides = [1, 1]} : vector<2x96xf32> to vector<2x32xf32>
    %145 = vector.extract_strided_slice %127 {offsets = [0, 64], sizes = [2, 32], strides = [1, 1]} : vector<2x96xf32> to vector<2x32xf32>
    %146 = arith.mulf %135, %145 : vector<2x32xf32>
    %147 = arith.addf %144, %146 : vector<2x32xf32>
    %148 = math.tanh %147 : vector<2x32xf32>
    %cst_39 = arith.constant 1.000000e+00 : f32
    %149 = vector.broadcast %cst_39 : f32 to vector<2x32xf32>
    %150 = arith.subf %149, %143 : vector<2x32xf32>
    %151 = arith.mulf %150, %148 : vector<2x32xf32>
    %152 = arith.mulf %143, %122 : vector<2x32xf32>
    %153 = arith.addf %151, %152 : vector<2x32xf32>
    %c3_40 = arith.constant 3 : index
    %c0_41 = arith.constant 0 : index
    %c0_42 = arith.constant 0 : index
    %154 = vector.load %arg1[%c3_40, %c0_41, %c0_42] : memref<8x2x1xf32, #tpu.memory_space<vmem>>, vector<1x2x1xf32>
    %155 = vector.shape_cast %154 : vector<1x2x1xf32> to vector<2x1xf32>
    %156 = vector.broadcast %155 : vector<2x1xf32> to vector<2x32xf32>
    %157 = arith.mulf %156, %153 : vector<2x32xf32>
    %cst_43 = arith.constant 1.000000e+00 : f32
    %158 = vector.broadcast %cst_43 : f32 to vector<2x1xf32>
    %159 = arith.subf %158, %155 : vector<2x1xf32>
    %160 = vector.broadcast %159 : vector<2x1xf32> to vector<2x32xf32>
    %161 = arith.mulf %160, %122 : vector<2x32xf32>
    %162 = arith.addf %157, %161 : vector<2x32xf32>
    %c4 = arith.constant 4 : index
    %c0_44 = arith.constant 0 : index
    %c0_45 = arith.constant 0 : index
    %163 = vector.load %arg0[%c4, %c0_44, %c0_45] : memref<8x2x96xf32, #tpu.memory_space<vmem>>, vector<1x2x96xf32>
    %164 = vector.shape_cast %163 : vector<1x2x96xf32> to vector<2x96xf32>
    %cst_46 = arith.constant dense<0.000000e+00> : vector<2x96xf32>
    %165 = tpu.matmul %162, %0, %cst_46 {dimension_numbers = #tpu.dot_dimension_numbers<[1], [0], [0], [1], [0, 0, 1, 1], [], []>, precision = #tpu.contract_precision<fp32>} : vector<2x32xf32>, vector<32x96xf32>, vector<2x96xf32> -> vector<2x96xf32>
    %166 = vector.broadcast %1 : vector<1x96xf32> to vector<2x96xf32>
    %167 = arith.addf %165, %166 : vector<2x96xf32>
    %168 = vector.extract_strided_slice %164 {offsets = [0, 0], sizes = [2, 32], strides = [1, 1]} : vector<2x96xf32> to vector<2x32xf32>
    %169 = vector.extract_strided_slice %167 {offsets = [0, 0], sizes = [2, 32], strides = [1, 1]} : vector<2x96xf32> to vector<2x32xf32>
    %170 = arith.addf %168, %169 : vector<2x32xf32>
    %171 = arith.negf %170 : vector<2x32xf32>
    %172 = math.exp %171 : vector<2x32xf32>
    %cst_47 = arith.constant 1.000000e+00 : f32
    %173 = vector.broadcast %cst_47 : f32 to vector<2x32xf32>
    %174 = arith.addf %173, %172 : vector<2x32xf32>
    %175 = arith.divf %173, %174 : vector<2x32xf32>
    %176 = vector.extract_strided_slice %164 {offsets = [0, 32], sizes = [2, 32], strides = [1, 1]} : vector<2x96xf32> to vector<2x32xf32>
    %177 = vector.extract_strided_slice %167 {offsets = [0, 32], sizes = [2, 32], strides = [1, 1]} : vector<2x96xf32> to vector<2x32xf32>
    %178 = arith.addf %176, %177 : vector<2x32xf32>
    %179 = arith.negf %178 : vector<2x32xf32>
    %180 = math.exp %179 : vector<2x32xf32>
    %cst_48 = arith.constant 1.000000e+00 : f32
    %181 = vector.broadcast %cst_48 : f32 to vector<2x32xf32>
    %182 = arith.addf %181, %180 : vector<2x32xf32>
    %183 = arith.divf %181, %182 : vector<2x32xf32>
    %184 = vector.extract_strided_slice %164 {offsets = [0, 64], sizes = [2, 32], strides = [1, 1]} : vector<2x96xf32> to vector<2x32xf32>
    %185 = vector.extract_strided_slice %167 {offsets = [0, 64], sizes = [2, 32], strides = [1, 1]} : vector<2x96xf32> to vector<2x32xf32>
    %186 = arith.mulf %175, %185 : vector<2x32xf32>
    %187 = arith.addf %184, %186 : vector<2x32xf32>
    %188 = math.tanh %187 : vector<2x32xf32>
    %cst_49 = arith.constant 1.000000e+00 : f32
    %189 = vector.broadcast %cst_49 : f32 to vector<2x32xf32>
    %190 = arith.subf %189, %183 : vector<2x32xf32>
    %191 = arith.mulf %190, %188 : vector<2x32xf32>
    %192 = arith.mulf %183, %162 : vector<2x32xf32>
    %193 = arith.addf %191, %192 : vector<2x32xf32>
    %c4_50 = arith.constant 4 : index
    %c0_51 = arith.constant 0 : index
    %c0_52 = arith.constant 0 : index
    %194 = vector.load %arg1[%c4_50, %c0_51, %c0_52] : memref<8x2x1xf32, #tpu.memory_space<vmem>>, vector<1x2x1xf32>
    %195 = vector.shape_cast %194 : vector<1x2x1xf32> to vector<2x1xf32>
    %196 = vector.broadcast %195 : vector<2x1xf32> to vector<2x32xf32>
    %197 = arith.mulf %196, %193 : vector<2x32xf32>
    %cst_53 = arith.constant 1.000000e+00 : f32
    %198 = vector.broadcast %cst_53 : f32 to vector<2x1xf32>
    %199 = arith.subf %198, %195 : vector<2x1xf32>
    %200 = vector.broadcast %199 : vector<2x1xf32> to vector<2x32xf32>
    %201 = arith.mulf %200, %162 : vector<2x32xf32>
    %202 = arith.addf %197, %201 : vector<2x32xf32>
    %c5 = arith.constant 5 : index
    %c0_54 = arith.constant 0 : index
    %c0_55 = arith.constant 0 : index
    %203 = vector.load %arg0[%c5, %c0_54, %c0_55] : memref<8x2x96xf32, #tpu.memory_space<vmem>>, vector<1x2x96xf32>
    %204 = vector.shape_cast %203 : vector<1x2x96xf32> to vector<2x96xf32>
    %cst_56 = arith.constant dense<0.000000e+00> : vector<2x96xf32>
    %205 = tpu.matmul %202, %0, %cst_56 {dimension_numbers = #tpu.dot_dimension_numbers<[1], [0], [0], [1], [0, 0, 1, 1], [], []>, precision = #tpu.contract_precision<fp32>} : vector<2x32xf32>, vector<32x96xf32>, vector<2x96xf32> -> vector<2x96xf32>
    %206 = vector.broadcast %1 : vector<1x96xf32> to vector<2x96xf32>
    %207 = arith.addf %205, %206 : vector<2x96xf32>
    %208 = vector.extract_strided_slice %204 {offsets = [0, 0], sizes = [2, 32], strides = [1, 1]} : vector<2x96xf32> to vector<2x32xf32>
    %209 = vector.extract_strided_slice %207 {offsets = [0, 0], sizes = [2, 32], strides = [1, 1]} : vector<2x96xf32> to vector<2x32xf32>
    %210 = arith.addf %208, %209 : vector<2x32xf32>
    %211 = arith.negf %210 : vector<2x32xf32>
    %212 = math.exp %211 : vector<2x32xf32>
    %cst_57 = arith.constant 1.000000e+00 : f32
    %213 = vector.broadcast %cst_57 : f32 to vector<2x32xf32>
    %214 = arith.addf %213, %212 : vector<2x32xf32>
    %215 = arith.divf %213, %214 : vector<2x32xf32>
    %216 = vector.extract_strided_slice %204 {offsets = [0, 32], sizes = [2, 32], strides = [1, 1]} : vector<2x96xf32> to vector<2x32xf32>
    %217 = vector.extract_strided_slice %207 {offsets = [0, 32], sizes = [2, 32], strides = [1, 1]} : vector<2x96xf32> to vector<2x32xf32>
    %218 = arith.addf %216, %217 : vector<2x32xf32>
    %219 = arith.negf %218 : vector<2x32xf32>
    %220 = math.exp %219 : vector<2x32xf32>
    %cst_58 = arith.constant 1.000000e+00 : f32
    %221 = vector.broadcast %cst_58 : f32 to vector<2x32xf32>
    %222 = arith.addf %221, %220 : vector<2x32xf32>
    %223 = arith.divf %221, %222 : vector<2x32xf32>
    %224 = vector.extract_strided_slice %204 {offsets = [0, 64], sizes = [2, 32], strides = [1, 1]} : vector<2x96xf32> to vector<2x32xf32>
    %225 = vector.extract_strided_slice %207 {offsets = [0, 64], sizes = [2, 32], strides = [1, 1]} : vector<2x96xf32> to vector<2x32xf32>
    %226 = arith.mulf %215, %225 : vector<2x32xf32>
    %227 = arith.addf %224, %226 : vector<2x32xf32>
    %228 = math.tanh %227 : vector<2x32xf32>
    %cst_59 = arith.constant 1.000000e+00 : f32
    %229 = vector.broadcast %cst_59 : f32 to vector<2x32xf32>
    %230 = arith.subf %229, %223 : vector<2x32xf32>
    %231 = arith.mulf %230, %228 : vector<2x32xf32>
    %232 = arith.mulf %223, %202 : vector<2x32xf32>
    %233 = arith.addf %231, %232 : vector<2x32xf32>
    %c5_60 = arith.constant 5 : index
    %c0_61 = arith.constant 0 : index
    %c0_62 = arith.constant 0 : index
    %234 = vector.load %arg1[%c5_60, %c0_61, %c0_62] : memref<8x2x1xf32, #tpu.memory_space<vmem>>, vector<1x2x1xf32>
    %235 = vector.shape_cast %234 : vector<1x2x1xf32> to vector<2x1xf32>
    %236 = vector.broadcast %235 : vector<2x1xf32> to vector<2x32xf32>
    %237 = arith.mulf %236, %233 : vector<2x32xf32>
    %cst_63 = arith.constant 1.000000e+00 : f32
    %238 = vector.broadcast %cst_63 : f32 to vector<2x1xf32>
    %239 = arith.subf %238, %235 : vector<2x1xf32>
    %240 = vector.broadcast %239 : vector<2x1xf32> to vector<2x32xf32>
    %241 = arith.mulf %240, %202 : vector<2x32xf32>
    %242 = arith.addf %237, %241 : vector<2x32xf32>
    %c6 = arith.constant 6 : index
    %c0_64 = arith.constant 0 : index
    %c0_65 = arith.constant 0 : index
    %243 = vector.load %arg0[%c6, %c0_64, %c0_65] : memref<8x2x96xf32, #tpu.memory_space<vmem>>, vector<1x2x96xf32>
    %244 = vector.shape_cast %243 : vector<1x2x96xf32> to vector<2x96xf32>
    %cst_66 = arith.constant dense<0.000000e+00> : vector<2x96xf32>
    %245 = tpu.matmul %242, %0, %cst_66 {dimension_numbers = #tpu.dot_dimension_numbers<[1], [0], [0], [1], [0, 0, 1, 1], [], []>, precision = #tpu.contract_precision<fp32>} : vector<2x32xf32>, vector<32x96xf32>, vector<2x96xf32> -> vector<2x96xf32>
    %246 = vector.broadcast %1 : vector<1x96xf32> to vector<2x96xf32>
    %247 = arith.addf %245, %246 : vector<2x96xf32>
    %248 = vector.extract_strided_slice %244 {offsets = [0, 0], sizes = [2, 32], strides = [1, 1]} : vector<2x96xf32> to vector<2x32xf32>
    %249 = vector.extract_strided_slice %247 {offsets = [0, 0], sizes = [2, 32], strides = [1, 1]} : vector<2x96xf32> to vector<2x32xf32>
    %250 = arith.addf %248, %249 : vector<2x32xf32>
    %251 = arith.negf %250 : vector<2x32xf32>
    %252 = math.exp %251 : vector<2x32xf32>
    %cst_67 = arith.constant 1.000000e+00 : f32
    %253 = vector.broadcast %cst_67 : f32 to vector<2x32xf32>
    %254 = arith.addf %253, %252 : vector<2x32xf32>
    %255 = arith.divf %253, %254 : vector<2x32xf32>
    %256 = vector.extract_strided_slice %244 {offsets = [0, 32], sizes = [2, 32], strides = [1, 1]} : vector<2x96xf32> to vector<2x32xf32>
    %257 = vector.extract_strided_slice %247 {offsets = [0, 32], sizes = [2, 32], strides = [1, 1]} : vector<2x96xf32> to vector<2x32xf32>
    %258 = arith.addf %256, %257 : vector<2x32xf32>
    %259 = arith.negf %258 : vector<2x32xf32>
    %260 = math.exp %259 : vector<2x32xf32>
    %cst_68 = arith.constant 1.000000e+00 : f32
    %261 = vector.broadcast %cst_68 : f32 to vector<2x32xf32>
    %262 = arith.addf %261, %260 : vector<2x32xf32>
    %263 = arith.divf %261, %262 : vector<2x32xf32>
    %264 = vector.extract_strided_slice %244 {offsets = [0, 64], sizes = [2, 32], strides = [1, 1]} : vector<2x96xf32> to vector<2x32xf32>
    %265 = vector.extract_strided_slice %247 {offsets = [0, 64], sizes = [2, 32], strides = [1, 1]} : vector<2x96xf32> to vector<2x32xf32>
    %266 = arith.mulf %255, %265 : vector<2x32xf32>
    %267 = arith.addf %264, %266 : vector<2x32xf32>
    %268 = math.tanh %267 : vector<2x32xf32>
    %cst_69 = arith.constant 1.000000e+00 : f32
    %269 = vector.broadcast %cst_69 : f32 to vector<2x32xf32>
    %270 = arith.subf %269, %263 : vector<2x32xf32>
    %271 = arith.mulf %270, %268 : vector<2x32xf32>
    %272 = arith.mulf %263, %242 : vector<2x32xf32>
    %273 = arith.addf %271, %272 : vector<2x32xf32>
    %c6_70 = arith.constant 6 : index
    %c0_71 = arith.constant 0 : index
    %c0_72 = arith.constant 0 : index
    %274 = vector.load %arg1[%c6_70, %c0_71, %c0_72] : memref<8x2x1xf32, #tpu.memory_space<vmem>>, vector<1x2x1xf32>
    %275 = vector.shape_cast %274 : vector<1x2x1xf32> to vector<2x1xf32>
    %276 = vector.broadcast %275 : vector<2x1xf32> to vector<2x32xf32>
    %277 = arith.mulf %276, %273 : vector<2x32xf32>
    %cst_73 = arith.constant 1.000000e+00 : f32
    %278 = vector.broadcast %cst_73 : f32 to vector<2x1xf32>
    %279 = arith.subf %278, %275 : vector<2x1xf32>
    %280 = vector.broadcast %279 : vector<2x1xf32> to vector<2x32xf32>
    %281 = arith.mulf %280, %242 : vector<2x32xf32>
    %282 = arith.addf %277, %281 : vector<2x32xf32>
    %c7 = arith.constant 7 : index
    %c0_74 = arith.constant 0 : index
    %c0_75 = arith.constant 0 : index
    %283 = vector.load %arg0[%c7, %c0_74, %c0_75] : memref<8x2x96xf32, #tpu.memory_space<vmem>>, vector<1x2x96xf32>
    %284 = vector.shape_cast %283 : vector<1x2x96xf32> to vector<2x96xf32>
    %cst_76 = arith.constant dense<0.000000e+00> : vector<2x96xf32>
    %285 = tpu.matmul %282, %0, %cst_76 {dimension_numbers = #tpu.dot_dimension_numbers<[1], [0], [0], [1], [0, 0, 1, 1], [], []>, precision = #tpu.contract_precision<fp32>} : vector<2x32xf32>, vector<32x96xf32>, vector<2x96xf32> -> vector<2x96xf32>
    %286 = vector.broadcast %1 : vector<1x96xf32> to vector<2x96xf32>
    %287 = arith.addf %285, %286 : vector<2x96xf32>
    %288 = vector.extract_strided_slice %284 {offsets = [0, 0], sizes = [2, 32], strides = [1, 1]} : vector<2x96xf32> to vector<2x32xf32>
    %289 = vector.extract_strided_slice %287 {offsets = [0, 0], sizes = [2, 32], strides = [1, 1]} : vector<2x96xf32> to vector<2x32xf32>
    %290 = arith.addf %288, %289 : vector<2x32xf32>
    %291 = arith.negf %290 : vector<2x32xf32>
    %292 = math.exp %291 : vector<2x32xf32>
    %cst_77 = arith.constant 1.000000e+00 : f32
    %293 = vector.broadcast %cst_77 : f32 to vector<2x32xf32>
    %294 = arith.addf %293, %292 : vector<2x32xf32>
    %295 = arith.divf %293, %294 : vector<2x32xf32>
    %296 = vector.extract_strided_slice %284 {offsets = [0, 32], sizes = [2, 32], strides = [1, 1]} : vector<2x96xf32> to vector<2x32xf32>
    %297 = vector.extract_strided_slice %287 {offsets = [0, 32], sizes = [2, 32], strides = [1, 1]} : vector<2x96xf32> to vector<2x32xf32>
    %298 = arith.addf %296, %297 : vector<2x32xf32>
    %299 = arith.negf %298 : vector<2x32xf32>
    %300 = math.exp %299 : vector<2x32xf32>
    %cst_78 = arith.constant 1.000000e+00 : f32
    %301 = vector.broadcast %cst_78 : f32 to vector<2x32xf32>
    %302 = arith.addf %301, %300 : vector<2x32xf32>
    %303 = arith.divf %301, %302 : vector<2x32xf32>
    %304 = vector.extract_strided_slice %284 {offsets = [0, 64], sizes = [2, 32], strides = [1, 1]} : vector<2x96xf32> to vector<2x32xf32>
    %305 = vector.extract_strided_slice %287 {offsets = [0, 64], sizes = [2, 32], strides = [1, 1]} : vector<2x96xf32> to vector<2x32xf32>
    %306 = arith.mulf %295, %305 : vector<2x32xf32>
    %307 = arith.addf %304, %306 : vector<2x32xf32>
    %308 = math.tanh %307 : vector<2x32xf32>
    %cst_79 = arith.constant 1.000000e+00 : f32
    %309 = vector.broadcast %cst_79 : f32 to vector<2x32xf32>
    %310 = arith.subf %309, %303 : vector<2x32xf32>
    %311 = arith.mulf %310, %308 : vector<2x32xf32>
    %312 = arith.mulf %303, %282 : vector<2x32xf32>
    %313 = arith.addf %311, %312 : vector<2x32xf32>
    %c7_80 = arith.constant 7 : index
    %c0_81 = arith.constant 0 : index
    %c0_82 = arith.constant 0 : index
    %314 = vector.load %arg1[%c7_80, %c0_81, %c0_82] : memref<8x2x1xf32, #tpu.memory_space<vmem>>, vector<1x2x1xf32>
    %315 = vector.shape_cast %314 : vector<1x2x1xf32> to vector<2x1xf32>
    %316 = vector.broadcast %315 : vector<2x1xf32> to vector<2x32xf32>
    %317 = arith.mulf %316, %313 : vector<2x32xf32>
    %cst_83 = arith.constant 1.000000e+00 : f32
    %318 = vector.broadcast %cst_83 : f32 to vector<2x1xf32>
    %319 = arith.subf %318, %315 : vector<2x1xf32>
    %320 = vector.broadcast %319 : vector<2x1xf32> to vector<2x32xf32>
    %321 = arith.mulf %320, %282 : vector<2x32xf32>
    %322 = arith.addf %317, %321 : vector<2x32xf32>
    %c0_84 = arith.constant 0 : index
    %c0_85 = arith.constant 0 : index
    %323 = vector.load %arg5[%c0_84, %c0_85] : memref<64x96xf32, #tpu.memory_space<vmem>>, vector<64x96xf32>
    %c0_86 = arith.constant 0 : index
    %c0_87 = arith.constant 0 : index
    %324 = vector.load %arg6[%c0_86, %c0_87] : memref<32x96xf32, #tpu.memory_space<vmem>>, vector<32x96xf32>
    %c0_88 = arith.constant 0 : index
    %c0_89 = arith.constant 0 : index
    %325 = vector.load %arg7[%c0_88, %c0_89] : memref<1x96xf32, #tpu.memory_space<vmem>>, vector<1x96xf32>
    %c0_90 = arith.constant 0 : index
    %c0_91 = arith.constant 0 : index
    %326 = vector.load %arg8[%c0_90, %c0_91] : memref<1x96xf32, #tpu.memory_space<vmem>>, vector<1x96xf32>
    %c0_92 = arith.constant 0 : index
    %c0_93 = arith.constant 0 : index
    %327 = vector.load %arg9[%c0_92, %c0_93] : memref<32x64xf32, #tpu.memory_space<vmem>>, vector<32x64xf32>
    %c0_94 = arith.constant 0 : index
    %c0_95 = arith.constant 0 : index
    %328 = vector.load %arg10[%c0_94, %c0_95] : memref<1x64xf32, #tpu.memory_space<vmem>>, vector<1x64xf32>
    %329 = tpu.iota {dimensions = array<i32: 1>} : vector<2x64xi32>
    %330 = arith.sitofp %329 : vector<2x64xi32> to vector<2x64xf32>
    %c0_96 = arith.constant 0 : index
    %c0_97 = arith.constant 0 : index
    %331 = vector.load %arg2[%c0_96, %c0_97] : memref<2x1xi32, #tpu.memory_space<vmem>>, vector<2x1xi32>
    %332 = vector.broadcast %331 : vector<2x1xi32> to vector<2x64xi32>
    %333 = arith.cmpi eq, %329, %332 : vector<2x64xi32>
    %334 = arith.extui %333 : vector<2x64xi1> to vector<2x64xi32>
    %335 = arith.sitofp %334 : vector<2x64xi32> to vector<2x64xf32>
    %cst_98 = arith.constant 0.000000e+00 : f32
    %336 = vector.broadcast %cst_98 : f32 to vector<2x64xf32>
    %c0_99 = arith.constant 0 : index
    %c0_100 = arith.constant 0 : index
    %c0_101 = arith.constant 0 : index
    %337 = vector.load %arg11[%c0_99, %c0_100, %c0_101] : memref<8x2x64xf32, #tpu.memory_space<vmem>>, vector<1x2x64xf32>
    %338 = vector.shape_cast %337 : vector<1x2x64xf32> to vector<2x64xf32>
    %339 = vector.shape_cast %336 : vector<2x64xf32> to vector<1x2x64xf32>
    tpu.vector_store %arg11[%c0_99, %c0_100, %c0_101], %339 {strides = array<i32>} : memref<8x2x64xf32, #tpu.memory_space<vmem>>, vector<1x2x64xf32>,
    %cst_102 = arith.constant dense<0.000000e+00> : vector<2x96xf32>
    %340 = tpu.matmul %335, %323, %cst_102 {dimension_numbers = #tpu.dot_dimension_numbers<[1], [0], [0], [1], [0, 0, 1, 1], [], []>, precision = #tpu.contract_precision<fp32>} : vector<2x64xf32>, vector<64x96xf32>, vector<2x96xf32> -> vector<2x96xf32>
    %341 = vector.broadcast %325 : vector<1x96xf32> to vector<2x96xf32>
    %342 = arith.addf %340, %341 : vector<2x96xf32>
    %cst_103 = arith.constant dense<0.000000e+00> : vector<2x96xf32>
    %343 = tpu.matmul %322, %324, %cst_103 {dimension_numbers = #tpu.dot_dimension_numbers<[1], [0], [0], [1], [0, 0, 1, 1], [], []>, precision = #tpu.contract_precision<fp32>} : vector<2x32xf32>, vector<32x96xf32>, vector<2x96xf32> -> vector<2x96xf32>
    %344 = vector.broadcast %326 : vector<1x96xf32> to vector<2x96xf32>
    %345 = arith.addf %343, %344 : vector<2x96xf32>
    %346 = vector.extract_strided_slice %342 {offsets = [0, 0], sizes = [2, 32], strides = [1, 1]} : vector<2x96xf32> to vector<2x32xf32>
    %347 = vector.extract_strided_slice %345 {offsets = [0, 0], sizes = [2, 32], strides = [1, 1]} : vector<2x96xf32> to vector<2x32xf32>
    %348 = arith.addf %346, %347 : vector<2x32xf32>
    %349 = arith.negf %348 : vector<2x32xf32>
    %350 = math.exp %349 : vector<2x32xf32>
    %cst_104 = arith.constant 1.000000e+00 : f32
    %351 = vector.broadcast %cst_104 : f32 to vector<2x32xf32>
    %352 = arith.addf %351, %350 : vector<2x32xf32>
    %353 = arith.divf %351, %352 : vector<2x32xf32>
    %354 = vector.extract_strided_slice %342 {offsets = [0, 32], sizes = [2, 32], strides = [1, 1]} : vector<2x96xf32> to vector<2x32xf32>
    %355 = vector.extract_strided_slice %345 {offsets = [0, 32], sizes = [2, 32], strides = [1, 1]} : vector<2x96xf32> to vector<2x32xf32>
    %356 = arith.addf %354, %355 : vector<2x32xf32>
    %357 = arith.negf %356 : vector<2x32xf32>
    %358 = math.exp %357 : vector<2x32xf32>
    %cst_105 = arith.constant 1.000000e+00 : f32
    %359 = vector.broadcast %cst_105 : f32 to vector<2x32xf32>
    %360 = arith.addf %359, %358 : vector<2x32xf32>
    %361 = arith.divf %359, %360 : vector<2x32xf32>
    %362 = vector.extract_strided_slice %342 {offsets = [0, 64], sizes = [2, 32], strides = [1, 1]} : vector<2x96xf32> to vector<2x32xf32>
    %363 = vector.extract_strided_slice %345 {offsets = [0, 64], sizes = [2, 32], strides = [1, 1]} : vector<2x96xf32> to vector<2x32xf32>
    %364 = arith.mulf %353, %363 : vector<2x32xf32>
    %365 = arith.addf %362, %364 : vector<2x32xf32>
    %366 = math.tanh %365 : vector<2x32xf32>
    %cst_106 = arith.constant 1.000000e+00 : f32
    %367 = vector.broadcast %cst_106 : f32 to vector<2x32xf32>
    %368 = arith.subf %367, %361 : vector<2x32xf32>
    %369 = arith.mulf %368, %366 : vector<2x32xf32>
    %370 = arith.mulf %361, %322 : vector<2x32xf32>
    %371 = arith.addf %369, %370 : vector<2x32xf32>
    %cst_107 = arith.constant dense<0.000000e+00> : vector<2x64xf32>
    %372 = tpu.matmul %371, %327, %cst_107 {dimension_numbers = #tpu.dot_dimension_numbers<[1], [0], [0], [1], [0, 0, 1, 1], [], []>, precision = #tpu.contract_precision<fp32>} : vector<2x32xf32>, vector<32x64xf32>, vector<2x64xf32> -> vector<2x64xf32>
    %373 = vector.broadcast %328 : vector<1x64xf32> to vector<2x64xf32>
    %374 = arith.addf %372, %373 : vector<2x64xf32>
    %c1_108 = arith.constant 1 : index
    %c0_109 = arith.constant 0 : index
    %c0_110 = arith.constant 0 : index
    %375 = vector.load %arg11[%c1_108, %c0_109, %c0_110] : memref<8x2x64xf32, #tpu.memory_space<vmem>>, vector<1x2x64xf32>
    %376 = vector.shape_cast %375 : vector<1x2x64xf32> to vector<2x64xf32>
    %377 = vector.shape_cast %374 : vector<2x64xf32> to vector<1x2x64xf32>
    tpu.vector_store %arg11[%c1_108, %c0_109, %c0_110], %377 {strides = array<i32>} : memref<8x2x64xf32, #tpu.memory_space<vmem>>, vector<1x2x64xf32>,
    %cst_111 = arith.constant dense<0xFF800000> : vector<2xf32>
    %378 = vector.multi_reduction <maximumf>, %374, %cst_111 [1] : vector<2x64xf32> to vector<2xf32>
    %379 = vector.shape_cast %378 : vector<2xf32> to vector<2x1xf32>
    %380 = vector.broadcast %379 : vector<2x1xf32> to vector<2x64xf32>
    %381 = arith.cmpf oeq, %374, %380 : vector<2x64xf32>
    %cst_112 = arith.constant 6.400000e+01 : f32
    %382 = vector.broadcast %cst_112 : f32 to vector<2x64xf32>
    %383 = arith.select %381, %330, %382 : vector<2x64xi1>, vector<2x64xf32>
    %cst_113 = arith.constant dense<0x7F800000> : vector<2xf32>
    %384 = vector.multi_reduction <minimumf>, %383, %cst_113 [1] : vector<2x64xf32> to vector<2xf32>
    %385 = vector.shape_cast %384 : vector<2xf32> to vector<2x1xf32>
    %386 = vector.broadcast %385 : vector<2x1xf32> to vector<2x64xf32>
    %387 = arith.cmpf oeq, %330, %386 : vector<2x64xf32>
    %388 = arith.extui %387 : vector<2x64xi1> to vector<2x64xi32>
    %389 = arith.sitofp %388 : vector<2x64xi32> to vector<2x64xf32>
    %cst_114 = arith.constant dense<0.000000e+00> : vector<2x96xf32>
    %390 = tpu.matmul %389, %323, %cst_114 {dimension_numbers = #tpu.dot_dimension_numbers<[1], [0], [0], [1], [0, 0, 1, 1], [], []>, precision = #tpu.contract_precision<fp32>} : vector<2x64xf32>, vector<64x96xf32>, vector<2x96xf32> -> vector<2x96xf32>
    %391 = vector.broadcast %325 : vector<1x96xf32> to vector<2x96xf32>
    %392 = arith.addf %390, %391 : vector<2x96xf32>
    %cst_115 = arith.constant dense<0.000000e+00> : vector<2x96xf32>
    %393 = tpu.matmul %371, %324, %cst_115 {dimension_numbers = #tpu.dot_dimension_numbers<[1], [0], [0], [1], [0, 0, 1, 1], [], []>, precision = #tpu.contract_precision<fp32>} : vector<2x32xf32>, vector<32x96xf32>, vector<2x96xf32> -> vector<2x96xf32>
    %394 = vector.broadcast %326 : vector<1x96xf32> to vector<2x96xf32>
    %395 = arith.addf %393, %394 : vector<2x96xf32>
    %396 = vector.extract_strided_slice %392 {offsets = [0, 0], sizes = [2, 32], strides = [1, 1]} : vector<2x96xf32> to vector<2x32xf32>
    %397 = vector.extract_strided_slice %395 {offsets = [0, 0], sizes = [2, 32], strides = [1, 1]} : vector<2x96xf32> to vector<2x32xf32>
    %398 = arith.addf %396, %397 : vector<2x32xf32>
    %399 = arith.negf %398 : vector<2x32xf32>
    %400 = math.exp %399 : vector<2x32xf32>
    %cst_116 = arith.constant 1.000000e+00 : f32
    %401 = vector.broadcast %cst_116 : f32 to vector<2x32xf32>
    %402 = arith.addf %401, %400 : vector<2x32xf32>
    %403 = arith.divf %401, %402 : vector<2x32xf32>
    %404 = vector.extract_strided_slice %392 {offsets = [0, 32], sizes = [2, 32], strides = [1, 1]} : vector<2x96xf32> to vector<2x32xf32>
    %405 = vector.extract_strided_slice %395 {offsets = [0, 32], sizes = [2, 32], strides = [1, 1]} : vector<2x96xf32> to vector<2x32xf32>
    %406 = arith.addf %404, %405 : vector<2x32xf32>
    %407 = arith.negf %406 : vector<2x32xf32>
    %408 = math.exp %407 : vector<2x32xf32>
    %cst_117 = arith.constant 1.000000e+00 : f32
    %409 = vector.broadcast %cst_117 : f32 to vector<2x32xf32>
    %410 = arith.addf %409, %408 : vector<2x32xf32>
    %411 = arith.divf %409, %410 : vector<2x32xf32>
    %412 = vector.extract_strided_slice %392 {offsets = [0, 64], sizes = [2, 32], strides = [1, 1]} : vector<2x96xf32> to vector<2x32xf32>
    %413 = vector.extract_strided_slice %395 {offsets = [0, 64], sizes = [2, 32], strides = [1, 1]} : vector<2x96xf32> to vector<2x32xf32>
    %414 = arith.mulf %403, %413 : vector<2x32xf32>
    %415 = arith.addf %412, %414 : vector<2x32xf32>
    %416 = math.tanh %415 : vector<2x32xf32>
    %cst_118 = arith.constant 1.000000e+00 : f32
    %417 = vector.broadcast %cst_118 : f32 to vector<2x32xf32>
    %418 = arith.subf %417, %411 : vector<2x32xf32>
    %419 = arith.mulf %418, %416 : vector<2x32xf32>
    %420 = arith.mulf %411, %371 : vector<2x32xf32>
    %421 = arith.addf %419, %420 : vector<2x32xf32>
    %cst_119 = arith.constant dense<0.000000e+00> : vector<2x64xf32>
    %422 = tpu.matmul %421, %327, %cst_119 {dimension_numbers = #tpu.dot_dimension_numbers<[1], [0], [0], [1], [0, 0, 1, 1], [], []>, precision = #tpu.contract_precision<fp32>} : vector<2x32xf32>, vector<32x64xf32>, vector<2x64xf32> -> vector<2x64xf32>
    %423 = vector.broadcast %328 : vector<1x64xf32> to vector<2x64xf32>
    %424 = arith.addf %422, %423 : vector<2x64xf32>
    %c2_120 = arith.constant 2 : index
    %c0_121 = arith.constant 0 : index
    %c0_122 = arith.constant 0 : index
    %425 = vector.load %arg11[%c2_120, %c0_121, %c0_122] : memref<8x2x64xf32, #tpu.memory_space<vmem>>, vector<1x2x64xf32>
    %426 = vector.shape_cast %425 : vector<1x2x64xf32> to vector<2x64xf32>
    %427 = vector.shape_cast %424 : vector<2x64xf32> to vector<1x2x64xf32>
    tpu.vector_store %arg11[%c2_120, %c0_121, %c0_122], %427 {strides = array<i32>} : memref<8x2x64xf32, #tpu.memory_space<vmem>>, vector<1x2x64xf32>,
    %cst_123 = arith.constant dense<0xFF800000> : vector<2xf32>
    %428 = vector.multi_reduction <maximumf>, %424, %cst_123 [1] : vector<2x64xf32> to vector<2xf32>
    %429 = vector.shape_cast %428 : vector<2xf32> to vector<2x1xf32>
    %430 = vector.broadcast %429 : vector<2x1xf32> to vector<2x64xf32>
    %431 = arith.cmpf oeq, %424, %430 : vector<2x64xf32>
    %cst_124 = arith.constant 6.400000e+01 : f32
    %432 = vector.broadcast %cst_124 : f32 to vector<2x64xf32>
    %433 = arith.select %431, %330, %432 : vector<2x64xi1>, vector<2x64xf32>
    %cst_125 = arith.constant dense<0x7F800000> : vector<2xf32>
    %434 = vector.multi_reduction <minimumf>, %433, %cst_125 [1] : vector<2x64xf32> to vector<2xf32>
    %435 = vector.shape_cast %434 : vector<2xf32> to vector<2x1xf32>
    %436 = vector.broadcast %435 : vector<2x1xf32> to vector<2x64xf32>
    %437 = arith.cmpf oeq, %330, %436 : vector<2x64xf32>
    %438 = arith.extui %437 : vector<2x64xi1> to vector<2x64xi32>
    %439 = arith.sitofp %438 : vector<2x64xi32> to vector<2x64xf32>
    %cst_126 = arith.constant dense<0.000000e+00> : vector<2x96xf32>
    %440 = tpu.matmul %439, %323, %cst_126 {dimension_numbers = #tpu.dot_dimension_numbers<[1], [0], [0], [1], [0, 0, 1, 1], [], []>, precision = #tpu.contract_precision<fp32>} : vector<2x64xf32>, vector<64x96xf32>, vector<2x96xf32> -> vector<2x96xf32>
    %441 = vector.broadcast %325 : vector<1x96xf32> to vector<2x96xf32>
    %442 = arith.addf %440, %441 : vector<2x96xf32>
    %cst_127 = arith.constant dense<0.000000e+00> : vector<2x96xf32>
    %443 = tpu.matmul %421, %324, %cst_127 {dimension_numbers = #tpu.dot_dimension_numbers<[1], [0], [0], [1], [0, 0, 1, 1], [], []>, precision = #tpu.contract_precision<fp32>} : vector<2x32xf32>, vector<32x96xf32>, vector<2x96xf32> -> vector<2x96xf32>
    %444 = vector.broadcast %326 : vector<1x96xf32> to vector<2x96xf32>
    %445 = arith.addf %443, %444 : vector<2x96xf32>
    %446 = vector.extract_strided_slice %442 {offsets = [0, 0], sizes = [2, 32], strides = [1, 1]} : vector<2x96xf32> to vector<2x32xf32>
    %447 = vector.extract_strided_slice %445 {offsets = [0, 0], sizes = [2, 32], strides = [1, 1]} : vector<2x96xf32> to vector<2x32xf32>
    %448 = arith.addf %446, %447 : vector<2x32xf32>
    %449 = arith.negf %448 : vector<2x32xf32>
    %450 = math.exp %449 : vector<2x32xf32>
    %cst_128 = arith.constant 1.000000e+00 : f32
    %451 = vector.broadcast %cst_128 : f32 to vector<2x32xf32>
    %452 = arith.addf %451, %450 : vector<2x32xf32>
    %453 = arith.divf %451, %452 : vector<2x32xf32>
    %454 = vector.extract_strided_slice %442 {offsets = [0, 32], sizes = [2, 32], strides = [1, 1]} : vector<2x96xf32> to vector<2x32xf32>
    %455 = vector.extract_strided_slice %445 {offsets = [0, 32], sizes = [2, 32], strides = [1, 1]} : vector<2x96xf32> to vector<2x32xf32>
    %456 = arith.addf %454, %455 : vector<2x32xf32>
    %457 = arith.negf %456 : vector<2x32xf32>
    %458 = math.exp %457 : vector<2x32xf32>
    %cst_129 = arith.constant 1.000000e+00 : f32
    %459 = vector.broadcast %cst_129 : f32 to vector<2x32xf32>
    %460 = arith.addf %459, %458 : vector<2x32xf32>
    %461 = arith.divf %459, %460 : vector<2x32xf32>
    %462 = vector.extract_strided_slice %442 {offsets = [0, 64], sizes = [2, 32], strides = [1, 1]} : vector<2x96xf32> to vector<2x32xf32>
    %463 = vector.extract_strided_slice %445 {offsets = [0, 64], sizes = [2, 32], strides = [1, 1]} : vector<2x96xf32> to vector<2x32xf32>
    %464 = arith.mulf %453, %463 : vector<2x32xf32>
    %465 = arith.addf %462, %464 : vector<2x32xf32>
    %466 = math.tanh %465 : vector<2x32xf32>
    %cst_130 = arith.constant 1.000000e+00 : f32
    %467 = vector.broadcast %cst_130 : f32 to vector<2x32xf32>
    %468 = arith.subf %467, %461 : vector<2x32xf32>
    %469 = arith.mulf %468, %466 : vector<2x32xf32>
    %470 = arith.mulf %461, %421 : vector<2x32xf32>
    %471 = arith.addf %469, %470 : vector<2x32xf32>
    %cst_131 = arith.constant dense<0.000000e+00> : vector<2x64xf32>
    %472 = tpu.matmul %471, %327, %cst_131 {dimension_numbers = #tpu.dot_dimension_numbers<[1], [0], [0], [1], [0, 0, 1, 1], [], []>, precision = #tpu.contract_precision<fp32>} : vector<2x32xf32>, vector<32x64xf32>, vector<2x64xf32> -> vector<2x64xf32>
    %473 = vector.broadcast %328 : vector<1x64xf32> to vector<2x64xf32>
    %474 = arith.addf %472, %473 : vector<2x64xf32>
    %c3_132 = arith.constant 3 : index
    %c0_133 = arith.constant 0 : index
    %c0_134 = arith.constant 0 : index
    %475 = vector.load %arg11[%c3_132, %c0_133, %c0_134] : memref<8x2x64xf32, #tpu.memory_space<vmem>>, vector<1x2x64xf32>
    %476 = vector.shape_cast %475 : vector<1x2x64xf32> to vector<2x64xf32>
    %477 = vector.shape_cast %474 : vector<2x64xf32> to vector<1x2x64xf32>
    tpu.vector_store %arg11[%c3_132, %c0_133, %c0_134], %477 {strides = array<i32>} : memref<8x2x64xf32, #tpu.memory_space<vmem>>, vector<1x2x64xf32>,
    %cst_135 = arith.constant dense<0xFF800000> : vector<2xf32>
    %478 = vector.multi_reduction <maximumf>, %474, %cst_135 [1] : vector<2x64xf32> to vector<2xf32>
    %479 = vector.shape_cast %478 : vector<2xf32> to vector<2x1xf32>
    %480 = vector.broadcast %479 : vector<2x1xf32> to vector<2x64xf32>
    %481 = arith.cmpf oeq, %474, %480 : vector<2x64xf32>
    %cst_136 = arith.constant 6.400000e+01 : f32
    %482 = vector.broadcast %cst_136 : f32 to vector<2x64xf32>
    %483 = arith.select %481, %330, %482 : vector<2x64xi1>, vector<2x64xf32>
    %cst_137 = arith.constant dense<0x7F800000> : vector<2xf32>
    %484 = vector.multi_reduction <minimumf>, %483, %cst_137 [1] : vector<2x64xf32> to vector<2xf32>
    %485 = vector.shape_cast %484 : vector<2xf32> to vector<2x1xf32>
    %486 = vector.broadcast %485 : vector<2x1xf32> to vector<2x64xf32>
    %487 = arith.cmpf oeq, %330, %486 : vector<2x64xf32>
    %488 = arith.extui %487 : vector<2x64xi1> to vector<2x64xi32>
    %489 = arith.sitofp %488 : vector<2x64xi32> to vector<2x64xf32>
    %cst_138 = arith.constant dense<0.000000e+00> : vector<2x96xf32>
    %490 = tpu.matmul %489, %323, %cst_138 {dimension_numbers = #tpu.dot_dimension_numbers<[1], [0], [0], [1], [0, 0, 1, 1], [], []>, precision = #tpu.contract_precision<fp32>} : vector<2x64xf32>, vector<64x96xf32>, vector<2x96xf32> -> vector<2x96xf32>
    %491 = vector.broadcast %325 : vector<1x96xf32> to vector<2x96xf32>
    %492 = arith.addf %490, %491 : vector<2x96xf32>
    %cst_139 = arith.constant dense<0.000000e+00> : vector<2x96xf32>
    %493 = tpu.matmul %471, %324, %cst_139 {dimension_numbers = #tpu.dot_dimension_numbers<[1], [0], [0], [1], [0, 0, 1, 1], [], []>, precision = #tpu.contract_precision<fp32>} : vector<2x32xf32>, vector<32x96xf32>, vector<2x96xf32> -> vector<2x96xf32>
    %494 = vector.broadcast %326 : vector<1x96xf32> to vector<2x96xf32>
    %495 = arith.addf %493, %494 : vector<2x96xf32>
    %496 = vector.extract_strided_slice %492 {offsets = [0, 0], sizes = [2, 32], strides = [1, 1]} : vector<2x96xf32> to vector<2x32xf32>
    %497 = vector.extract_strided_slice %495 {offsets = [0, 0], sizes = [2, 32], strides = [1, 1]} : vector<2x96xf32> to vector<2x32xf32>
    %498 = arith.addf %496, %497 : vector<2x32xf32>
    %499 = arith.negf %498 : vector<2x32xf32>
    %500 = math.exp %499 : vector<2x32xf32>
    %cst_140 = arith.constant 1.000000e+00 : f32
    %501 = vector.broadcast %cst_140 : f32 to vector<2x32xf32>
    %502 = arith.addf %501, %500 : vector<2x32xf32>
    %503 = arith.divf %501, %502 : vector<2x32xf32>
    %504 = vector.extract_strided_slice %492 {offsets = [0, 32], sizes = [2, 32], strides = [1, 1]} : vector<2x96xf32> to vector<2x32xf32>
    %505 = vector.extract_strided_slice %495 {offsets = [0, 32], sizes = [2, 32], strides = [1, 1]} : vector<2x96xf32> to vector<2x32xf32>
    %506 = arith.addf %504, %505 : vector<2x32xf32>
    %507 = arith.negf %506 : vector<2x32xf32>
    %508 = math.exp %507 : vector<2x32xf32>
    %cst_141 = arith.constant 1.000000e+00 : f32
    %509 = vector.broadcast %cst_141 : f32 to vector<2x32xf32>
    %510 = arith.addf %509, %508 : vector<2x32xf32>
    %511 = arith.divf %509, %510 : vector<2x32xf32>
    %512 = vector.extract_strided_slice %492 {offsets = [0, 64], sizes = [2, 32], strides = [1, 1]} : vector<2x96xf32> to vector<2x32xf32>
    %513 = vector.extract_strided_slice %495 {offsets = [0, 64], sizes = [2, 32], strides = [1, 1]} : vector<2x96xf32> to vector<2x32xf32>
    %514 = arith.mulf %503, %513 : vector<2x32xf32>
    %515 = arith.addf %512, %514 : vector<2x32xf32>
    %516 = math.tanh %515 : vector<2x32xf32>
    %cst_142 = arith.constant 1.000000e+00 : f32
    %517 = vector.broadcast %cst_142 : f32 to vector<2x32xf32>
    %518 = arith.subf %517, %511 : vector<2x32xf32>
    %519 = arith.mulf %518, %516 : vector<2x32xf32>
    %520 = arith.mulf %511, %471 : vector<2x32xf32>
    %521 = arith.addf %519, %520 : vector<2x32xf32>
    %cst_143 = arith.constant dense<0.000000e+00> : vector<2x64xf32>
    %522 = tpu.matmul %521, %327, %cst_143 {dimension_numbers = #tpu.dot_dimension_numbers<[1], [0], [0], [1], [0, 0, 1, 1], [], []>, precision = #tpu.contract_precision<fp32>} : vector<2x32xf32>, vector<32x64xf32>, vector<2x64xf32> -> vector<2x64xf32>
    %523 = vector.broadcast %328 : vector<1x64xf32> to vector<2x64xf32>
    %524 = arith.addf %522, %523 : vector<2x64xf32>
    %c4_144 = arith.constant 4 : index
    %c0_145 = arith.constant 0 : index
    %c0_146 = arith.constant 0 : index
    %525 = vector.load %arg11[%c4_144, %c0_145, %c0_146] : memref<8x2x64xf32, #tpu.memory_space<vmem>>, vector<1x2x64xf32>
    %526 = vector.shape_cast %525 : vector<1x2x64xf32> to vector<2x64xf32>
    %527 = vector.shape_cast %524 : vector<2x64xf32> to vector<1x2x64xf32>
    tpu.vector_store %arg11[%c4_144, %c0_145, %c0_146], %527 {strides = array<i32>} : memref<8x2x64xf32, #tpu.memory_space<vmem>>, vector<1x2x64xf32>,
    %cst_147 = arith.constant dense<0xFF800000> : vector<2xf32>
    %528 = vector.multi_reduction <maximumf>, %524, %cst_147 [1] : vector<2x64xf32> to vector<2xf32>
    %529 = vector.shape_cast %528 : vector<2xf32> to vector<2x1xf32>
    %530 = vector.broadcast %529 : vector<2x1xf32> to vector<2x64xf32>
    %531 = arith.cmpf oeq, %524, %530 : vector<2x64xf32>
    %cst_148 = arith.constant 6.400000e+01 : f32
    %532 = vector.broadcast %cst_148 : f32 to vector<2x64xf32>
    %533 = arith.select %531, %330, %532 : vector<2x64xi1>, vector<2x64xf32>
    %cst_149 = arith.constant dense<0x7F800000> : vector<2xf32>
    %534 = vector.multi_reduction <minimumf>, %533, %cst_149 [1] : vector<2x64xf32> to vector<2xf32>
    %535 = vector.shape_cast %534 : vector<2xf32> to vector<2x1xf32>
    %536 = vector.broadcast %535 : vector<2x1xf32> to vector<2x64xf32>
    %537 = arith.cmpf oeq, %330, %536 : vector<2x64xf32>
    %538 = arith.extui %537 : vector<2x64xi1> to vector<2x64xi32>
    %539 = arith.sitofp %538 : vector<2x64xi32> to vector<2x64xf32>
    %cst_150 = arith.constant dense<0.000000e+00> : vector<2x96xf32>
    %540 = tpu.matmul %539, %323, %cst_150 {dimension_numbers = #tpu.dot_dimension_numbers<[1], [0], [0], [1], [0, 0, 1, 1], [], []>, precision = #tpu.contract_precision<fp32>} : vector<2x64xf32>, vector<64x96xf32>, vector<2x96xf32> -> vector<2x96xf32>
    %541 = vector.broadcast %325 : vector<1x96xf32> to vector<2x96xf32>
    %542 = arith.addf %540, %541 : vector<2x96xf32>
    %cst_151 = arith.constant dense<0.000000e+00> : vector<2x96xf32>
    %543 = tpu.matmul %521, %324, %cst_151 {dimension_numbers = #tpu.dot_dimension_numbers<[1], [0], [0], [1], [0, 0, 1, 1], [], []>, precision = #tpu.contract_precision<fp32>} : vector<2x32xf32>, vector<32x96xf32>, vector<2x96xf32> -> vector<2x96xf32>
    %544 = vector.broadcast %326 : vector<1x96xf32> to vector<2x96xf32>
    %545 = arith.addf %543, %544 : vector<2x96xf32>
    %546 = vector.extract_strided_slice %542 {offsets = [0, 0], sizes = [2, 32], strides = [1, 1]} : vector<2x96xf32> to vector<2x32xf32>
    %547 = vector.extract_strided_slice %545 {offsets = [0, 0], sizes = [2, 32], strides = [1, 1]} : vector<2x96xf32> to vector<2x32xf32>
    %548 = arith.addf %546, %547 : vector<2x32xf32>
    %549 = arith.negf %548 : vector<2x32xf32>
    %550 = math.exp %549 : vector<2x32xf32>
    %cst_152 = arith.constant 1.000000e+00 : f32
    %551 = vector.broadcast %cst_152 : f32 to vector<2x32xf32>
    %552 = arith.addf %551, %550 : vector<2x32xf32>
    %553 = arith.divf %551, %552 : vector<2x32xf32>
    %554 = vector.extract_strided_slice %542 {offsets = [0, 32], sizes = [2, 32], strides = [1, 1]} : vector<2x96xf32> to vector<2x32xf32>
    %555 = vector.extract_strided_slice %545 {offsets = [0, 32], sizes = [2, 32], strides = [1, 1]} : vector<2x96xf32> to vector<2x32xf32>
    %556 = arith.addf %554, %555 : vector<2x32xf32>
    %557 = arith.negf %556 : vector<2x32xf32>
    %558 = math.exp %557 : vector<2x32xf32>
    %cst_153 = arith.constant 1.000000e+00 : f32
    %559 = vector.broadcast %cst_153 : f32 to vector<2x32xf32>
    %560 = arith.addf %559, %558 : vector<2x32xf32>
    %561 = arith.divf %559, %560 : vector<2x32xf32>
    %562 = vector.extract_strided_slice %542 {offsets = [0, 64], sizes = [2, 32], strides = [1, 1]} : vector<2x96xf32> to vector<2x32xf32>
    %563 = vector.extract_strided_slice %545 {offsets = [0, 64], sizes = [2, 32], strides = [1, 1]} : vector<2x96xf32> to vector<2x32xf32>
    %564 = arith.mulf %553, %563 : vector<2x32xf32>
    %565 = arith.addf %562, %564 : vector<2x32xf32>
    %566 = math.tanh %565 : vector<2x32xf32>
    %cst_154 = arith.constant 1.000000e+00 : f32
    %567 = vector.broadcast %cst_154 : f32 to vector<2x32xf32>
    %568 = arith.subf %567, %561 : vector<2x32xf32>
    %569 = arith.mulf %568, %566 : vector<2x32xf32>
    %570 = arith.mulf %561, %521 : vector<2x32xf32>
    %571 = arith.addf %569, %570 : vector<2x32xf32>
    %cst_155 = arith.constant dense<0.000000e+00> : vector<2x64xf32>
    %572 = tpu.matmul %571, %327, %cst_155 {dimension_numbers = #tpu.dot_dimension_numbers<[1], [0], [0], [1], [0, 0, 1, 1], [], []>, precision = #tpu.contract_precision<fp32>} : vector<2x32xf32>, vector<32x64xf32>, vector<2x64xf32> -> vector<2x64xf32>
    %573 = vector.broadcast %328 : vector<1x64xf32> to vector<2x64xf32>
    %574 = arith.addf %572, %573 : vector<2x64xf32>
    %c5_156 = arith.constant 5 : index
    %c0_157 = arith.constant 0 : index
    %c0_158 = arith.constant 0 : index
    %575 = vector.load %arg11[%c5_156, %c0_157, %c0_158] : memref<8x2x64xf32, #tpu.memory_space<vmem>>, vector<1x2x64xf32>
    %576 = vector.shape_cast %575 : vector<1x2x64xf32> to vector<2x64xf32>
    %577 = vector.shape_cast %574 : vector<2x64xf32> to vector<1x2x64xf32>
    tpu.vector_store %arg11[%c5_156, %c0_157, %c0_158], %577 {strides = array<i32>} : memref<8x2x64xf32, #tpu.memory_space<vmem>>, vector<1x2x64xf32>,
    %cst_159 = arith.constant dense<0xFF800000> : vector<2xf32>
    %578 = vector.multi_reduction <maximumf>, %574, %cst_159 [1] : vector<2x64xf32> to vector<2xf32>
    %579 = vector.shape_cast %578 : vector<2xf32> to vector<2x1xf32>
    %580 = vector.broadcast %579 : vector<2x1xf32> to vector<2x64xf32>
    %581 = arith.cmpf oeq, %574, %580 : vector<2x64xf32>
    %cst_160 = arith.constant 6.400000e+01 : f32
    %582 = vector.broadcast %cst_160 : f32 to vector<2x64xf32>
    %583 = arith.select %581, %330, %582 : vector<2x64xi1>, vector<2x64xf32>
    %cst_161 = arith.constant dense<0x7F800000> : vector<2xf32>
    %584 = vector.multi_reduction <minimumf>, %583, %cst_161 [1] : vector<2x64xf32> to vector<2xf32>
    %585 = vector.shape_cast %584 : vector<2xf32> to vector<2x1xf32>
    %586 = vector.broadcast %585 : vector<2x1xf32> to vector<2x64xf32>
    %587 = arith.cmpf oeq, %330, %586 : vector<2x64xf32>
    %588 = arith.extui %587 : vector<2x64xi1> to vector<2x64xi32>
    %589 = arith.sitofp %588 : vector<2x64xi32> to vector<2x64xf32>
    %cst_162 = arith.constant dense<0.000000e+00> : vector<2x96xf32>
    %590 = tpu.matmul %589, %323, %cst_162 {dimension_numbers = #tpu.dot_dimension_numbers<[1], [0], [0], [1], [0, 0, 1, 1], [], []>, precision = #tpu.contract_precision<fp32>} : vector<2x64xf32>, vector<64x96xf32>, vector<2x96xf32> -> vector<2x96xf32>
    %591 = vector.broadcast %325 : vector<1x96xf32> to vector<2x96xf32>
    %592 = arith.addf %590, %591 : vector<2x96xf32>
    %cst_163 = arith.constant dense<0.000000e+00> : vector<2x96xf32>
    %593 = tpu.matmul %571, %324, %cst_163 {dimension_numbers = #tpu.dot_dimension_numbers<[1], [0], [0], [1], [0, 0, 1, 1], [], []>, precision = #tpu.contract_precision<fp32>} : vector<2x32xf32>, vector<32x96xf32>, vector<2x96xf32> -> vector<2x96xf32>
    %594 = vector.broadcast %326 : vector<1x96xf32> to vector<2x96xf32>
    %595 = arith.addf %593, %594 : vector<2x96xf32>
    %596 = vector.extract_strided_slice %592 {offsets = [0, 0], sizes = [2, 32], strides = [1, 1]} : vector<2x96xf32> to vector<2x32xf32>
    %597 = vector.extract_strided_slice %595 {offsets = [0, 0], sizes = [2, 32], strides = [1, 1]} : vector<2x96xf32> to vector<2x32xf32>
    %598 = arith.addf %596, %597 : vector<2x32xf32>
    %599 = arith.negf %598 : vector<2x32xf32>
    %600 = math.exp %599 : vector<2x32xf32>
    %cst_164 = arith.constant 1.000000e+00 : f32
    %601 = vector.broadcast %cst_164 : f32 to vector<2x32xf32>
    %602 = arith.addf %601, %600 : vector<2x32xf32>
    %603 = arith.divf %601, %602 : vector<2x32xf32>
    %604 = vector.extract_strided_slice %592 {offsets = [0, 32], sizes = [2, 32], strides = [1, 1]} : vector<2x96xf32> to vector<2x32xf32>
    %605 = vector.extract_strided_slice %595 {offsets = [0, 32], sizes = [2, 32], strides = [1, 1]} : vector<2x96xf32> to vector<2x32xf32>
    %606 = arith.addf %604, %605 : vector<2x32xf32>
    %607 = arith.negf %606 : vector<2x32xf32>
    %608 = math.exp %607 : vector<2x32xf32>
    %cst_165 = arith.constant 1.000000e+00 : f32
    %609 = vector.broadcast %cst_165 : f32 to vector<2x32xf32>
    %610 = arith.addf %609, %608 : vector<2x32xf32>
    %611 = arith.divf %609, %610 : vector<2x32xf32>
    %612 = vector.extract_strided_slice %592 {offsets = [0, 64], sizes = [2, 32], strides = [1, 1]} : vector<2x96xf32> to vector<2x32xf32>
    %613 = vector.extract_strided_slice %595 {offsets = [0, 64], sizes = [2, 32], strides = [1, 1]} : vector<2x96xf32> to vector<2x32xf32>
    %614 = arith.mulf %603, %613 : vector<2x32xf32>
    %615 = arith.addf %612, %614 : vector<2x32xf32>
    %616 = math.tanh %615 : vector<2x32xf32>
    %cst_166 = arith.constant 1.000000e+00 : f32
    %617 = vector.broadcast %cst_166 : f32 to vector<2x32xf32>
    %618 = arith.subf %617, %611 : vector<2x32xf32>
    %619 = arith.mulf %618, %616 : vector<2x32xf32>
    %620 = arith.mulf %611, %571 : vector<2x32xf32>
    %621 = arith.addf %619, %620 : vector<2x32xf32>
    %cst_167 = arith.constant dense<0.000000e+00> : vector<2x64xf32>
    %622 = tpu.matmul %621, %327, %cst_167 {dimension_numbers = #tpu.dot_dimension_numbers<[1], [0], [0], [1], [0, 0, 1, 1], [], []>, precision = #tpu.contract_precision<fp32>} : vector<2x32xf32>, vector<32x64xf32>, vector<2x64xf32> -> vector<2x64xf32>
    %623 = vector.broadcast %328 : vector<1x64xf32> to vector<2x64xf32>
    %624 = arith.addf %622, %623 : vector<2x64xf32>
    %c6_168 = arith.constant 6 : index
    %c0_169 = arith.constant 0 : index
    %c0_170 = arith.constant 0 : index
    %625 = vector.load %arg11[%c6_168, %c0_169, %c0_170] : memref<8x2x64xf32, #tpu.memory_space<vmem>>, vector<1x2x64xf32>
    %626 = vector.shape_cast %625 : vector<1x2x64xf32> to vector<2x64xf32>
    %627 = vector.shape_cast %624 : vector<2x64xf32> to vector<1x2x64xf32>
    tpu.vector_store %arg11[%c6_168, %c0_169, %c0_170], %627 {strides = array<i32>} : memref<8x2x64xf32, #tpu.memory_space<vmem>>, vector<1x2x64xf32>,
    %cst_171 = arith.constant dense<0xFF800000> : vector<2xf32>
    %628 = vector.multi_reduction <maximumf>, %624, %cst_171 [1] : vector<2x64xf32> to vector<2xf32>
    %629 = vector.shape_cast %628 : vector<2xf32> to vector<2x1xf32>
    %630 = vector.broadcast %629 : vector<2x1xf32> to vector<2x64xf32>
    %631 = arith.cmpf oeq, %624, %630 : vector<2x64xf32>
    %cst_172 = arith.constant 6.400000e+01 : f32
    %632 = vector.broadcast %cst_172 : f32 to vector<2x64xf32>
    %633 = arith.select %631, %330, %632 : vector<2x64xi1>, vector<2x64xf32>
    %cst_173 = arith.constant dense<0x7F800000> : vector<2xf32>
    %634 = vector.multi_reduction <minimumf>, %633, %cst_173 [1] : vector<2x64xf32> to vector<2xf32>
    %635 = vector.shape_cast %634 : vector<2xf32> to vector<2x1xf32>
    %636 = vector.broadcast %635 : vector<2x1xf32> to vector<2x64xf32>
    %637 = arith.cmpf oeq, %330, %636 : vector<2x64xf32>
    %638 = arith.extui %637 : vector<2x64xi1> to vector<2x64xi32>
    %639 = arith.sitofp %638 : vector<2x64xi32> to vector<2x64xf32>
    %cst_174 = arith.constant dense<0.000000e+00> : vector<2x96xf32>
    %640 = tpu.matmul %639, %323, %cst_174 {dimension_numbers = #tpu.dot_dimension_numbers<[1], [0], [0], [1], [0, 0, 1, 1], [], []>, precision = #tpu.contract_precision<fp32>} : vector<2x64xf32>, vector<64x96xf32>, vector<2x96xf32> -> vector<2x96xf32>
    %641 = vector.broadcast %325 : vector<1x96xf32> to vector<2x96xf32>
    %642 = arith.addf %640, %641 : vector<2x96xf32>
    %cst_175 = arith.constant dense<0.000000e+00> : vector<2x96xf32>
    %643 = tpu.matmul %621, %324, %cst_175 {dimension_numbers = #tpu.dot_dimension_numbers<[1], [0], [0], [1], [0, 0, 1, 1], [], []>, precision = #tpu.contract_precision<fp32>} : vector<2x32xf32>, vector<32x96xf32>, vector<2x96xf32> -> vector<2x96xf32>
    %644 = vector.broadcast %326 : vector<1x96xf32> to vector<2x96xf32>
    %645 = arith.addf %643, %644 : vector<2x96xf32>
    %646 = vector.extract_strided_slice %642 {offsets = [0, 0], sizes = [2, 32], strides = [1, 1]} : vector<2x96xf32> to vector<2x32xf32>
    %647 = vector.extract_strided_slice %645 {offsets = [0, 0], sizes = [2, 32], strides = [1, 1]} : vector<2x96xf32> to vector<2x32xf32>
    %648 = arith.addf %646, %647 : vector<2x32xf32>
    %649 = arith.negf %648 : vector<2x32xf32>
    %650 = math.exp %649 : vector<2x32xf32>
    %cst_176 = arith.constant 1.000000e+00 : f32
    %651 = vector.broadcast %cst_176 : f32 to vector<2x32xf32>
    %652 = arith.addf %651, %650 : vector<2x32xf32>
    %653 = arith.divf %651, %652 : vector<2x32xf32>
    %654 = vector.extract_strided_slice %642 {offsets = [0, 32], sizes = [2, 32], strides = [1, 1]} : vector<2x96xf32> to vector<2x32xf32>
    %655 = vector.extract_strided_slice %645 {offsets = [0, 32], sizes = [2, 32], strides = [1, 1]} : vector<2x96xf32> to vector<2x32xf32>
    %656 = arith.addf %654, %655 : vector<2x32xf32>
    %657 = arith.negf %656 : vector<2x32xf32>
    %658 = math.exp %657 : vector<2x32xf32>
    %cst_177 = arith.constant 1.000000e+00 : f32
    %659 = vector.broadcast %cst_177 : f32 to vector<2x32xf32>
    %660 = arith.addf %659, %658 : vector<2x32xf32>
    %661 = arith.divf %659, %660 : vector<2x32xf32>
    %662 = vector.extract_strided_slice %642 {offsets = [0, 64], sizes = [2, 32], strides = [1, 1]} : vector<2x96xf32> to vector<2x32xf32>
    %663 = vector.extract_strided_slice %645 {offsets = [0, 64], sizes = [2, 32], strides = [1, 1]} : vector<2x96xf32> to vector<2x32xf32>
    %664 = arith.mulf %653, %663 : vector<2x32xf32>
    %665 = arith.addf %662, %664 : vector<2x32xf32>
    %666 = math.tanh %665 : vector<2x32xf32>
    %cst_178 = arith.constant 1.000000e+00 : f32
    %667 = vector.broadcast %cst_178 : f32 to vector<2x32xf32>
    %668 = arith.subf %667, %661 : vector<2x32xf32>
    %669 = arith.mulf %668, %666 : vector<2x32xf32>
    %670 = arith.mulf %661, %621 : vector<2x32xf32>
    %671 = arith.addf %669, %670 : vector<2x32xf32>
    %cst_179 = arith.constant dense<0.000000e+00> : vector<2x64xf32>
    %672 = tpu.matmul %671, %327, %cst_179 {dimension_numbers = #tpu.dot_dimension_numbers<[1], [0], [0], [1], [0, 0, 1, 1], [], []>, precision = #tpu.contract_precision<fp32>} : vector<2x32xf32>, vector<32x64xf32>, vector<2x64xf32> -> vector<2x64xf32>
    %673 = vector.broadcast %328 : vector<1x64xf32> to vector<2x64xf32>
    %674 = arith.addf %672, %673 : vector<2x64xf32>
    %c7_180 = arith.constant 7 : index
    %c0_181 = arith.constant 0 : index
    %c0_182 = arith.constant 0 : index
    %675 = vector.load %arg11[%c7_180, %c0_181, %c0_182] : memref<8x2x64xf32, #tpu.memory_space<vmem>>, vector<1x2x64xf32>
    %676 = vector.shape_cast %675 : vector<1x2x64xf32> to vector<2x64xf32>
    %677 = vector.shape_cast %674 : vector<2x64xf32> to vector<1x2x64xf32>
    tpu.vector_store %arg11[%c7_180, %c0_181, %c0_182], %677 {strides = array<i32>} : memref<8x2x64xf32, #tpu.memory_space<vmem>>, vector<1x2x64xf32>,
    return
  }
}

</mosaic_0001>

<bundles_post_ra>
// kernel: seq2seq_forward.1
= control target key start
LH: loop header
LB: loop body
LE: loop exit
PB: predicated region body
PF: predicated region fallthrough
CT: control target
= control target key end

     0   :  { %v20319_v0 = vmov 0.0|0.0   ;;  %vm20320_vm0 = vmmov 0   ;;  %v20321_v4 = vmov 0.0   ;;  %v20322_v34 = vmov 0   ;;  %s20323_s28 = smov 64   ;;  %s20324_s12 = smov 96   ;;  %s22190_s3 = inlined_call_operand.vmem [shape: f32[32,96], index: 3, kind: input, shape index: {}]   ;;  %s22191_s1 = inlined_call_operand.vmem [shape: f32[8,2,1], index: 1, kind: input, shape index: {}]   ;;  %s22192_s4 = inlined_call_operand.vmem [shape: f32[1,96], index: 4, kind: input, shape index: {}]   ;;  %s22193_s0 = inlined_call_operand.vmem [shape: f32[8,2,96], index: 0, kind: input, shape index: {}]   ;;  %s22194_s5 = inlined_call_operand.vmem [shape: f32[64,96], index: 5, kind: input, shape index: {}]   ;;  %s22195_s2 = inlined_call_operand.vmem [shape: s32[2,1], index: 2, kind: input, shape index: {}]   ;;  %s22196_s6 = inlined_call_operand.vmem [shape: f32[32,96], index: 6, kind: input, shape index: {}]   ;;  %s22197_s8 = inlined_call_operand.vmem [shape: f32[1,96], index: 8, kind: input, shape index: {}]   ;;  %s22198_s7 = inlined_call_operand.vmem [shape: f32[1,96], index: 7, kind: input, shape index: {}]   ;;  %s22199_s9 = inlined_call_operand.vmem [shape: f32[32,64], index: 9, kind: input, shape index: {}]   ;;  %s22200_s11 = inlined_call_operand.vmem [shape: f32[8,2,64], index: 11, kind: output, shape index: {}]   ;;  %s22201_s10 = inlined_call_operand.vmem [shape: f32[1,64], index: 10, kind: input, shape index: {}]  }
   0x1   :  { %18600 = vmatprep.subr.bf16.mxu0 %v20319_v0  ;;  %v38_v1 = vld [vmem:[%s22190_s3] sm:$0xff]  ;;  %v39_v2 = vld [vmem:[%s22190_s3 + $0x8] sm:$0xff]  ;;  %v40_v3 = vld [vmem:[%s22190_s3 + $0x10] sm:$0xff]  ;;  %16358 = vmatprep.mubr.msk.f32.mxu0 %vm20320_vm0, %v20321_v4  ;;  %vm50_vm1 = vcmask 261120   ;;  %vm4355_vm2 = vcmask 523264   ;;  %vm4347_vm4 = vcmask 517120  }
   0x2   :  { %v55_v5 = vand.u32 4294901760, %v38_v1  ;;  %v58_v6 = vand.u32 4294901760, %v39_v2  ;;  %v41_v7 = vld [vmem:[%s22190_s3 + $0x18] sm:$0xff]  ;;  %v61_v8 = vand.u32 4294901760, %v40_v3  ;;  %18636 = vmatprep.subr.bf16.mxu1 %v20319_v0  ;;  %16424 = vmatprep.mubr.msk.f32.mxu1 %vm20320_vm0, %v20321_v4  ;;  %v565_v35 = vld [vmem:[%s22191_s1] sm:$0x3] }
   0x3   :  { %v64_v9 = vand.u32 4294901760, %v41_v7  ;;  %20221 = vset.pattern.permute.xlu1 %v20322_v34  ;;  %20222 = vset.pattern.permute.xlu0 %v20322_v34  ;;  %v572_v36 = vsub.f32 1.0, %v565_v35  ;;  %v20475_v37 = vld [vmem:[%s22192_s4] ss:$0 sm:$0xff]  ;;  %4348 = vst.msk [vmem:[%s22200_s11] sm:$0x3] %vm4347_vm4, %v20321_v4 }
   0x4   :  { %v20403_v10 = vpack.c.bf16 %v58_v6, %v55_v5  ;;  %v135_v11 = vsub.f32 %v38_v1, %v55_v5  ;;  %v142_v12 = vsub.f32 %v39_v2, %v58_v6  ;;  %v149_v13 = vsub.f32 %v40_v3, %v61_v8  ;;  %568 = vperm.xlu1 %20221, %v565_v35   ;;  %v43_v41 = vld [vmem:[%s22193_s0] sm:$0x3] }
   0x5   :  { %v156_v14 = vsub.f32 %v41_v7, %v64_v9  ;;  %v20406_v15 = vpack.c.bf16 %v64_v9, %v61_v8 }
   0x6   :  { %18602 = vmatpush3.bf16.msra.mxu0 %v20403_v10  ;;  %v136_v16 = vand.u32 4294901760, %v135_v11  ;;  %v143_v17 = vand.u32 4294901760, %v142_v12  ;;  %v150_v18 = vand.u32 4294901760, %v149_v13  ;;  %18638 = vmatpush3.bf16.msra.mxu1 %v20403_v10  ;;  %v20425_v30 = vpack.c.bf16 %v142_v12, %v135_v11 }
   0x7   :  { %18603 = vmatprep.subr.bf16.mxu0 %v20319_v0  ;;  %v157_v19 = vand.u32 4294901760, %v156_v14  ;;  %18639 = vmatprep.subr.bf16.mxu1 %v20319_v0  ;;  %v20430_v31 = vpack.c.bf16 %v156_v14, %v149_v13 }
   0x8   :  { %v137_v20 = vsub.f32 %v135_v11, %v136_v16  ;;  %v144_v21 = vsub.f32 %v142_v12, %v143_v17  ;;  %v151_v22 = vsub.f32 %v149_v13, %v150_v18  ;;  %v20443_v32 = vpack.c.bf16 %v143_v17, %v136_v16  ;;  %575 = vperm.xlu1 %20221, %v572_v36   ;;  %v15248_v11 = vld [vmem:[%s22191_s1 + $0x2] sm:$0x3] }
   0x9   :  { %v158_v23 = vsub.f32 %v156_v14, %v157_v19  ;;  %v20448_v33 = vpack.c.bf16 %v157_v19, %v150_v18  ;;  %v15246_v12 = vld [vmem:[%s22193_s0 + $0x2] sm:$0x3] }
   0xa   :  { %18605 = vmatpush3.bf16.msra.mxu0 %v20406_v15  ;;  %v138_v24 = vand.u32 4294901760, %v137_v20  ;;  %v145_v25 = vand.u32 4294901760, %v144_v21  ;;  %v152_v26 = vand.u32 4294901760, %v151_v22  ;;  %18641 = vmatpush3.bf16.msra.mxu1 %v20406_v15  ;;  %v1106_v21 = vsub.f32 1.0, %v15248_v11 }
   0xb   :  { %18606 = vmatprep.subr.bf16.mxu0 %v20319_v0  ;;  %v159_v27 = vand.u32 4294901760, %v158_v23  ;;  %18642 = vmatprep.subr.bf16.mxu1 %v20319_v0 }
   0xc   :  { %v20415_v28 = vpack.c.bf16 %v145_v25, %v138_v24 }
   0xd   :  { %16359 = vmatmul.mubr.f32.vlgmr.msra.gmra.mrb[0].mxu0 %v20321_v4  ;;  %v20419_v29 = vpack.c.bf16 %v159_v27, %v152_v26 }
   0xe   :  { %18608 = vmatpush3.bf16.msra.mxu0 %v20415_v28  ;;  %16369 = vmatprep.mubr.msk.f32.mxu0 %vm20320_vm0, %v20321_v4 }
   0xf   :  { %18609 = vmatprep.subr.bf16.mxu0 %v20319_v0 }
  0x12   :  { %18611 = vmatpush3.bf16.msra.mxu0 %v20419_v29 }
  0x13   :  { %18612 = vmatprep.subr.bf16.mxu0 %v20319_v0 }
  0x15   :  { %16370 = vmatmul.mubr.f32.vlgmr.msra.gmra.mrb[0].mxu0 %v20321_v4 }
  0x16   :  { %18614 = vmatpush3.bf16.msra.mxu0 %v20425_v30  ;;  %16380 = vmatprep.mubr.msk.f32.mxu0 %vm20320_vm0, %v20321_v4 }
  0x17   :  { %18615 = vmatprep.subr.bf16.mxu0 %v20319_v0 }
  0x1a   :  { %18617 = vmatpush3.bf16.msra.mxu0 %v20430_v31 }
  0x1b   :  { %18618 = vmatprep.subr.bf16.mxu0 %v20319_v0 }
  0x1d   :  { %16381 = vmatmul.mubr.f32.vlgmr.msra.gmra.mrb[0].mxu0 %v20321_v4 }
  0x1e   :  { %18620 = vmatpush3.bf16.msra.mxu0 %v20403_v10  ;;  %16391 = vmatprep.mubr.msk.f32.mxu0 %vm20320_vm0, %v20321_v4 }
  0x1f   :  { %18621 = vmatprep.subr.bf16.mxu0 %v20319_v0 }
  0x22   :  { %18623 = vmatpush3.bf16.msra.mxu0 %v20406_v15 }
  0x23   :  { %18624 = vmatprep.subr.bf16.mxu0 %v20319_v0 }
  0x25   :  { %16392 = vmatmul.mubr.f32.vlgmr.msra.gmra.mrb[0].mxu0 %v20321_v4 }
  0x26   :  { %18626 = vmatpush3.bf16.msra.mxu0 %v20443_v32  ;;  %16402 = vmatprep.mubr.msk.f32.mxu0 %vm20320_vm0, %v20321_v4 }
  0x27   :  { %18627 = vmatprep.subr.bf16.mxu0 %v20319_v0 }
  0x2a   :  { %18629 = vmatpush3.bf16.msra.mxu0 %v20448_v33 }
  0x2b   :  { %18630 = vmatprep.subr.bf16.mxu0 %v20319_v0 }
  0x2d   :  { %16403 = vmatmul.mubr.f32.vlgmr.msra.gmra.mrb[0].mxu0 %v20321_v4 }
  0x2e   :  { %18632 = vmatpush3.bf16.msra.mxu0 %v20403_v10  ;;  %16413 = vmatprep.mubr.msk.f32.mxu0 %vm20320_vm0, %v20321_v4 }
  0x2f   :  { %18633 = vmatprep.subr.bf16.mxu0 %v20319_v0 }
  0x32   :  { %18635 = vmatpush3.bf16.msra.mxu0 %v20406_v15 }
  0x33   :  { %18672 = vmatprep.subr.bf16.mxu0 %v20319_v0 }
  0x35   :  { %16414 = vmatmul.mubr.f32.vlgmr.msra.gmra.mrb[0].mxu0 %v20321_v4 }
  0x36   :  { %18674 = vmatpush3.bf16.msra.mxu0 %v20403_v10  ;;  %16490 = vmatprep.mubr.msk.f32.mxu0 %vm20320_vm0, %v20321_v4 }
  0x37   :  { %18675 = vmatprep.subr.bf16.mxu0 %v20319_v0 }
  0x3a   :  { %18677 = vmatpush3.bf16.msra.mxu0 %v20406_v15 }
  0x3b   :  { %18678 = vmatprep.subr.bf16.mxu0 %v20319_v0 }
  0x83   :  { %v569_v52 = vpop.permute.xlu1 %568 }
  0x87   :  { %v576_v57 = vpop.permute.xlu1 %575 }
  0x88   :  { %v578_v60 = vmul.f32 0.0, %v576_v57 }
 0x108   :  { %v535_v38 = vpop.f32.mrb[0].mxu0 }
 0x109   :  { %v19896_v39 = vadd.f32 %v20475_v37, %v535_v38  ;;  %v16415_v40 = vpop.f32.mrb[1].mxu0 }
 0x10b   :  { %547 = vrot.lane.b32.xlu0 %v19896_v39, %s20323_s28  ;;  %v539_v42 = vadd.f32 %v19896_v39, %v43_v41 }
 0x10d   :  { %v15245_v43 = vmul.f32 -1.442695, %v539_v42 }
 0x10f   :  { %20223 = vpow2.f32 %v15245_v43 }
 0x119   :  { %v20224_v44 = vpop.eup %20223 }
 0x11a   :  { %v543_v45 = vadd.f32 1.0, %v20224_v44 }
 0x11c   :  { %20225 = vrcp.f32 %v543_v45 }
 0x126   :  { %v20226_v46 = vpop.eup %20225 }
 0x127   :  { %v557_v53 = vsub.f32 1.0, %v20226_v46  ;;  %v563_v55 = vmul.f32 0.0, %v20226_v46 }
 0x17d   :  { %v548_v47 = vpop.permute.xlu0 %547 }
 0x17e   :  { %v550_v48 = vmul.f32 %v20226_v46, %v548_v47 }
 0x180   :  { %552 = vrot.lane.b32.xlu0 %v550_v48, %s20323_s28 }
 0x1f2   :  { %v553_v49 = vpop.permute.xlu0 %552 }
 0x1f3   :  { %v555_v50 = vadd.f32 %v553_v49, %v43_v41 }
 0x1f5   :  { %20227 = vtanh.f32 %v555_v50 }
 0x1ff   :  { %v20228_v51 = vpop.eup %20227 }
 0x200   :  { %559 = vrot.lane.b32.xlu0 %v20228_v51, %s20324_s12 }
 0x272   :  { %v560_v54 = vpop.permute.xlu0 %559 }
 0x273   :  { %v562_v56 = vmul.f32 %v560_v54, %v557_v53  ;;  %v15249_v53 = vld [vmem:[%s22193_s0 + $0x4] sm:$0x3] }
 0x275   :  { %v564_v58 = vadd.f32 %v563_v55, %v562_v56 }
 0x277   :  { %v571_v59 = vmul.f32 %v569_v52, %v564_v58  ;;  %v15251_v52 = vld [vmem:[%s22191_s1 + $0x4] sm:$0x3] }
 0x279   :  { %v20484_v61 = vadd.f32 %v578_v60, %v571_v59 }
 0x27b   :  { %583 = vrot.lane.b32.xlu1 %v20484_v61, %s20324_s12 }
 0x2ed   :  { %v584_v62 = vpop.permute.xlu1 %583 }
 0x2ee   :  { %v585_v63 = vsel %vm50_vm1, %v584_v62, 0 }
 0x2ef   :  { %v656_v1 = vand.u32 4294901760, %v585_v63 }
 0x2f1   :  { %v657_v2 = vsub.f32 %v585_v63, %v656_v1 }
 0x2f3   :  { %v658_v3 = vand.u32 4294901760, %v657_v2 }
 0x2f5   :  { %v659_v5 = vsub.f32 %v657_v2, %v658_v3 }
 0x2f7   :  { %v660_v6 = vand.u32 4294901760, %v659_v5 }
 0x2f9   :  { %16425 = vmatmul.mubr.f32.vlgmr.msra.gmra.mrb[0].mxu1 %v660_v6 }
 0x2fa   :  { %18644 = vmatpush3.bf16.msra.mxu1 %v20415_v28  ;;  %16435 = vmatprep.mubr.msk.f32.mxu1 %vm20320_vm0, %v20321_v4 }
 0x2fb   :  { %18645 = vmatprep.subr.bf16.mxu1 %v20319_v0 }
 0x2fe   :  { %18647 = vmatpush3.bf16.msra.mxu1 %v20419_v29 }
 0x2ff   :  { %18648 = vmatprep.subr.bf16.mxu1 %v20319_v0 }
 0x301   :  { %16436 = vmatmul.mubr.f32.vlgmr.msra.gmra.mrb[0].mxu1 %v656_v1 }
 0x302   :  { %18650 = vmatpush3.bf16.msra.mxu1 %v20425_v30  ;;  %16446 = vmatprep.mubr.msk.f32.mxu1 %vm20320_vm0, %v20321_v4 }
 0x303   :  { %18651 = vmatprep.subr.bf16.mxu1 %v20319_v0 }
 0x306   :  { %18653 = vmatpush3.bf16.msra.mxu1 %v20430_v31 }
 0x307   :  { %18654 = vmatprep.subr.bf16.mxu1 %v20319_v0 }
 0x309   :  { %16447 = vmatmul.mubr.f32.vlgmr.msra.gmra.mrb[0].mxu1 %v657_v2 }
 0x30a   :  { %18656 = vmatpush3.bf16.msra.mxu1 %v20403_v10  ;;  %16457 = vmatprep.mubr.msk.f32.mxu1 %vm20320_vm0, %v20321_v4 }
 0x30b   :  { %18657 = vmatprep.subr.bf16.mxu1 %v20319_v0 }
 0x30e   :  { %18659 = vmatpush3.bf16.msra.mxu1 %v20406_v15 }
 0x30f   :  { %18660 = vmatprep.subr.bf16.mxu1 %v20319_v0 }
 0x311   :  { %16458 = vmatmul.mubr.f32.vlgmr.msra.gmra.mrb[0].mxu1 %v658_v3 }
 0x312   :  { %18662 = vmatpush3.bf16.msra.mxu1 %v20443_v32  ;;  %16468 = vmatprep.mubr.msk.f32.mxu1 %vm20320_vm0, %v20321_v4 }
 0x313   :  { %18663 = vmatprep.subr.bf16.mxu1 %v20319_v0 }
 0x316   :  { %18665 = vmatpush3.bf16.msra.mxu1 %v20448_v33 }
 0x317   :  { %18666 = vmatprep.subr.bf16.mxu1 %v20319_v0 }
 0x319   :  { %16469 = vmatmul.mubr.f32.vlgmr.msra.gmra.mrb[0].mxu1 %v656_v1 }
 0x31a   :  { %18668 = vmatpush3.bf16.msra.mxu1 %v20403_v10  ;;  %16479 = vmatprep.mubr.msk.f32.mxu1 %vm20320_vm0, %v20321_v4 }
 0x31b   :  { %18669 = vmatprep.subr.bf16.mxu1 %v20319_v0 }
 0x31e   :  { %18671 = vmatpush3.bf16.msra.mxu1 %v20406_v15 }
 0x31f   :  { %18708 = vmatprep.subr.bf16.mxu1 %v20319_v0 }
 0x321   :  { %16480 = vmatmul.mubr.f32.vlgmr.msra.gmra.mrb[0].mxu1 %v656_v1 }
 0x322   :  { %18710 = vmatpush3.bf16.msra.mxu1 %v20403_v10  ;;  %16556 = vmatprep.mubr.msk.f32.mxu1 %vm20320_vm0, %v20321_v4 }
 0x323   :  { %18711 = vmatprep.subr.bf16.mxu1 %v20319_v0 }
 0x326   :  { %18713 = vmatpush3.bf16.msra.mxu1 %v20406_v15 }
 0x327   :  { %18714 = vmatprep.subr.bf16.mxu1 %v20319_v0 }
 0x3f4   :  { %v1068_v7 = vpop.f32.mrb[0].mxu1 }
 0x3f5   :  { %v19897_v8 = vadd.f32 %v20475_v37, %v1068_v7  ;;  %v16481_v9 = vpop.f32.mrb[1].mxu1 }
 0x3f7   :  { %1080 = vrot.lane.b32.xlu0 %v19897_v8, %s20323_s28  ;;  %v1072_v13 = vadd.f32 %v19897_v8, %v15246_v12 }
 0x3f9   :  { %v15247_v14 = vmul.f32 -1.442695, %v1072_v13 }
 0x3fb   :  { %1102 = vperm.xlu0 %20222, %v15248_v11   ;;  %20229 = vpow2.f32 %v15247_v14 }
 0x405   :  { %v20230_v16 = vpop.eup %20229 }
 0x406   :  { %v1076_v17 = vadd.f32 1.0, %v20230_v16 }
 0x408   :  { %20231 = vrcp.f32 %v1076_v17 }
 0x412   :  { %v20232_v18 = vpop.eup %20231 }
 0x413   :  { %v1090_v26 = vsub.f32 1.0, %v20232_v18  ;;  %v1096_v35 = vmul.f32 %v20232_v18, %v20484_v61 }
 0x469   :  { %v1081_v19 = vpop.permute.xlu0 %1080 }
 0x46a   :  { %v1083_v20 = vmul.f32 %v20232_v18, %v1081_v19 }
 0x46c   :  { %1085 = vrot.lane.b32.xlu1 %v1083_v20, %s20323_s28 }
 0x470   :  { %1109 = vperm.xlu1 %20221, %v1106_v21  }
 0x47a   :  { %v1103_v36 = vpop.permute.xlu0 %1102 }
 0x4de   :  { %v1086_v22 = vpop.permute.xlu1 %1085 }
 0x4df   :  { %v1088_v23 = vadd.f32 %v15246_v12, %v1086_v22 }
 0x4e1   :  { %20233 = vtanh.f32 %v1088_v23 }
 0x4eb   :  { %v20234_v24 = vpop.eup %20233 }
 0x4ec   :  { %1092 = vrot.lane.b32.xlu1 %v20234_v24, %s20324_s12 }
 0x4ef   :  { %v1110_v25 = vpop.permute.xlu1 %1109 }
 0x4f0   :  { %v1112_v39 = vmul.f32 %v1110_v25, %v20484_v61  ;;  %v1640_v61 = vsub.f32 1.0, %v15251_v52  ;;  %v15254_v25 = vld [vmem:[%s22191_s1 + $0x6] sm:$0x3] }
 0x55e   :  { %v1093_v27 = vpop.permute.xlu1 %1092 }
 0x55f   :  { %v1095_v34 = vmul.f32 %v1093_v27, %v1090_v26  ;;  %v15252_v26 = vld [vmem:[%s22193_s0 + $0x6] sm:$0x3] }
 0x561   :  { %v1097_v38 = vadd.f32 %v1096_v35, %v1095_v34 }
 0x563   :  { %v1105_v40 = vmul.f32 %v1103_v36, %v1097_v38 }
 0x565   :  { %v20537_v41 = vadd.f32 %v1112_v39, %v1105_v40 }
 0x567   :  { %1117 = vrot.lane.b32.xlu0 %v20537_v41, %s20324_s12 }
 0x5d9   :  { %v1118_v42 = vpop.permute.xlu0 %1117 }
 0x5da   :  { %v1119_v43 = vsel %vm50_vm1, %v1118_v42, 0 }
 0x5db   :  { %v1190_v44 = vand.u32 4294901760, %v1119_v43 }
 0x5dd   :  { %v1191_v45 = vsub.f32 %v1119_v43, %v1190_v44 }
 0x5df   :  { %v1192_v46 = vand.u32 4294901760, %v1191_v45 }
 0x5e1   :  { %v1193_v47 = vsub.f32 %v1191_v45, %v1192_v46 }
 0x5e3   :  { %v1194_v48 = vand.u32 4294901760, %v1193_v47 }
 0x5e5   :  { %16491 = vmatmul.mubr.f32.vlgmr.msra.gmra.mrb[2].mxu0 %v1194_v48 }
 0x5e6   :  { %18680 = vmatpush3.bf16.msra.mxu0 %v20415_v28  ;;  %16501 = vmatprep.mubr.msk.f32.mxu0 %vm20320_vm0, %v20321_v4 }
 0x5e7   :  { %18681 = vmatprep.subr.bf16.mxu0 %v20319_v0 }
 0x5ea   :  { %18683 = vmatpush3.bf16.msra.mxu0 %v20419_v29 }
 0x5eb   :  { %18684 = vmatprep.subr.bf16.mxu0 %v20319_v0 }
 0x5ed   :  { %16502 = vmatmul.mubr.f32.vlgmr.msra.gmra.mrb[2].mxu0 %v1190_v44 }
 0x5ee   :  { %18686 = vmatpush3.bf16.msra.mxu0 %v20425_v30  ;;  %16512 = vmatprep.mubr.msk.f32.mxu0 %vm20320_vm0, %v20321_v4 }
 0x5ef   :  { %18687 = vmatprep.subr.bf16.mxu0 %v20319_v0 }
 0x5f2   :  { %18689 = vmatpush3.bf16.msra.mxu0 %v20430_v31 }
 0x5f3   :  { %18690 = vmatprep.subr.bf16.mxu0 %v20319_v0 }
 0x5f5   :  { %16513 = vmatmul.mubr.f32.vlgmr.msra.gmra.mrb[2].mxu0 %v1191_v45 }
 0x5f6   :  { %18692 = vmatpush3.bf16.msra.mxu0 %v20403_v10  ;;  %16523 = vmatprep.mubr.msk.f32.mxu0 %vm20320_vm0, %v20321_v4 }
 0x5f7   :  { %18693 = vmatprep.subr.bf16.mxu0 %v20319_v0 }
 0x5fa   :  { %18695 = vmatpush3.bf16.msra.mxu0 %v20406_v15 }
 0x5fb   :  { %18696 = vmatprep.subr.bf16.mxu0 %v20319_v0 }
 0x5fd   :  { %16524 = vmatmul.mubr.f32.vlgmr.msra.gmra.mrb[2].mxu0 %v1192_v46 }
 0x5fe   :  { %18698 = vmatpush3.bf16.msra.mxu0 %v20443_v32  ;;  %16534 = vmatprep.mubr.msk.f32.mxu0 %vm20320_vm0, %v20321_v4 }
 0x5ff   :  { %18699 = vmatprep.subr.bf16.mxu0 %v20319_v0 }
 0x602   :  { %18701 = vmatpush3.bf16.msra.mxu0 %v20448_v33 }
 0x603   :  { %18702 = vmatprep.subr.bf16.mxu0 %v20319_v0 }
 0x605   :  { %16535 = vmatmul.mubr.f32.vlgmr.msra.gmra.mrb[2].mxu0 %v1190_v44 }
 0x606   :  { %18704 = vmatpush3.bf16.msra.mxu0 %v20403_v10  ;;  %16545 = vmatprep.mubr.msk.f32.mxu0 %vm20320_vm0, %v20321_v4 }
 0x607   :  { %18705 = vmatprep.subr.bf16.mxu0 %v20319_v0 }
 0x60a   :  { %18707 = vmatpush3.bf16.msra.mxu0 %v20406_v15 }
 0x60b   :  { %18744 = vmatprep.subr.bf16.mxu0 %v20319_v0 }
 0x60d   :  { %16546 = vmatmul.mubr.f32.vlgmr.msra.gmra.mrb[2].mxu0 %v1190_v44 }
 0x60e   :  { %18746 = vmatpush3.bf16.msra.mxu0 %v20403_v10  ;;  %16622 = vmatprep.mubr.msk.f32.mxu0 %vm20320_vm0, %v20321_v4 }
 0x60f   :  { %18747 = vmatprep.subr.bf16.mxu0 %v20319_v0 }
 0x612   :  { %18749 = vmatpush3.bf16.msra.mxu0 %v20406_v15 }
 0x613   :  { %18750 = vmatprep.subr.bf16.mxu0 %v20319_v0 }
 0x6e0   :  { %v1602_v49 = vpop.f32.mrb[2].mxu0 }
 0x6e1   :  { %v19898_v50 = vadd.f32 %v20475_v37, %v1602_v49  ;;  %v16547_v51 = vpop.f32.mrb[3].mxu0 }
 0x6e3   :  { %1614 = vrot.lane.b32.xlu1 %v19898_v50, %s20323_s28  ;;  %v1606_v54 = vadd.f32 %v19898_v50, %v15249_v53 }
 0x6e5   :  { %v15250_v55 = vmul.f32 -1.442695, %v1606_v54 }
 0x6e7   :  { %1636 = vperm.xlu1 %20221, %v15251_v52   ;;  %20235 = vpow2.f32 %v15250_v55 }
 0x6f1   :  { %v20236_v56 = vpop.eup %20235 }
 0x6f2   :  { %v1610_v57 = vadd.f32 1.0, %v20236_v56 }
 0x6f4   :  { %20237 = vrcp.f32 %v1610_v57 }
 0x6fe   :  { %v20238_v58 = vpop.eup %20237 }
 0x6ff   :  { %v1624_v3 = vsub.f32 1.0, %v20238_v58  ;;  %v1630_v6 = vmul.f32 %v20238_v58, %v20537_v41 }
 0x755   :  { %v1615_v59 = vpop.permute.xlu1 %1614 }
 0x756   :  { %v1617_v60 = vmul.f32 %v20238_v58, %v1615_v59 }
 0x758   :  { %1619 = vrot.lane.b32.xlu0 %v1617_v60, %s20323_s28 }
 0x75c   :  { %1643 = vperm.xlu0 %20222, %v1640_v61  }
 0x766   :  { %v1637_v2 = vpop.permute.xlu1 %1636 }
 0x7ca   :  { %v1620_v62 = vpop.permute.xlu0 %1619 }
 0x7cb   :  { %v1622_v63 = vadd.f32 %v15249_v53, %v1620_v62 }
 0x7cd   :  { %20239 = vtanh.f32 %v1622_v63 }
 0x7d7   :  { %v20240_v1 = vpop.eup %20239 }
 0x7d8   :  { %1626 = vrot.lane.b32.xlu1 %v20240_v1, %s20324_s12 }
 0x7db   :  { %v1644_v8 = vpop.permute.xlu0 %1643 }
 0x7dc   :  { %v1646_v11 = vmul.f32 %v1644_v8, %v20537_v41  ;;  %v2174_v41 = vsub.f32 1.0, %v15254_v25 }
 0x84a   :  { %v1627_v5 = vpop.permute.xlu1 %1626 }
 0x84b   :  { %v1629_v7 = vmul.f32 %v1627_v5, %v1624_v3  ;;  %v15255_v3 = vld [vmem:[%s22193_s0 + $0x8] sm:$0x3] }
 0x84d   :  { %v1631_v9 = vadd.f32 %v1630_v6, %v1629_v7 }
 0x84f   :  { %v1639_v12 = vmul.f32 %v1637_v2, %v1631_v9  ;;  %v15257_v2 = vld [vmem:[%s22191_s1 + $0x8] sm:$0x3] }
 0x851   :  { %v20590_v13 = vadd.f32 %v1646_v11, %v1639_v12 }
 0x853   :  { %1651 = vrot.lane.b32.xlu0 %v20590_v13, %s20324_s12 }
 0x8c5   :  { %v1652_v14 = vpop.permute.xlu0 %1651 }
 0x8c6   :  { %v1653_v16 = vsel %vm50_vm1, %v1652_v14, 0 }
 0x8c7   :  { %v1724_v17 = vand.u32 4294901760, %v1653_v16 }
 0x8c9   :  { %v1725_v18 = vsub.f32 %v1653_v16, %v1724_v17 }
 0x8cb   :  { %v1726_v19 = vand.u32 4294901760, %v1725_v18 }
 0x8cd   :  { %v1727_v20 = vsub.f32 %v1725_v18, %v1726_v19 }
 0x8cf   :  { %v1728_v21 = vand.u32 4294901760, %v1727_v20 }
 0x8d1   :  { %16557 = vmatmul.mubr.f32.vlgmr.msra.gmra.mrb[2].mxu1 %v1728_v21 }
 0x8d2   :  { %18716 = vmatpush3.bf16.msra.mxu1 %v20415_v28  ;;  %16567 = vmatprep.mubr.msk.f32.mxu1 %vm20320_vm0, %v20321_v4 }
 0x8d3   :  { %18717 = vmatprep.subr.bf16.mxu1 %v20319_v0 }
 0x8d6   :  { %18719 = vmatpush3.bf16.msra.mxu1 %v20419_v29 }
 0x8d7   :  { %18720 = vmatprep.subr.bf16.mxu1 %v20319_v0 }
 0x8d9   :  { %16568 = vmatmul.mubr.f32.vlgmr.msra.gmra.mrb[2].mxu1 %v1724_v17 }
 0x8da   :  { %18722 = vmatpush3.bf16.msra.mxu1 %v20425_v30  ;;  %16578 = vmatprep.mubr.msk.f32.mxu1 %vm20320_vm0, %v20321_v4 }
 0x8db   :  { %18723 = vmatprep.subr.bf16.mxu1 %v20319_v0 }
 0x8de   :  { %18725 = vmatpush3.bf16.msra.mxu1 %v20430_v31 }
 0x8df   :  { %18726 = vmatprep.subr.bf16.mxu1 %v20319_v0 }
 0x8e1   :  { %16579 = vmatmul.mubr.f32.vlgmr.msra.gmra.mrb[2].mxu1 %v1725_v18 }
 0x8e2   :  { %18728 = vmatpush3.bf16.msra.mxu1 %v20403_v10  ;;  %16589 = vmatprep.mubr.msk.f32.mxu1 %vm20320_vm0, %v20321_v4 }
 0x8e3   :  { %18729 = vmatprep.subr.bf16.mxu1 %v20319_v0 }
 0x8e6   :  { %18731 = vmatpush3.bf16.msra.mxu1 %v20406_v15 }
 0x8e7   :  { %18732 = vmatprep.subr.bf16.mxu1 %v20319_v0 }
 0x8e9   :  { %16590 = vmatmul.mubr.f32.vlgmr.msra.gmra.mrb[2].mxu1 %v1726_v19 }
 0x8ea   :  { %18734 = vmatpush3.bf16.msra.mxu1 %v20443_v32  ;;  %16600 = vmatprep.mubr.msk.f32.mxu1 %vm20320_vm0, %v20321_v4 }
 0x8eb   :  { %18735 = vmatprep.subr.bf16.mxu1 %v20319_v0 }
 0x8ee   :  { %18737 = vmatpush3.bf16.msra.mxu1 %v20448_v33 }
 0x8ef   :  { %18738 = vmatprep.subr.bf16.mxu1 %v20319_v0 }
 0x8f1   :  { %16601 = vmatmul.mubr.f32.vlgmr.msra.gmra.mrb[2].mxu1 %v1724_v17 }
 0x8f2   :  { %18740 = vmatpush3.bf16.msra.mxu1 %v20403_v10  ;;  %16611 = vmatprep.mubr.msk.f32.mxu1 %vm20320_vm0, %v20321_v4 }
 0x8f3   :  { %18741 = vmatprep.subr.bf16.mxu1 %v20319_v0 }
 0x8f6   :  { %18743 = vmatpush3.bf16.msra.mxu1 %v20406_v15 }
 0x8f7   :  { %18780 = vmatprep.subr.bf16.mxu1 %v20319_v0 }
 0x8f9   :  { %16612 = vmatmul.mubr.f32.vlgmr.msra.gmra.mrb[2].mxu1 %v1724_v17 }
 0x8fa   :  { %18782 = vmatpush3.bf16.msra.mxu1 %v20403_v10  ;;  %16688 = vmatprep.mubr.msk.f32.mxu1 %vm20320_vm0, %v20321_v4 }
 0x8fb   :  { %18783 = vmatprep.subr.bf16.mxu1 %v20319_v0 }
 0x8fe   :  { %18785 = vmatpush3.bf16.msra.mxu1 %v20406_v15 }
 0x8ff   :  { %18786 = vmatprep.subr.bf16.mxu1 %v20319_v0 }
 0x9cc   :  { %v2136_v22 = vpop.f32.mrb[2].mxu1 }
 0x9cd   :  { %v19899_v23 = vadd.f32 %v20475_v37, %v2136_v22  ;;  %v16613_v24 = vpop.f32.mrb[3].mxu1 }
 0x9cf   :  { %2148 = vrot.lane.b32.xlu1 %v19899_v23, %s20323_s28  ;;  %v2140_v27 = vadd.f32 %v19899_v23, %v15252_v26 }
 0x9d1   :  { %v15253_v34 = vmul.f32 -1.442695, %v2140_v27 }
 0x9d3   :  { %2170 = vperm.xlu1 %20221, %v15254_v25   ;;  %20241 = vpow2.f32 %v15253_v34 }
 0x9dd   :  { %v20242_v35 = vpop.eup %20241 }
 0x9de   :  { %v2144_v36 = vadd.f32 1.0, %v20242_v35 }
 0x9e0   :  { %20243 = vrcp.f32 %v2144_v36 }
 0x9ea   :  { %v20244_v38 = vpop.eup %20243 }
 0x9eb   :  { %v2158_v46 = vsub.f32 1.0, %v20244_v38  ;;  %v2164_v48 = vmul.f32 %v20244_v38, %v20590_v13 }
 0xa41   :  { %v2149_v39 = vpop.permute.xlu1 %2148 }
 0xa42   :  { %v2151_v40 = vmul.f32 %v20244_v38, %v2149_v39 }
 0xa44   :  { %2153 = vrot.lane.b32.xlu0 %v2151_v40, %s20323_s28 }
 0xa48   :  { %2177 = vperm.xlu0 %20222, %v2174_v41  }
 0xa52   :  { %v2171_v45 = vpop.permute.xlu1 %2170 }
 0xab6   :  { %v2154_v42 = vpop.permute.xlu0 %2153 }
 0xab7   :  { %v2156_v43 = vadd.f32 %v15252_v26, %v2154_v42 }
 0xab9   :  { %20245 = vtanh.f32 %v2156_v43 }
 0xac3   :  { %v20246_v44 = vpop.eup %20245 }
 0xac4   :  { %2160 = vrot.lane.b32.xlu1 %v20246_v44, %s20324_s12 }
 0xac7   :  { %v2178_v50 = vpop.permute.xlu0 %2177 }
 0xac8   :  { %v2180_v52 = vmul.f32 %v2178_v50, %v20590_v13  ;;  %v2708_v13 = vsub.f32 1.0, %v15257_v2 }
 0xb36   :  { %v2161_v47 = vpop.permute.xlu1 %2160 }
 0xb37   :  { %v2163_v49 = vmul.f32 %v2161_v47, %v2158_v46  ;;  %v15258_v46 = vld [vmem:[%s22193_s0 + $0xa] sm:$0x3] }
 0xb39   :  { %v2165_v51 = vadd.f32 %v2164_v48, %v2163_v49 }
 0xb3b   :  { %v2173_v53 = vmul.f32 %v2171_v45, %v2165_v51  ;;  %v15260_v45 = vld [vmem:[%s22191_s1 + $0xa] sm:$0x3] }
 0xb3d   :  { %v20643_v54 = vadd.f32 %v2180_v52, %v2173_v53 }
 0xb3f   :  { %2185 = vrot.lane.b32.xlu0 %v20643_v54, %s20324_s12 }
 0xbb1   :  { %v2186_v55 = vpop.permute.xlu0 %2185 }
 0xbb2   :  { %v2187_v56 = vsel %vm50_vm1, %v2186_v55, 0 }
 0xbb3   :  { %v2258_v57 = vand.u32 4294901760, %v2187_v56 }
 0xbb5   :  { %v2259_v58 = vsub.f32 %v2187_v56, %v2258_v57 }
 0xbb7   :  { %v2260_v59 = vand.u32 4294901760, %v2259_v58 }
 0xbb9   :  { %v2261_v60 = vsub.f32 %v2259_v58, %v2260_v59 }
 0xbbb   :  { %v2262_v61 = vand.u32 4294901760, %v2261_v60 }
 0xbbd   :  { %16623 = vmatmul.mubr.f32.vlgmr.msra.gmra.mrb[4].mxu0 %v2262_v61 }
 0xbbe   :  { %18752 = vmatpush3.bf16.msra.mxu0 %v20415_v28  ;;  %16633 = vmatprep.mubr.msk.f32.mxu0 %vm20320_vm0, %v20321_v4 }
 0xbbf   :  { %18753 = vmatprep.subr.bf16.mxu0 %v20319_v0 }
 0xbc2   :  { %18755 = vmatpush3.bf16.msra.mxu0 %v20419_v29 }
 0xbc3   :  { %18756 = vmatprep.subr.bf16.mxu0 %v20319_v0 }
 0xbc5   :  { %16634 = vmatmul.mubr.f32.vlgmr.msra.gmra.mrb[4].mxu0 %v2258_v57 }
 0xbc6   :  { %18758 = vmatpush3.bf16.msra.mxu0 %v20425_v30  ;;  %16644 = vmatprep.mubr.msk.f32.mxu0 %vm20320_vm0, %v20321_v4 }
 0xbc7   :  { %18759 = vmatprep.subr.bf16.mxu0 %v20319_v0 }
 0xbca   :  { %18761 = vmatpush3.bf16.msra.mxu0 %v20430_v31 }
 0xbcb   :  { %18762 = vmatprep.subr.bf16.mxu0 %v20319_v0 }
 0xbcd   :  { %16645 = vmatmul.mubr.f32.vlgmr.msra.gmra.mrb[4].mxu0 %v2259_v58 }
 0xbce   :  { %18764 = vmatpush3.bf16.msra.mxu0 %v20403_v10  ;;  %16655 = vmatprep.mubr.msk.f32.mxu0 %vm20320_vm0, %v20321_v4 }
 0xbcf   :  { %18765 = vmatprep.subr.bf16.mxu0 %v20319_v0 }
 0xbd2   :  { %18767 = vmatpush3.bf16.msra.mxu0 %v20406_v15 }
 0xbd3   :  { %18768 = vmatprep.subr.bf16.mxu0 %v20319_v0 }
 0xbd5   :  { %16656 = vmatmul.mubr.f32.vlgmr.msra.gmra.mrb[4].mxu0 %v2260_v59 }
 0xbd6   :  { %18770 = vmatpush3.bf16.msra.mxu0 %v20443_v32  ;;  %16666 = vmatprep.mubr.msk.f32.mxu0 %vm20320_vm0, %v20321_v4 }
 0xbd7   :  { %18771 = vmatprep.subr.bf16.mxu0 %v20319_v0 }
 0xbda   :  { %18773 = vmatpush3.bf16.msra.mxu0 %v20448_v33 }
 0xbdb   :  { %18774 = vmatprep.subr.bf16.mxu0 %v20319_v0 }
 0xbdd   :  { %16667 = vmatmul.mubr.f32.vlgmr.msra.gmra.mrb[4].mxu0 %v2258_v57 }
 0xbde   :  { %18776 = vmatpush3.bf16.msra.mxu0 %v20403_v10  ;;  %16677 = vmatprep.mubr.msk.f32.mxu0 %vm20320_vm0, %v20321_v4 }
 0xbdf   :  { %18777 = vmatprep.subr.bf16.mxu0 %v20319_v0 }
 0xbe2   :  { %18779 = vmatpush3.bf16.msra.mxu0 %v20406_v15 }
 0xbe3   :  { %18816 = vmatprep.subr.bf16.mxu0 %v20319_v0 }
 0xbe5   :  { %16678 = vmatmul.mubr.f32.vlgmr.msra.gmra.mrb[4].mxu0 %v2258_v57 }
 0xbe6   :  { %18818 = vmatpush3.bf16.msra.mxu0 %v20403_v10  ;;  %16754 = vmatprep.mubr.msk.f32.mxu0 %vm20320_vm0, %v20321_v4 }
 0xbe7   :  { %18819 = vmatprep.subr.bf16.mxu0 %v20319_v0 }
 0xbea   :  { %18821 = vmatpush3.bf16.msra.mxu0 %v20406_v15 }
 0xbeb   :  { %18822 = vmatprep.subr.bf16.mxu0 %v20319_v0 }
 0xcb8   :  { %v2670_v62 = vpop.f32.mrb[4].mxu0 }
 0xcb9   :  { %v19900_v63 = vadd.f32 %v20475_v37, %v2670_v62  ;;  %v16679_v1 = vpop.f32.mrb[5].mxu0 }
 0xcbb   :  { %2682 = vrot.lane.b32.xlu1 %v19900_v63, %s20323_s28  ;;  %v2674_v5 = vadd.f32 %v19900_v63, %v15255_v3 }
 0xcbd   :  { %v15256_v6 = vmul.f32 -1.442695, %v2674_v5 }
 0xcbf   :  { %2704 = vperm.xlu1 %20221, %v15257_v2   ;;  %20247 = vpow2.f32 %v15256_v6 }
 0xcc9   :  { %v20248_v7 = vpop.eup %20247 }
 0xcca   :  { %v2678_v8 = vadd.f32 1.0, %v20248_v7 }
 0xccc   :  { %20249 = vrcp.f32 %v2678_v8 }
 0xcd6   :  { %v20250_v9 = vpop.eup %20249 }
 0xcd7   :  { %v2692_v19 = vsub.f32 1.0, %v20250_v9  ;;  %v2698_v21 = vmul.f32 %v20250_v9, %v20643_v54 }
 0xd2d   :  { %v2683_v11 = vpop.permute.xlu1 %2682 }
 0xd2e   :  { %v2685_v12 = vmul.f32 %v20250_v9, %v2683_v11 }
 0xd30   :  { %2687 = vrot.lane.b32.xlu0 %v2685_v12, %s20323_s28 }
 0xd34   :  { %2711 = vperm.xlu0 %20222, %v2708_v13  }
 0xd3e   :  { %v2705_v18 = vpop.permute.xlu1 %2704 }
 0xda2   :  { %v2688_v14 = vpop.permute.xlu0 %2687 }
 0xda3   :  { %v2690_v16 = vadd.f32 %v15255_v3, %v2688_v14 }
 0xda5   :  { %20251 = vtanh.f32 %v2690_v16 }
 0xdaf   :  { %v20252_v17 = vpop.eup %20251 }
 0xdb0   :  { %2694 = vrot.lane.b32.xlu1 %v20252_v17, %s20324_s12 }
 0xdb3   :  { %v2712_v23 = vpop.permute.xlu0 %2711 }
 0xdb4   :  { %v2714_v25 = vmul.f32 %v2712_v23, %v20643_v54  ;;  %v3242_v54 = vsub.f32 1.0, %v15260_v45 }
 0xe22   :  { %v2695_v20 = vpop.permute.xlu1 %2694 }
 0xe23   :  { %v2697_v22 = vmul.f32 %v2695_v20, %v2692_v19  ;;  %v15261_v19 = vld [vmem:[%s22193_s0 + $0xc] sm:$0x3] }
 0xe25   :  { %v2699_v24 = vadd.f32 %v2698_v21, %v2697_v22 }
 0xe27   :  { %v2707_v26 = vmul.f32 %v2705_v18, %v2699_v24  ;;  %v15263_v18 = vld [vmem:[%s22191_s1 + $0xc] sm:$0x3] }
 0xe29   :  { %v20696_v27 = vadd.f32 %v2714_v25, %v2707_v26  ;;  %v3776_v26 = vsub.f32 1.0, %v15263_v18 }
 0xe2b   :  { %2719 = vrot.lane.b32.xlu0 %v20696_v27, %s20324_s12 }
 0xe9d   :  { %v2720_v34 = vpop.permute.xlu0 %2719 }
 0xe9e   :  { %v2721_v35 = vsel %vm50_vm1, %v2720_v34, 0 }
 0xe9f   :  { %v2792_v36 = vand.u32 4294901760, %v2721_v35 }
 0xea1   :  { %v2793_v38 = vsub.f32 %v2721_v35, %v2792_v36 }
 0xea3   :  { %v2794_v39 = vand.u32 4294901760, %v2793_v38 }
 0xea5   :  { %v2795_v40 = vsub.f32 %v2793_v38, %v2794_v39 }
 0xea7   :  { %v2796_v41 = vand.u32 4294901760, %v2795_v40 }
 0xea9   :  { %16689 = vmatmul.mubr.f32.vlgmr.msra.gmra.mrb[4].mxu1 %v2796_v41 }
 0xeaa   :  { %18788 = vmatpush3.bf16.msra.mxu1 %v20415_v28  ;;  %16699 = vmatprep.mubr.msk.f32.mxu1 %vm20320_vm0, %v20321_v4 }
 0xeab   :  { %18789 = vmatprep.subr.bf16.mxu1 %v20319_v0 }
 0xeae   :  { %18791 = vmatpush3.bf16.msra.mxu1 %v20419_v29 }
 0xeaf   :  { %18792 = vmatprep.subr.bf16.mxu1 %v20319_v0 }
 0xeb1   :  { %16700 = vmatmul.mubr.f32.vlgmr.msra.gmra.mrb[4].mxu1 %v2792_v36 }
 0xeb2   :  { %18794 = vmatpush3.bf16.msra.mxu1 %v20425_v30  ;;  %16710 = vmatprep.mubr.msk.f32.mxu1 %vm20320_vm0, %v20321_v4 }
 0xeb3   :  { %18795 = vmatprep.subr.bf16.mxu1 %v20319_v0 }
 0xeb6   :  { %18797 = vmatpush3.bf16.msra.mxu1 %v20430_v31 }
 0xeb7   :  { %18798 = vmatprep.subr.bf16.mxu1 %v20319_v0 }
 0xeb9   :  { %16711 = vmatmul.mubr.f32.vlgmr.msra.gmra.mrb[4].mxu1 %v2793_v38 }
 0xeba   :  { %18800 = vmatpush3.bf16.msra.mxu1 %v20403_v10  ;;  %16721 = vmatprep.mubr.msk.f32.mxu1 %vm20320_vm0, %v20321_v4 }
 0xebb   :  { %18801 = vmatprep.subr.bf16.mxu1 %v20319_v0 }
 0xebe   :  { %18803 = vmatpush3.bf16.msra.mxu1 %v20406_v15 }
 0xebf   :  { %18804 = vmatprep.subr.bf16.mxu1 %v20319_v0 }
 0xec1   :  { %16722 = vmatmul.mubr.f32.vlgmr.msra.gmra.mrb[4].mxu1 %v2794_v39 }
 0xec2   :  { %18806 = vmatpush3.bf16.msra.mxu1 %v20443_v32  ;;  %16732 = vmatprep.mubr.msk.f32.mxu1 %vm20320_vm0, %v20321_v4 }
 0xec3   :  { %18807 = vmatprep.subr.bf16.mxu1 %v20319_v0 }
 0xec6   :  { %18809 = vmatpush3.bf16.msra.mxu1 %v20448_v33 }
 0xec7   :  { %18810 = vmatprep.subr.bf16.mxu1 %v20319_v0 }
 0xec9   :  { %16733 = vmatmul.mubr.f32.vlgmr.msra.gmra.mrb[4].mxu1 %v2792_v36 }
 0xeca   :  { %18812 = vmatpush3.bf16.msra.mxu1 %v20403_v10  ;;  %16743 = vmatprep.mubr.msk.f32.mxu1 %vm20320_vm0, %v20321_v4 }
 0xecb   :  { %18813 = vmatprep.subr.bf16.mxu1 %v20319_v0 }
 0xece   :  { %18815 = vmatpush3.bf16.msra.mxu1 %v20406_v15 }
 0xecf   :  { %18852 = vmatprep.subr.bf16.mxu1 %v20319_v0 }
 0xed1   :  { %16744 = vmatmul.mubr.f32.vlgmr.msra.gmra.mrb[4].mxu1 %v2792_v36 }
 0xed2   :  { %18854 = vmatpush3.bf16.msra.mxu1 %v20403_v10  ;;  %16820 = vmatprep.mubr.msk.f32.mxu1 %vm20320_vm0, %v20321_v4 }
 0xed3   :  { %18855 = vmatprep.subr.bf16.mxu1 %v20319_v0 }
 0xed6   :  { %18857 = vmatpush3.bf16.msra.mxu1 %v20406_v15 }
 0xed7   :  { %18858 = vmatprep.subr.bf16.mxu1 %v20319_v0 }
 0xfa4   :  { %v3204_v42 = vpop.f32.mrb[4].mxu1 }
 0xfa5   :  { %v19901_v43 = vadd.f32 %v20475_v37, %v3204_v42  ;;  %v16745_v44 = vpop.f32.mrb[5].mxu1 }
 0xfa7   :  { %3216 = vrot.lane.b32.xlu1 %v19901_v43, %s20323_s28  ;;  %v3208_v47 = vadd.f32 %v19901_v43, %v15258_v46 }
 0xfa9   :  { %v15259_v48 = vmul.f32 -1.442695, %v3208_v47 }
 0xfab   :  { %3238 = vperm.xlu1 %20221, %v15260_v45   ;;  %20253 = vpow2.f32 %v15259_v48 }
 0xfb5   :  { %v20254_v49 = vpop.eup %20253 }
 0xfb6   :  { %v3212_v50 = vadd.f32 1.0, %v20254_v49 }
 0xfb8   :  { %20255 = vrcp.f32 %v3212_v50 }
 0xfc2   :  { %v20256_v51 = vpop.eup %20255 }
 0xfc3   :  { %v3226_v59 = vsub.f32 1.0, %v20256_v51  ;;  %v3232_v61 = vmul.f32 %v20256_v51, %v20696_v27 }
0x1019   :  { %v3217_v52 = vpop.permute.xlu1 %3216 }
0x101a   :  { %v3219_v53 = vmul.f32 %v20256_v51, %v3217_v52 }
0x101c   :  { %3221 = vrot.lane.b32.xlu0 %v3219_v53, %s20323_s28 }
0x1020   :  { %3245 = vperm.xlu0 %20222, %v3242_v54  }
0x102a   :  { %v3239_v58 = vpop.permute.xlu1 %3238 }
0x108e   :  { %v3222_v55 = vpop.permute.xlu0 %3221 }
0x108f   :  { %v3224_v56 = vadd.f32 %v15258_v46, %v3222_v55 }
0x1091   :  { %20257 = vtanh.f32 %v3224_v56 }
0x109b   :  { %v20258_v57 = vpop.eup %20257 }
0x109c   :  { %3228 = vrot.lane.b32.xlu1 %v20258_v57, %s20324_s12 }
0x109f   :  { %v3246_v63 = vpop.permute.xlu0 %3245 }
0x10a0   :  { %v3248_v2 = vmul.f32 %v3246_v63, %v20696_v27 }
0x110e   :  { %v3229_v60 = vpop.permute.xlu1 %3228 }
0x110f   :  { %v3231_v62 = vmul.f32 %v3229_v60, %v3226_v59  ;;  %v4318_v59 = vld [vmem:[%s22194_s5] sm:$0xff]  ;;  %v4319_v60 = vld [vmem:[%s22194_s5 + $0x8] sm:$0xff] }
0x1111   :  { %v3233_v1 = vadd.f32 %v3232_v61, %v3231_v62  ;;  %v4360_v61 = vand.u32 4294901760, %v4318_v59  ;;  %v4363_v62 = vand.u32 4294901760, %v4319_v60 }
0x1113   :  { %v3241_v3 = vmul.f32 %v3239_v58, %v3233_v1  ;;  %v20858_v1 = vpack.c.bf16 %v4363_v62, %v4360_v61 }
0x1115   :  { %v20749_v5 = vadd.f32 %v3248_v2, %v3241_v3  ;;  %v4320_v2 = vld [vmem:[%s22194_s5 + $0x10] sm:$0xff]  ;;  %v4321_v3 = vld [vmem:[%s22194_s5 + $0x18] sm:$0xff] }
0x1117   :  { %3253 = vrot.lane.b32.xlu0 %v20749_v5, %s20324_s12 }
0x1189   :  { %v3254_v6 = vpop.permute.xlu0 %3253 }
0x118a   :  { %v3255_v7 = vsel %vm50_vm1, %v3254_v6, 0  ;;  %v4369_v6 = vand.u32 4294901760, %v4321_v3 }
0x118b   :  { %v3326_v8 = vand.u32 4294901760, %v3255_v7 }
0x118d   :  { %v3327_v9 = vsub.f32 %v3255_v7, %v3326_v8  ;;  %v4340_v7 = vld [vmem:[%s22195_s2] sm:$0x3] }
0x118f   :  { %v3328_v11 = vand.u32 4294901760, %v3327_v9 }
0x1191   :  { %v3329_v12 = vsub.f32 %v3327_v9, %v3328_v11 }
0x1193   :  { %v3330_v13 = vand.u32 4294901760, %v3329_v12 }
0x1195   :  { %16755 = vmatmul.mubr.f32.vlgmr.msra.gmra.mrb[6].mxu0 %v3330_v13 }
0x1196   :  { %18824 = vmatpush3.bf16.msra.mxu0 %v20415_v28  ;;  %16765 = vmatprep.mubr.msk.f32.mxu0 %vm20320_vm0, %v20321_v4 }
0x1197   :  { %18825 = vmatprep.subr.bf16.mxu0 %v20319_v0 }
0x119a   :  { %18827 = vmatpush3.bf16.msra.mxu0 %v20419_v29 }
0x119b   :  { %18828 = vmatprep.subr.bf16.mxu0 %v20319_v0 }
0x119d   :  { %16766 = vmatmul.mubr.f32.vlgmr.msra.gmra.mrb[6].mxu0 %v3326_v8 }
0x119e   :  { %18830 = vmatpush3.bf16.msra.mxu0 %v20425_v30  ;;  %16776 = vmatprep.mubr.msk.f32.mxu0 %vm20320_vm0, %v20321_v4 }
0x119f   :  { %18831 = vmatprep.subr.bf16.mxu0 %v20319_v0 }
0x11a2   :  { %18833 = vmatpush3.bf16.msra.mxu0 %v20430_v31 }
0x11a3   :  { %18834 = vmatprep.subr.bf16.mxu0 %v20319_v0 }
0x11a5   :  { %16777 = vmatmul.mubr.f32.vlgmr.msra.gmra.mrb[6].mxu0 %v3327_v9  ;;  %v4322_v9 = vld [vmem:[%s22194_s5 + $0x20] sm:$0xff] }
0x11a6   :  { %18836 = vmatpush3.bf16.msra.mxu0 %v20403_v10  ;;  %16787 = vmatprep.mubr.msk.f32.mxu0 %vm20320_vm0, %v20321_v4  ;;  %v4372_v12 = vand.u32 4294901760, %v4322_v9 }
0x11a7   :  { %18837 = vmatprep.subr.bf16.mxu0 %v20319_v0 }
0x11aa   :  { %18839 = vmatpush3.bf16.msra.mxu0 %v20406_v15 }
0x11ab   :  { %18840 = vmatprep.subr.bf16.mxu0 %v20319_v0 }
0x11ad   :  { %16788 = vmatmul.mubr.f32.vlgmr.msra.gmra.mrb[6].mxu0 %v3328_v11  ;;  %v4323_v11 = vld [vmem:[%s22194_s5 + $0x28] sm:$0xff] }
0x11ae   :  { %18842 = vmatpush3.bf16.msra.mxu0 %v20443_v32  ;;  %16798 = vmatprep.mubr.msk.f32.mxu0 %vm20320_vm0, %v20321_v4  ;;  %v4375_v13 = vand.u32 4294901760, %v4323_v11 }
0x11af   :  { %18843 = vmatprep.subr.bf16.mxu0 %v20319_v0 }
0x11b2   :  { %18845 = vmatpush3.bf16.msra.mxu0 %v20448_v33 }
0x11b3   :  { %18846 = vmatprep.subr.bf16.mxu0 %v20319_v0 }
0x11b5   :  { %16799 = vmatmul.mubr.f32.vlgmr.msra.gmra.mrb[6].mxu0 %v3326_v8 }
0x11b6   :  { %18848 = vmatpush3.bf16.msra.mxu0 %v20403_v10  ;;  %16809 = vmatprep.mubr.msk.f32.mxu0 %vm20320_vm0, %v20321_v4 }
0x11b7   :  { %18849 = vmatprep.subr.bf16.mxu0 %v20319_v0 }
0x11ba   :  { %18851 = vmatpush3.bf16.msra.mxu0 %v20406_v15 }
0x11bb   :  { %18888 = vmatprep.subr.bf16.mxu0 %v20319_v0 }
0x11bd   :  { %16810 = vmatmul.mubr.f32.vlgmr.msra.gmra.mrb[6].mxu0 %v3326_v8 }
0x11be   :  { %16894 = vmatprep.mubr.msk.f32.mxu0 %vm20320_vm0, %v20321_v4  ;;  %18890 = vmatpush3.bf16.msra.mxu0 %v20858_v1 }
0x11bf   :  { %18891 = vmatprep.subr.bf16.mxu0 %v20319_v0 }
0x1290   :  { %v3738_v14 = vpop.f32.mrb[6].mxu0 }
0x1291   :  { %v19902_v16 = vadd.f32 %v20475_v37, %v3738_v14  ;;  %v16811_v17 = vpop.f32.mrb[7].mxu0  ;;  %v20881_v14 = vpack.c.bf16 %v4375_v13, %v4372_v12 }
0x1292   :  { %v4451_v17 = vsub.f32 %v4319_v60, %v4363_v62 }
0x1293   :  { %3750 = vrot.lane.b32.xlu1 %v19902_v16, %s20323_s28  ;;  %v3742_v20 = vadd.f32 %v19902_v16, %v15261_v19  ;;  %v4444_v16 = vsub.f32 %v4318_v59, %v4360_v61 }
0x1295   :  { %v15262_v21 = vmul.f32 -1.442695, %v3742_v20 }
0x1297   :  { %3772 = vperm.xlu1 %20221, %v15263_v18   ;;  %20259 = vpow2.f32 %v15262_v21  ;;  %v4324_v18 = vld [vmem:[%s22194_s5 + $0x30] sm:$0xff] }
0x1298   :  { %v4378_v20 = vand.u32 4294901760, %v4324_v18 }
0x12a1   :  { %v20260_v22 = vpop.eup %20259 }
0x12a2   :  { %v3746_v23 = vadd.f32 1.0, %v20260_v22  ;;  %v4445_v22 = vand.u32 4294901760, %v4444_v16 }
0x12a4   :  { %20261 = vrcp.f32 %v3746_v23  ;;  %v4452_v23 = vand.u32 4294901760, %v4451_v17 }
0x12a6   :  { %v20911_v62 = vpack.c.bf16 %v4452_v23, %v4445_v22 }
0x12ae   :  { %v20262_v24 = vpop.eup %20261 }
0x12af   :  { %v3760_v38 = vsub.f32 1.0, %v20262_v24  ;;  %v3766_v40 = vmul.f32 %v20262_v24, %v20749_v5 }
0x1305   :  { %v3751_v37 = vpop.permute.xlu1 %3750 }
0x1306   :  { %v3753_v25 = vmul.f32 %v20262_v24, %v3751_v37  ;;  %v4446_v37 = vsub.f32 %v4444_v16, %v4445_v22  ;;  %v4326_v22 = vld [vmem:[%s22196_s6] sm:$0xff] }
0x1308   :  { %3755 = vrot.lane.b32.xlu0 %v3753_v25, %s20323_s28  ;;  %v4453_v25 = vsub.f32 %v4451_v17, %v4452_v23  ;;  %v4327_v23 = vld [vmem:[%s22196_s6 + $0x8] sm:$0xff] }
0x130c   :  { %3779 = vperm.xlu0 %20222, %v3776_v26  }
0x1316   :  { %v3773_v36 = vpop.permute.xlu1 %3772 }
0x137a   :  { %v3756_v27 = vpop.permute.xlu0 %3755 }
0x137b   :  { %v3758_v34 = vadd.f32 %v15261_v19, %v3756_v27  ;;  %v4325_v19 = vld [vmem:[%s22194_s5 + $0x38] sm:$0xff]  ;;  %v4465_v27 = vsub.f32 %v4321_v3, %v4369_v6 }
0x137c   :  { %v4381_v21 = vand.u32 4294901760, %v4325_v19 }
0x137d   :  { %20263 = vtanh.f32 %v3758_v34  ;;  %v4447_v34 = vand.u32 4294901760, %v4446_v37  ;;  %v4908_v37 = vand.u32 4294901760, %v4326_v22 }
0x137e   :  { %v20891_v24 = vpack.c.bf16 %v4381_v21, %v4378_v20 }
0x1387   :  { %v20264_v35 = vpop.eup %20263 }
0x1388   :  { %3762 = vrot.lane.b32.xlu1 %v20264_v35, %s20324_s12  ;;  %v4454_v35 = vand.u32 4294901760, %v4453_v25  ;;  %v4911_v25 = vand.u32 4294901760, %v4327_v23 }
0x138b   :  { %v3780_v42 = vpop.permute.xlu0 %3779 }
0x138c   :  { %v3782_v44 = vmul.f32 %v3780_v42, %v20749_v5  ;;  %v4366_v5 = vand.u32 4294901760, %v4320_v2  ;;  %v4472_v42 = vsub.f32 %v4322_v9, %v4372_v12  ;;  %v4337_v9 = vlaneseq }
0x138e   :  { %v20871_v8 = vpack.c.bf16 %v4369_v6, %v4366_v5  ;;  %v4458_v26 = vsub.f32 %v4320_v2, %v4366_v5  ;;  %v20923_v12 = vand.u32 127, %v4337_v9 }
0x1390   :  { %18893 = vmatpush3.bf16.msra.mxu0 %v20871_v8  ;;  %v20905_v59 = vpack.c.bf16 %v4465_v27, %v4458_v26 }
0x1391   :  { %18894 = vmatprep.subr.bf16.mxu0 %v20319_v0 }
0x1394   :  { %18896 = vmatpush3.bf16.msra.mxu0 %v20881_v14 }
0x1395   :  { %18897 = vmatprep.subr.bf16.mxu0 %v20319_v0 }
0x1398   :  { %18899 = vmatpush3.bf16.msra.mxu0 %v20891_v24 }
0x1399   :  { %18900 = vmatprep.subr.bf16.mxu0 %v20319_v0 }
0x13fa   :  { %v3763_v39 = vpop.permute.xlu1 %3762 }
0x13fb   :  { %v3765_v41 = vmul.f32 %v3763_v39, %v3760_v38  ;;  %v4466_v38 = vand.u32 4294901760, %v4465_v27  ;;  %v20895_v39 = vpack.c.bf16 %v4454_v35, %v4447_v34  ;;  %v4988_v34 = vsub.f32 %v4326_v22, %v4908_v37 }
0x13fc   :  { %v4995_v35 = vsub.f32 %v4327_v23, %v4911_v25 }
0x13fd   :  { %v3767_v43 = vadd.f32 %v3766_v40, %v3765_v41  ;;  %v4467_v41 = vsub.f32 %v4465_v27, %v4466_v38  ;;  %v20997_v27 = vpack.c.bf16 %v4911_v25, %v4908_v37 }
0x13ff   :  { %v3775_v45 = vmul.f32 %v3773_v36, %v3767_v43  ;;  %v4459_v36 = vand.u32 4294901760, %v4458_v26  ;;  %v4479_v43 = vsub.f32 %v4323_v11, %v4375_v13 }
0x1401   :  { %v20798_v46 = vadd.f32 %v3782_v44, %v3775_v45  ;;  %v4460_v40 = vsub.f32 %v4458_v26, %v4459_v36  ;;  %v4468_v45 = vand.u32 4294901760, %v4467_v41  ;;  %v20907_v60 = vpack.c.bf16 %v4479_v43, %v4472_v42  ;;  %v4329_v41 = vld [vmem:[%s22196_s6 + $0x18] sm:$0xff] }
0x1403   :  { %3787 = vrot.lane.b32.xlu0 %v20798_v46, %s20324_s12  ;;  %v4461_v44 = vand.u32 4294901760, %v4460_v40  ;;  %v4328_v40 = vld [vmem:[%s22196_s6 + $0x10] sm:$0xff] }
0x1475   :  { %v3788_v47 = vpop.permute.xlu0 %3787 }
0x1476   :  { %v3789_v48 = vsel %vm50_vm1, %v3788_v47, 0  ;;  %v4473_v47 = vand.u32 4294901760, %v4472_v42 }
0x1477   :  { %v3860_v49 = vand.u32 4294901760, %v3789_v48 }
0x1479   :  { %v3861_v50 = vsub.f32 %v3789_v48, %v3860_v49  ;;  %v4480_v48 = vand.u32 4294901760, %v4479_v43 }
0x147b   :  { %v3862_v51 = vand.u32 4294901760, %v3861_v50  ;;  %v20915_v2 = vpack.c.bf16 %v4480_v48, %v4473_v47 }
0x147d   :  { %v3863_v52 = vsub.f32 %v3861_v50, %v3862_v51 }
0x147f   :  { %v3864_v53 = vand.u32 4294901760, %v3863_v52  ;;  %v4486_v52 = vsub.f32 %v4324_v18, %v4378_v20 }
0x1481   :  { %16821 = vmatmul.mubr.f32.vlgmr.msra.gmra.mrb[6].mxu1 %v3864_v53  ;;  %v4493_v53 = vsub.f32 %v4325_v19, %v4381_v21 }
0x1482   :  { %18860 = vmatpush3.bf16.msra.mxu1 %v20415_v28  ;;  %16831 = vmatprep.mubr.msk.f32.mxu1 %vm20320_vm0, %v20321_v4 }
0x1483   :  { %18861 = vmatprep.subr.bf16.mxu1 %v20319_v0  ;;  %v20909_v61 = vpack.c.bf16 %v4493_v53, %v4486_v52 }
0x1486   :  { %18863 = vmatpush3.bf16.msra.mxu1 %v20419_v29  ;;  %v20313_v29 = vld [vmem:[%s22192_s4] ss:$0 sm:$0xff] }
0x1487   :  { %18864 = vmatprep.subr.bf16.mxu1 %v20319_v0 }
0x1489   :  { %16832 = vmatmul.mubr.f32.vlgmr.msra.gmra.mrb[6].mxu1 %v3860_v49 }
0x148a   :  { %18866 = vmatpush3.bf16.msra.mxu1 %v20425_v30  ;;  %16842 = vmatprep.mubr.msk.f32.mxu1 %vm20320_vm0, %v20321_v4 }
0x148b   :  { %18867 = vmatprep.subr.bf16.mxu1 %v20319_v0 }
0x148e   :  { %18869 = vmatpush3.bf16.msra.mxu1 %v20430_v31  ;;  %v15266_v31 = vld [vmem:[%s22191_s1 + $0xe] sm:$0x3] }
0x148f   :  { %18870 = vmatprep.subr.bf16.mxu1 %v20319_v0  ;;  %v4310_v63 = vsub.f32 1.0, %v15266_v31 }
0x1491   :  { %16843 = vmatmul.mubr.f32.vlgmr.msra.gmra.mrb[6].mxu1 %v3861_v50  ;;  %v4474_v50 = vsub.f32 %v4472_v42, %v4473_v47  ;;  %v4996_v47 = vand.u32 4294901760, %v4995_v35 }
0x1492   :  { %18872 = vmatpush3.bf16.msra.mxu1 %v20403_v10  ;;  %16853 = vmatprep.mubr.msk.f32.mxu1 %vm20320_vm0, %v20321_v4 }
0x1493   :  { %18873 = vmatprep.subr.bf16.mxu1 %v20319_v0 }
0x1496   :  { %18875 = vmatpush3.bf16.msra.mxu1 %v20406_v15 }
0x1497   :  { %18876 = vmatprep.subr.bf16.mxu1 %v20319_v0 }
0x1499   :  { %16854 = vmatmul.mubr.f32.vlgmr.msra.gmra.mrb[6].mxu1 %v3862_v51  ;;  %v4481_v51 = vsub.f32 %v4479_v43, %v4480_v48  ;;  %v4914_v43 = vand.u32 4294901760, %v4328_v40 }
0x149a   :  { %18878 = vmatpush3.bf16.msra.mxu1 %v20443_v32  ;;  %16864 = vmatprep.mubr.msk.f32.mxu1 %vm20320_vm0, %v20321_v4 }
0x149b   :  { %18879 = vmatprep.subr.bf16.mxu1 %v20319_v0 }
0x149e   :  { %18881 = vmatpush3.bf16.msra.mxu1 %v20448_v33 }
0x149f   :  { %18882 = vmatprep.subr.bf16.mxu1 %v20319_v0 }
0x14a1   :  { %16865 = vmatmul.mubr.f32.vlgmr.msra.gmra.mrb[6].mxu1 %v3860_v49 }
0x14a2   :  { %18884 = vmatpush3.bf16.msra.mxu1 %v20403_v10  ;;  %16875 = vmatprep.mubr.msk.f32.mxu1 %vm20320_vm0, %v20321_v4 }
0x14a3   :  { %18885 = vmatprep.subr.bf16.mxu1 %v20319_v0 }
0x14a6   :  { %18887 = vmatpush3.bf16.msra.mxu1 %v20406_v15  ;;  %v20845_v15 = vld [vmem:[%s22193_s0 + $0xe] sm:$0x3] }
0x14a7   :  { %18960 = vmatprep.subr.bf16.mxu1 %v20319_v0 }
0x14a9   :  { %16876 = vmatmul.mubr.f32.vlgmr.msra.gmra.mrb[6].mxu1 %v3860_v49  ;;  %v20897_v49 = vpack.c.bf16 %v4468_v45, %v4461_v44  ;;  %v4917_v44 = vand.u32 4294901760, %v4329_v41  ;;  %v4989_v45 = vand.u32 4294901760, %v4988_v34 }
0x14aa   :  { %17000 = vmatprep.mubr.msk.f32.mxu1 %vm20320_vm0, %v20321_v4  ;;  %18962 = vmatpush3.bf16.msra.mxu1 %v20997_v27 }
0x14ab   :  { %18963 = vmatprep.subr.bf16.mxu1 %v20319_v0 }
0x157c   :  { %v4272_v28 = vpop.f32.mrb[6].mxu1 }
0x157d   :  { %v19903_v30 = vadd.f32 %v20313_v29, %v4272_v28  ;;  %v16877_v10 = vpop.f32.mrb[7].mxu1  ;;  %v4475_v28 = vand.u32 4294901760, %v4474_v50  ;;  %v4482_v29 = vand.u32 4294901760, %v4481_v51  ;;  %v4990_v50 = vsub.f32 %v4988_v34, %v4989_v45 }
0x157e   :  { %v4494_v10 = vand.u32 4294901760, %v4493_v53  ;;  %v5002_v51 = vsub.f32 %v4328_v40, %v4914_v43 }
0x157f   :  { %4284 = vrot.lane.b32.xlu1 %v19903_v30, %s20323_s28  ;;  %v4276_v32 = vadd.f32 %v19903_v30, %v20845_v15  ;;  %v4487_v30 = vand.u32 4294901760, %v4486_v52 }
0x1581   :  { %v15265_v33 = vmul.f32 -1.442695, %v4276_v32  ;;  %v4488_v32 = vsub.f32 %v4486_v52, %v4487_v30  ;;  %v20917_v3 = vpack.c.bf16 %v4494_v10, %v4487_v30  ;;  %v4997_v52 = vsub.f32 %v4995_v35, %v4996_v47 }
0x1582   :  { %v4991_v30 = vand.u32 4294901760, %v4990_v50 }
0x1583   :  { %4306 = vperm.xlu1 %20221, %v15266_v31   ;;  %20265 = vpow2.f32 %v15265_v33  ;;  %v20899_v31 = vpack.c.bf16 %v4482_v29, %v4475_v28  ;;  %v4495_v33 = vsub.f32 %v4493_v53, %v4494_v10  ;;  %v5009_v53 = vsub.f32 %v4329_v41, %v4917_v44 }
0x1584   :  { %v5003_v10 = vand.u32 4294901760, %v5002_v51 }
0x158d   :  { %v20266_v54 = vpop.eup %20265 }
0x158e   :  { %v4280_v55 = vadd.f32 1.0, %v20266_v54  ;;  %v4489_v54 = vand.u32 4294901760, %v4488_v32  ;;  %v4998_v32 = vand.u32 4294901760, %v4997_v52 }
0x1590   :  { %20267 = vrcp.f32 %v4280_v55  ;;  %v4496_v55 = vand.u32 4294901760, %v4495_v33  ;;  %v5010_v33 = vand.u32 4294901760, %v5009_v53 }
0x159a   :  { %v20848_v56 = vpop.eup %20267 }
0x159b   :  { %v4294_v26 = vsub.f32 1.0, %v20848_v56 }
0x15f1   :  { %v4285_v57 = vpop.permute.xlu1 %4284 }
0x15f2   :  { %v4287_v58 = vmul.f32 %v20848_v56, %v4285_v57  ;;  %v20901_v57 = vpack.c.bf16 %v4496_v55, %v4489_v54  ;;  %v5004_v55 = vsub.f32 %v5002_v51, %v5003_v10 }
0x15f4   :  { %4289 = vrot.lane.b32.xlu0 %v4287_v58, %s20323_s28  ;;  %v20903_v58 = vpack.c.bf16 %v4451_v17, %v4444_v16 }
0x15f8   :  { %4313 = vperm.xlu0 %20222, %v4310_v63   ;;  %v20913_v63 = vpack.c.bf16 %v4466_v38, %v4459_v36  ;;  %v4300_v36 = vmul.f32 %v20848_v56, %v20798_v46  ;;  %v21010_v56 = vpack.c.bf16 %v4917_v44, %v4914_v43 }
0x15fa   :  { %18965 = vmatpush3.bf16.msra.mxu1 %v21010_v56 }
0x15fb   :  { %18966 = vmatprep.subr.bf16.mxu1 %v20319_v0 }
0x15fc   :  { %4342 = vperm.xlu0 %20222, %v4340_v7  }
0x1602   :  { %v4307_v21 = vpop.permute.xlu1 %4306 }
0x1666   :  { %v4290_v5 = vpop.permute.xlu0 %4289 }
0x1667   :  { %v4292_v6 = vadd.f32 %v20845_v15, %v4290_v5  ;;  %v21018_v5 = vpack.c.bf16 %v4998_v32, %v4991_v30 }
0x1669   :  { %20269 = vtanh.f32 %v4292_v6  ;;  %v5011_v6 = vsub.f32 %v5009_v53, %v5010_v33 }
0x1673   :  { %v20270_v7 = vpop.eup %20269 }
0x1674   :  { %4296 = vrot.lane.b32.xlu1 %v20270_v7, %s20324_s12  ;;  %v5005_v7 = vand.u32 4294901760, %v5004_v55  ;;  %v4334_v55 = vld [vmem:[%s22199_s9 + $0x10] sm:$0xff] }
0x1677   :  { %v20921_v11 = vpop.permute.xlu0 %4313 }
0x1678   :  { %v4316_v28 = vmul.f32 %v20921_v11, %v20798_v46  ;;  %v5012_v46 = vand.u32 4294901760, %v5011_v6  ;;  %v21024_v11 = vpack.c.bf16 %v4995_v35, %v4988_v34  ;;  %v4335_v6 = vld [vmem:[%s22199_s9 + $0x18] sm:$0xff] }
0x167a   :  { %v21022_v9 = vpack.c.bf16 %v5012_v46, %v5005_v7  ;;  %v5436_v7 = vand.u32 4294901760, %v4334_v55  ;;  %v5439_v46 = vand.u32 4294901760, %v4335_v6 }
0x167b   :  { %v4343_v13 = vpop.permute.xlu0 %4342 }
0x167c   :  { %vm4344_vm3 = vcmp.eq.s32.totalorder %v20923_v12, %v4343_v13  ;;  %v21026_v13 = vpack.c.bf16 %v5009_v53, %v5002_v51  ;;  %v4332_v53 = vld [vmem:[%s22199_s9] sm:$0xff] }
0x167d   :  { %v15267_v16 = vsel %vm4344_vm3, 1.0, %v20321_v4 }
0x167e   :  { %v4357_v17 = vsel %vm4355_vm2, %v15267_v16, 0 }
0x167f   :  { %v4433_v18 = vsub.f32 %v4357_v17, %v4357_v17  ;;  %v21030_v17 = vpack.c.bf16 %v5010_v33, %v5003_v10 }
0x1681   :  { %v4434_v19 = vand.u32 4294901760, %v4433_v18 }
0x1683   :  { %v4435_v15 = vsub.f32 %v4433_v18, %v4434_v19 }
0x1685   :  { %v4436_v20 = vand.u32 4294901760, %v4435_v15 }
0x1687   :  { %16895 = vmatmul.mubr.f32.vlgmr.msra.gmra.mrb[8].mxu0 %v4436_v20 }
0x1688   :  { %18902 = vmatpush3.bf16.msra.mxu0 %v20895_v39  ;;  %16913 = vmatprep.mubr.msk.f32.mxu0 %vm20320_vm0, %v20321_v4 }
0x1689   :  { %18903 = vmatprep.subr.bf16.mxu0 %v20319_v0 }
0x168c   :  { %18905 = vmatpush3.bf16.msra.mxu0 %v20897_v49 }
0x168d   :  { %18906 = vmatprep.subr.bf16.mxu0 %v20319_v0 }
0x1690   :  { %18908 = vmatpush3.bf16.msra.mxu0 %v20899_v31 }
0x1691   :  { %18909 = vmatprep.subr.bf16.mxu0 %v20319_v0 }
0x1694   :  { %18911 = vmatpush3.bf16.msra.mxu0 %v20901_v57 }
0x1695   :  { %18912 = vmatprep.subr.bf16.mxu0 %v20319_v0 }
0x1697   :  { %16914 = vmatmul.mubr.msk.f32.vlgmr.msra.gmra.mrb[8].mxu0 %vm4355_vm2, %v15267_v16 }
0x1698   :  { %18914 = vmatpush3.bf16.msra.mxu0 %v20903_v58  ;;  %16932 = vmatprep.mubr.msk.f32.mxu0 %vm20320_vm0, %v20321_v4 }
0x1699   :  { %18915 = vmatprep.subr.bf16.mxu0 %v20319_v0 }
0x169c   :  { %18917 = vmatpush3.bf16.msra.mxu0 %v20905_v59 }
0x169d   :  { %18918 = vmatprep.subr.bf16.mxu0 %v20319_v0 }
0x16a0   :  { %18920 = vmatpush3.bf16.msra.mxu0 %v20907_v60 }
0x16a1   :  { %18921 = vmatprep.subr.bf16.mxu0 %v20319_v0 }
0x16a4   :  { %18923 = vmatpush3.bf16.msra.mxu0 %v20909_v61 }
0x16a5   :  { %18924 = vmatprep.subr.bf16.mxu0 %v20319_v0 }
0x16a7   :  { %16933 = vmatmul.mubr.f32.vlgmr.msra.gmra.mrb[8].mxu0 %v4433_v18 }
0x16a8   :  { %18926 = vmatpush3.bf16.msra.mxu0 %v20858_v1  ;;  %16951 = vmatprep.mubr.msk.f32.mxu0 %vm20320_vm0, %v20321_v4 }
0x16a9   :  { %18927 = vmatprep.subr.bf16.mxu0 %v20319_v0 }
0x16ac   :  { %18929 = vmatpush3.bf16.msra.mxu0 %v20871_v8 }
0x16ad   :  { %18930 = vmatprep.subr.bf16.mxu0 %v20319_v0 }
0x16b0   :  { %18932 = vmatpush3.bf16.msra.mxu0 %v20881_v14 }
0x16b1   :  { %18933 = vmatprep.subr.bf16.mxu0 %v20319_v0 }
0x16b4   :  { %18935 = vmatpush3.bf16.msra.mxu0 %v20891_v24 }
0x16b5   :  { %18936 = vmatprep.subr.bf16.mxu0 %v20319_v0 }
0x16b7   :  { %16952 = vmatmul.mubr.f32.vlgmr.msra.gmra.mrb[8].mxu0 %v4434_v19 }
0x16b8   :  { %18938 = vmatpush3.bf16.msra.mxu0 %v20911_v62  ;;  %16970 = vmatprep.mubr.msk.f32.mxu0 %vm20320_vm0, %v20321_v4 }
0x16b9   :  { %18939 = vmatprep.subr.bf16.mxu0 %v20319_v0 }
0x16bc   :  { %18941 = vmatpush3.bf16.msra.mxu0 %v20913_v63 }
0x16bd   :  { %18942 = vmatprep.subr.bf16.mxu0 %v20319_v0 }
0x16c0   :  { %18944 = vmatpush3.bf16.msra.mxu0 %v20915_v2 }
0x16c1   :  { %18945 = vmatprep.subr.bf16.mxu0 %v20319_v0 }
0x16c4   :  { %18947 = vmatpush3.bf16.msra.mxu0 %v20917_v3 }
0x16c5   :  { %18948 = vmatprep.subr.bf16.mxu0 %v20319_v0 }
0x16c7   :  { %16971 = vmatmul.mubr.msk.f32.vlgmr.msra.gmra.mrb[8].mxu0 %vm4355_vm2, %v15267_v16 }
0x16c8   :  { %18950 = vmatpush3.bf16.msra.mxu0 %v20858_v1  ;;  %16989 = vmatprep.mubr.msk.f32.mxu0 %vm20320_vm0, %v20321_v4 }
0x16c9   :  { %18951 = vmatprep.subr.bf16.mxu0 %v20319_v0 }
0x16cc   :  { %18953 = vmatpush3.bf16.msra.mxu0 %v20871_v8 }
0x16cd   :  { %18954 = vmatprep.subr.bf16.mxu0 %v20319_v0 }
0x16d0   :  { %18956 = vmatpush3.bf16.msra.mxu0 %v20881_v14 }
0x16d1   :  { %18957 = vmatprep.subr.bf16.mxu0 %v20319_v0 }
0x16d4   :  { %18959 = vmatpush3.bf16.msra.mxu0 %v20891_v24 }
0x16d5   :  { %19032 = vmatprep.subr.bf16.mxu0 %v20319_v0 }
0x16d7   :  { %16990 = vmatmul.mubr.msk.f32.vlgmr.msra.gmra.mrb[8].mxu0 %vm4355_vm2, %v15267_v16  ;;  %v21028_v16 = vpack.c.bf16 %v4996_v47, %v4989_v45 }
0x16d8   :  { %19034 = vmatpush3.bf16.msra.mxu0 %v20858_v1  ;;  %17140 = vmatprep.mubr.msk.f32.mxu0 %vm20320_vm0, %v20321_v4 }
0x16d9   :  { %19035 = vmatprep.subr.bf16.mxu0 %v20319_v0 }
0x16dc   :  { %19037 = vmatpush3.bf16.msra.mxu0 %v20871_v8 }
0x16dd   :  { %19038 = vmatprep.subr.bf16.mxu0 %v20319_v0 }
0x16e0   :  { %19040 = vmatpush3.bf16.msra.mxu0 %v20881_v14 }
0x16e1   :  { %19041 = vmatprep.subr.bf16.mxu0 %v20319_v0 }
0x16e4   :  { %19043 = vmatpush3.bf16.msra.mxu0 %v20891_v24 }
0x16e5   :  { %19044 = vmatprep.subr.bf16.mxu0 %v20319_v0 }
0x16e6   :  { %v4297_v38 = vpop.permute.xlu1 %4296 }
0x16e7   :  { %v4299_v42 = vmul.f32 %v4297_v38, %v4294_v26  ;;  %v21068_v26 = vld [vmem:[%s22197_s8] ss:$0 sm:$0xff] }
0x16e8   :  { %v21075_v38 = vld [vmem:[%s22198_s7] ss:$0 sm:$0xff] }
0x16e9   :  { %v4301_v48 = vadd.f32 %v4300_v36, %v4299_v42 }
0x16eb   :  { %v4309_v29 = vmul.f32 %v4307_v21, %v4301_v48 }
0x16ed   :  { %v21016_v54 = vadd.f32 %v4316_v28, %v4309_v29  ;;  %v4333_v28 = vld [vmem:[%s22199_s9 + $0x8] sm:$0xff]  ;;  %v5430_v29 = vand.u32 4294901760, %v4332_v53 }
0x16ee   :  { %v5433_v30 = vand.u32 4294901760, %v4333_v28 }
0x16ef   :  { %4903 = vrot.lane.b32.xlu1 %v21016_v54, %s20324_s12  ;;  %v5510_v32 = vsub.f32 %v4332_v53, %v5430_v29 }
0x16f0   :  { %v21086_v10 = vpack.c.bf16 %v5433_v30, %v5430_v29  ;;  %v5517_v33 = vsub.f32 %v4333_v28, %v5433_v30 }
0x16f2   :  { %v21109_v53 = vpack.c.bf16 %v5517_v33, %v5510_v32 }
0x1761   :  { %v4904_v18 = vpop.permute.xlu1 %4903 }
0x1762   :  { %v4905_v19 = vsel %vm50_vm1, %v4904_v18, 0  ;;  %v5511_v18 = vand.u32 4294901760, %v5510_v32 }
0x1763   :  { %v4976_v15 = vand.u32 4294901760, %v4905_v19 }
0x1765   :  { %v4977_v20 = vsub.f32 %v4905_v19, %v4976_v15  ;;  %v5518_v19 = vand.u32 4294901760, %v5517_v33 }
0x1767   :  { %v4978_v21 = vand.u32 4294901760, %v4977_v20 }
0x1769   :  { %v4979_v22 = vsub.f32 %v4977_v20, %v4978_v21 }
0x176b   :  { %v4980_v23 = vand.u32 4294901760, %v4979_v22  ;;  %v5524_v22 = vsub.f32 %v4334_v55, %v5436_v7 }
0x176d   :  { %17001 = vmatmul.mubr.f32.vlgmr.msra.gmra.mrb[8].mxu1 %v4980_v23 }
0x176e   :  { %18968 = vmatpush3.bf16.msra.mxu1 %v21018_v5  ;;  %17011 = vmatprep.mubr.msk.f32.mxu1 %vm20320_vm0, %v20321_v4 }
0x176f   :  { %18969 = vmatprep.subr.bf16.mxu1 %v20319_v0 }
0x1772   :  { %18971 = vmatpush3.bf16.msra.mxu1 %v21022_v9 }
0x1773   :  { %18972 = vmatprep.subr.bf16.mxu1 %v20319_v0 }
0x1775   :  { %17012 = vmatmul.mubr.f32.vlgmr.msra.gmra.mrb[8].mxu1 %v4976_v15 }
0x1776   :  { %18974 = vmatpush3.bf16.msra.mxu1 %v21024_v11  ;;  %17022 = vmatprep.mubr.msk.f32.mxu1 %vm20320_vm0, %v20321_v4 }
0x1777   :  { %18975 = vmatprep.subr.bf16.mxu1 %v20319_v0 }
0x177a   :  { %18977 = vmatpush3.bf16.msra.mxu1 %v21026_v13 }
0x177b   :  { %18978 = vmatprep.subr.bf16.mxu1 %v20319_v0 }
0x177d   :  { %17023 = vmatmul.mubr.f32.vlgmr.msra.gmra.mrb[8].mxu1 %v4977_v20  ;;  %v5512_v20 = vsub.f32 %v5510_v32, %v5511_v18 }
0x177e   :  { %18980 = vmatpush3.bf16.msra.mxu1 %v20997_v27  ;;  %17033 = vmatprep.mubr.msk.f32.mxu1 %vm20320_vm0, %v20321_v4 }
0x177f   :  { %18981 = vmatprep.subr.bf16.mxu1 %v20319_v0 }
0x1782   :  { %18983 = vmatpush3.bf16.msra.mxu1 %v21010_v56 }
0x1783   :  { %18984 = vmatprep.subr.bf16.mxu1 %v20319_v0 }
0x1785   :  { %17034 = vmatmul.mubr.f32.vlgmr.msra.gmra.mrb[8].mxu1 %v4978_v21  ;;  %v5519_v21 = vsub.f32 %v5517_v33, %v5518_v19 }
0x1786   :  { %18986 = vmatpush3.bf16.msra.mxu1 %v21028_v16  ;;  %17044 = vmatprep.mubr.msk.f32.mxu1 %vm20320_vm0, %v20321_v4 }
0x1787   :  { %18987 = vmatprep.subr.bf16.mxu1 %v20319_v0 }
0x178a   :  { %18989 = vmatpush3.bf16.msra.mxu1 %v21030_v17 }
0x178b   :  { %18990 = vmatprep.subr.bf16.mxu1 %v20319_v0 }
0x178d   :  { %17045 = vmatmul.mubr.f32.vlgmr.msra.gmra.mrb[8].mxu1 %v4976_v15 }
0x178e   :  { %18992 = vmatpush3.bf16.msra.mxu1 %v20997_v27  ;;  %17055 = vmatprep.mubr.msk.f32.mxu1 %vm20320_vm0, %v20321_v4 }
0x178f   :  { %18993 = vmatprep.subr.bf16.mxu1 %v20319_v0 }
0x1792   :  { %18995 = vmatpush3.bf16.msra.mxu1 %v21010_v56 }
0x1793   :  { %18996 = vmatprep.subr.bf16.mxu1 %v20319_v0 }
0x1795   :  { %17056 = vmatmul.mubr.f32.vlgmr.msra.gmra.mrb[8].mxu1 %v4976_v15  ;;  %v21096_v15 = vpack.c.bf16 %v5439_v46, %v5436_v7 }
0x1796   :  { %17066 = vmatprep.mubr.msk.f32.mxu1 %vm20320_vm0, %v20321_v4  ;;  %18998 = vmatpush3.bf16.msra.mxu1 %v21086_v10 }
0x1797   :  { %18999 = vmatprep.subr.bf16.mxu1 %v20319_v0 }
0x179a   :  { %19001 = vmatpush3.bf16.msra.mxu1 %v21096_v15 }
0x179b   :  { %19002 = vmatprep.subr.bf16.mxu1 %v20319_v0 }
0x17aa   :  { %v4892_v37 = vpop.f32.mrb[8].mxu0 }
0x17ab   :  { %v16991_v25 = vpop.f32.mrb[9].mxu0  ;;  %v19904_v40 = vadd.f32 %v21075_v38, %v4892_v37  ;;  %v5531_v37 = vsub.f32 %v4335_v6, %v5439_v46  ;;  %v21207_v46 = vld [vmem:[%s22201_s10] ss:$0 sm:$0xff] }
0x1868   :  { %v5388_v34 = vpop.f32.mrb[8].mxu1 }
0x1869   :  { %v19905_v35 = vadd.f32 %v21068_v26, %v5388_v34  ;;  %v17057_v36 = vpop.f32.mrb[9].mxu1  ;;  %v5513_v34 = vand.u32 4294901760, %v5512_v20 }
0x186a   :  { %v5525_v36 = vand.u32 4294901760, %v5524_v22 }
0x186b   :  { %5400 = vrot.lane.b32.xlu0 %v19905_v35, %s20323_s28  ;;  %v5392_v41 = vadd.f32 %v19905_v35, %v19904_v40  ;;  %v5520_v35 = vand.u32 4294901760, %v5519_v21 }
0x186d   :  { %v15273_v42 = vmul.f32 -1.442695, %v5392_v41 }
0x186f   :  { %20271 = vpow2.f32 %v15273_v42  ;;  %v5532_v42 = vand.u32 4294901760, %v5531_v37 }
0x1871   :  { %v21115_v28 = vpack.c.bf16 %v5532_v42, %v5525_v36 }
0x1879   :  { %v20272_v43 = vpop.eup %20271 }
0x187a   :  { %v5396_v44 = vadd.f32 1.0, %v20272_v43  ;;  %v21101_v43 = vpack.c.bf16 %v5520_v35, %v5513_v34 }
0x187c   :  { %20273 = vrcp.f32 %v5396_v44  ;;  %v5526_v44 = vsub.f32 %v5524_v22, %v5525_v36 }
0x1886   :  { %v20274_v45 = vpop.eup %20273 }
0x1887   :  { %v5410_v23 = vsub.f32 1.0, %v20274_v45 }
0x18dd   :  { %v5401_v47 = vpop.permute.xlu0 %5400 }
0x18de   :  { %v5403_v48 = vmul.f32 %v20274_v45, %v5401_v47 }
0x18e0   :  { %5405 = vrot.lane.b32.xlu1 %v5403_v48, %s20323_s28  ;;  %v5533_v48 = vsub.f32 %v5531_v37, %v5532_v42 }
0x1952   :  { %v5406_v50 = vpop.permute.xlu1 %5405 }
0x1953   :  { %v5408_v51 = vadd.f32 %v19904_v40, %v5406_v50  ;;  %v5416_v40 = vmul.f32 %v20274_v45, %v21016_v54  ;;  %v5527_v50 = vand.u32 4294901760, %v5526_v44  ;;  %v21111_v54 = vpack.c.bf16 %v5531_v37, %v5524_v22 }
0x1954   :  { %v21113_v45 = vpack.c.bf16 %v5518_v19, %v5511_v18 }
0x1955   :  { %20275 = vtanh.f32 %v5408_v51  ;;  %v5534_v51 = vand.u32 4294901760, %v5533_v48 }
0x195f   :  { %v20276_v52 = vpop.eup %20275 }
0x1960   :  { %5412 = vrot.lane.b32.xlu0 %v20276_v52, %s20324_s12  ;;  %v21107_v52 = vpack.c.bf16 %v5534_v51, %v5527_v50 }
0x19d2   :  { %v5413_v25 = vpop.permute.xlu0 %5412 }
0x19d3   :  { %v5415_v41 = vmul.f32 %v5413_v25, %v5410_v23  ;;  %v21221_v25 = vcvt.s32.f32 %v20923_v12 }
0x19d5   :  { %v21103_v47 = vadd.f32 %v5416_v40, %v5415_v41 }
0x19d7   :  { %5425 = vrot.lane.b32.xlu1 %v21103_v47, %s20324_s12 }
0x1a49   :  { %v5426_v29 = vpop.permute.xlu1 %5425 }
0x1a4a   :  { %v5427_v30 = vsel %vm50_vm1, %v5426_v29, 0 }
0x1a4b   :  { %v21123_v55 = vand.u32 4294901760, %v5427_v30 }
0x1a4d   :  { %v5499_v32 = vsub.f32 %v5427_v30, %v21123_v55 }
0x1a4f   :  { %v5500_v33 = vand.u32 4294901760, %v5499_v32 }
0x1a51   :  { %v5501_v6 = vsub.f32 %v5499_v32, %v5500_v33 }
0x1a53   :  { %v5502_v7 = vand.u32 4294901760, %v5501_v6 }
0x1a55   :  { %17067 = vmatmul.mubr.f32.vlgmr.msra.gmra.mrb[10].mxu1 %v5502_v7 }
0x1a56   :  { %19004 = vmatpush3.bf16.msra.mxu1 %v21101_v43  ;;  %17077 = vmatprep.mubr.msk.f32.mxu1 %vm20320_vm0, %v20321_v4 }
0x1a57   :  { %19005 = vmatprep.subr.bf16.mxu1 %v20319_v0 }
0x1a5a   :  { %19007 = vmatpush3.bf16.msra.mxu1 %v21107_v52 }
0x1a5b   :  { %19008 = vmatprep.subr.bf16.mxu1 %v20319_v0 }
0x1a5d   :  { %17078 = vmatmul.mubr.f32.vlgmr.msra.gmra.mrb[10].mxu1 %v21123_v55 }
0x1a5e   :  { %19010 = vmatpush3.bf16.msra.mxu1 %v21109_v53  ;;  %17088 = vmatprep.mubr.msk.f32.mxu1 %vm20320_vm0, %v20321_v4 }
0x1a5f   :  { %19011 = vmatprep.subr.bf16.mxu1 %v20319_v0 }
0x1a62   :  { %19013 = vmatpush3.bf16.msra.mxu1 %v21111_v54 }
0x1a63   :  { %19014 = vmatprep.subr.bf16.mxu1 %v20319_v0 }
0x1a65   :  { %17089 = vmatmul.mubr.f32.vlgmr.msra.gmra.mrb[10].mxu1 %v5499_v32 }
0x1a66   :  { %19016 = vmatpush3.bf16.msra.mxu1 %v21086_v10  ;;  %17099 = vmatprep.mubr.msk.f32.mxu1 %vm20320_vm0, %v20321_v4 }
0x1a67   :  { %19017 = vmatprep.subr.bf16.mxu1 %v20319_v0 }
0x1a6a   :  { %19019 = vmatpush3.bf16.msra.mxu1 %v21096_v15 }
0x1a6b   :  { %19020 = vmatprep.subr.bf16.mxu1 %v20319_v0 }
0x1a6d   :  { %17100 = vmatmul.mubr.f32.vlgmr.msra.gmra.mrb[10].mxu1 %v5500_v33 }
0x1a6e   :  { %19022 = vmatpush3.bf16.msra.mxu1 %v21113_v45  ;;  %17110 = vmatprep.mubr.msk.f32.mxu1 %vm20320_vm0, %v20321_v4 }
0x1a6f   :  { %19023 = vmatprep.subr.bf16.mxu1 %v20319_v0 }
0x1a72   :  { %19025 = vmatpush3.bf16.msra.mxu1 %v21115_v28 }
0x1a73   :  { %19026 = vmatprep.subr.bf16.mxu1 %v20319_v0 }
0x1a75   :  { %17111 = vmatmul.mubr.f32.vlgmr.msra.gmra.mrb[10].mxu1 %v21123_v55 }
0x1a76   :  { %19028 = vmatpush3.bf16.msra.mxu1 %v21086_v10  ;;  %17121 = vmatprep.mubr.msk.f32.mxu1 %vm20320_vm0, %v20321_v4 }
0x1a77   :  { %19029 = vmatprep.subr.bf16.mxu1 %v20319_v0 }
0x1a7a   :  { %19031 = vmatpush3.bf16.msra.mxu1 %v21096_v15 }
0x1a7b   :  { %19104 = vmatprep.subr.bf16.mxu1 %v20319_v0 }
0x1a7d   :  { %17122 = vmatmul.mubr.f32.vlgmr.msra.gmra.mrb[10].mxu1 %v21123_v55 }
0x1a7e   :  { %19106 = vmatpush3.bf16.msra.mxu1 %v20997_v27  ;;  %17246 = vmatprep.mubr.msk.f32.mxu1 %vm20320_vm0, %v20321_v4 }
0x1a7f   :  { %19107 = vmatprep.subr.bf16.mxu1 %v20319_v0 }
0x1a82   :  { %19109 = vmatpush3.bf16.msra.mxu1 %v21010_v56 }
0x1a83   :  { %19110 = vmatprep.subr.bf16.mxu1 %v20319_v0 }
0x1a85   :  { %17247 = vmatmul.mubr.f32.vlgmr.msra.gmra.mrb[12].mxu1 %v5502_v7 }
0x1a86   :  { %19112 = vmatpush3.bf16.msra.mxu1 %v21018_v5  ;;  %17257 = vmatprep.mubr.msk.f32.mxu1 %vm20320_vm0, %v20321_v4 }
0x1a87   :  { %19113 = vmatprep.subr.bf16.mxu1 %v20319_v0 }
0x1a8a   :  { %19115 = vmatpush3.bf16.msra.mxu1 %v21022_v9 }
0x1a8b   :  { %19116 = vmatprep.subr.bf16.mxu1 %v20319_v0 }
0x1a8d   :  { %17258 = vmatmul.mubr.f32.vlgmr.msra.gmra.mrb[12].mxu1 %v21123_v55 }
0x1a8e   :  { %19118 = vmatpush3.bf16.msra.mxu1 %v21024_v11  ;;  %17268 = vmatprep.mubr.msk.f32.mxu1 %vm20320_vm0, %v20321_v4 }
0x1a8f   :  { %19119 = vmatprep.subr.bf16.mxu1 %v20319_v0 }
0x1a92   :  { %19121 = vmatpush3.bf16.msra.mxu1 %v21026_v13 }
0x1a93   :  { %19122 = vmatprep.subr.bf16.mxu1 %v20319_v0 }
0x1a95   :  { %17269 = vmatmul.mubr.f32.vlgmr.msra.gmra.mrb[12].mxu1 %v5499_v32 }
0x1a96   :  { %19124 = vmatpush3.bf16.msra.mxu1 %v20997_v27  ;;  %17279 = vmatprep.mubr.msk.f32.mxu1 %vm20320_vm0, %v20321_v4 }
0x1a97   :  { %19125 = vmatprep.subr.bf16.mxu1 %v20319_v0 }
0x1a9a   :  { %19127 = vmatpush3.bf16.msra.mxu1 %v21010_v56 }
0x1a9b   :  { %19128 = vmatprep.subr.bf16.mxu1 %v20319_v0 }
0x1a9d   :  { %17280 = vmatmul.mubr.f32.vlgmr.msra.gmra.mrb[12].mxu1 %v5500_v33 }
0x1a9e   :  { %19130 = vmatpush3.bf16.msra.mxu1 %v21028_v16  ;;  %17290 = vmatprep.mubr.msk.f32.mxu1 %vm20320_vm0, %v20321_v4 }
0x1a9f   :  { %19131 = vmatprep.subr.bf16.mxu1 %v20319_v0 }
0x1aa2   :  { %19133 = vmatpush3.bf16.msra.mxu1 %v21030_v17 }
0x1aa3   :  { %19134 = vmatprep.subr.bf16.mxu1 %v20319_v0 }
0x1aa5   :  { %17291 = vmatmul.mubr.f32.vlgmr.msra.gmra.mrb[12].mxu1 %v21123_v55 }
0x1aa6   :  { %19136 = vmatpush3.bf16.msra.mxu1 %v20997_v27  ;;  %17301 = vmatprep.mubr.msk.f32.mxu1 %vm20320_vm0, %v20321_v4 }
0x1aa7   :  { %19137 = vmatprep.subr.bf16.mxu1 %v20319_v0 }
0x1aaa   :  { %19139 = vmatpush3.bf16.msra.mxu1 %v21010_v56 }
0x1aab   :  { %19140 = vmatprep.subr.bf16.mxu1 %v20319_v0 }
0x1aad   :  { %17302 = vmatmul.mubr.f32.vlgmr.msra.gmra.mrb[12].mxu1 %v21123_v55 }
0x1aae   :  { %19142 = vmatpush3.bf16.msra.mxu1 %v21086_v10  ;;  %17312 = vmatprep.mubr.msk.f32.mxu1 %vm20320_vm0, %v20321_v4 }
0x1aaf   :  { %19143 = vmatprep.subr.bf16.mxu1 %v20319_v0 }
0x1ab2   :  { %19145 = vmatpush3.bf16.msra.mxu1 %v21096_v15 }
0x1ab3   :  { %19146 = vmatprep.subr.bf16.mxu1 %v20319_v0 }
0x1b50   :  { %v5910_v18 = vpop.f32.mrb[10].mxu1 }
0x1b51   :  { %v19906_v19 = vadd.f32 %v21207_v46, %v5910_v18  ;;  %v17123_v20 = vpop.f32.mrb[11].mxu1 }
0x1b53   :  { %15275 = vst.msk [vmem:[%s22200_s11 + $0x2] sm:$0x3] %vm4347_vm4, %v19906_v19  ;;  %v5916_v21 = vsel %vm4347_vm4, %v19906_v19, -inf }
0x1b54   :  { %5917 = vmax.xlane.f32.xlu0 %v5916_v21 }
0x1b80   :  { %v6948_v22 = vpop.f32.mrb[12].mxu1 }
0x1b81   :  { %v21216_v23 = vadd.f32 %v21068_v26, %v6948_v22  ;;  %v17303_v37 = vpop.f32.mrb[13].mxu1 }
0x1b83   :  { %6960 = vrot.lane.b32.xlu0 %v21216_v23, %s20323_s28 }
0x1be1   :  { %v5918_v34 = vpop.xlane.xlu0 %5917 }
0x1be2   :  { %vm5919_vm5 = vcmp.eq.f32.partialorder %v19906_v19, %v5918_v34 }
0x1be3   :  { %v5920_v35 = vsel %vm5919_vm5, %v21221_v25, 64.0 }
0x1be4   :  { %v5921_v36 = vsel %vm4347_vm4, %v5920_v35, inf }
0x1be5   :  { %5922 = vmin.xlane.f32.xlu1 %v5921_v36 }
0x1bf5   :  { %v6961_v18 = vpop.permute.xlu0 %6960 }
0x1c72   :  { %v5923_v40 = vpop.xlane.xlu1 %5922 }
0x1c73   :  { %vm5924_vm6 = vcmp.eq.f32.partialorder %v21221_v25, %v5923_v40 }
0x1c74   :  { %v15276_v41 = vsel %vm5924_vm6, 1.0, %v20321_v4 }
0x1c75   :  { %v5928_v42 = vsel %vm4355_vm2, %v15276_v41, 0 }
0x1c76   :  { %v6004_v44 = vsub.f32 %v5928_v42, %v5928_v42 }
0x1c78   :  { %v6005_v48 = vand.u32 4294901760, %v6004_v44 }
0x1c7a   :  { %v6006_v50 = vsub.f32 %v6004_v44, %v6005_v48 }
0x1c7c   :  { %v6007_v51 = vand.u32 4294901760, %v6006_v50 }
0x1c7e   :  { %17141 = vmatmul.mubr.f32.vlgmr.msra.gmra.mrb[10].mxu0 %v6007_v51 }
0x1c7f   :  { %19046 = vmatpush3.bf16.msra.mxu0 %v20895_v39  ;;  %17159 = vmatprep.mubr.msk.f32.mxu0 %vm20320_vm0, %v20321_v4 }
0x1c80   :  { %19047 = vmatprep.subr.bf16.mxu0 %v20319_v0 }
0x1c83   :  { %19049 = vmatpush3.bf16.msra.mxu0 %v20897_v49 }
0x1c84   :  { %19050 = vmatprep.subr.bf16.mxu0 %v20319_v0 }
0x1c87   :  { %19052 = vmatpush3.bf16.msra.mxu0 %v20899_v31 }
0x1c88   :  { %19053 = vmatprep.subr.bf16.mxu0 %v20319_v0 }
0x1c8b   :  { %19055 = vmatpush3.bf16.msra.mxu0 %v20901_v57 }
0x1c8c   :  { %19056 = vmatprep.subr.bf16.mxu0 %v20319_v0 }
0x1c8e   :  { %17160 = vmatmul.mubr.msk.f32.vlgmr.msra.gmra.mrb[10].mxu0 %vm4355_vm2, %v15276_v41 }
0x1c8f   :  { %19058 = vmatpush3.bf16.msra.mxu0 %v20903_v58  ;;  %17178 = vmatprep.mubr.msk.f32.mxu0 %vm20320_vm0, %v20321_v4 }
0x1c90   :  { %19059 = vmatprep.subr.bf16.mxu0 %v20319_v0 }
0x1c93   :  { %19061 = vmatpush3.bf16.msra.mxu0 %v20905_v59 }
0x1c94   :  { %19062 = vmatprep.subr.bf16.mxu0 %v20319_v0 }
0x1c97   :  { %19064 = vmatpush3.bf16.msra.mxu0 %v20907_v60 }
0x1c98   :  { %19065 = vmatprep.subr.bf16.mxu0 %v20319_v0 }
0x1c9b   :  { %19067 = vmatpush3.bf16.msra.mxu0 %v20909_v61 }
0x1c9c   :  { %19068 = vmatprep.subr.bf16.mxu0 %v20319_v0 }
0x1c9e   :  { %17179 = vmatmul.mubr.f32.vlgmr.msra.gmra.mrb[10].mxu0 %v6004_v44 }
0x1c9f   :  { %19070 = vmatpush3.bf16.msra.mxu0 %v20858_v1  ;;  %17197 = vmatprep.mubr.msk.f32.mxu0 %vm20320_vm0, %v20321_v4 }
0x1ca0   :  { %19071 = vmatprep.subr.bf16.mxu0 %v20319_v0 }
0x1ca3   :  { %19073 = vmatpush3.bf16.msra.mxu0 %v20871_v8 }
0x1ca4   :  { %19074 = vmatprep.subr.bf16.mxu0 %v20319_v0 }
0x1ca7   :  { %19076 = vmatpush3.bf16.msra.mxu0 %v20881_v14 }
0x1ca8   :  { %19077 = vmatprep.subr.bf16.mxu0 %v20319_v0 }
0x1cab   :  { %19079 = vmatpush3.bf16.msra.mxu0 %v20891_v24 }
0x1cac   :  { %19080 = vmatprep.subr.bf16.mxu0 %v20319_v0 }
0x1cae   :  { %17198 = vmatmul.mubr.f32.vlgmr.msra.gmra.mrb[10].mxu0 %v6005_v48 }
0x1caf   :  { %19082 = vmatpush3.bf16.msra.mxu0 %v20911_v62  ;;  %17216 = vmatprep.mubr.msk.f32.mxu0 %vm20320_vm0, %v20321_v4 }
0x1cb0   :  { %19083 = vmatprep.subr.bf16.mxu0 %v20319_v0 }
0x1cb3   :  { %19085 = vmatpush3.bf16.msra.mxu0 %v20913_v63 }
0x1cb4   :  { %19086 = vmatprep.subr.bf16.mxu0 %v20319_v0 }
0x1cb7   :  { %19088 = vmatpush3.bf16.msra.mxu0 %v20915_v2 }
0x1cb8   :  { %19089 = vmatprep.subr.bf16.mxu0 %v20319_v0 }
0x1cbb   :  { %19091 = vmatpush3.bf16.msra.mxu0 %v20917_v3 }
0x1cbc   :  { %19092 = vmatprep.subr.bf16.mxu0 %v20319_v0 }
0x1cbe   :  { %17217 = vmatmul.mubr.msk.f32.vlgmr.msra.gmra.mrb[10].mxu0 %vm4355_vm2, %v15276_v41 }
0x1cbf   :  { %19094 = vmatpush3.bf16.msra.mxu0 %v20858_v1  ;;  %17235 = vmatprep.mubr.msk.f32.mxu0 %vm20320_vm0, %v20321_v4 }
0x1cc0   :  { %19095 = vmatprep.subr.bf16.mxu0 %v20319_v0 }
0x1cc3   :  { %19097 = vmatpush3.bf16.msra.mxu0 %v20871_v8 }
0x1cc4   :  { %19098 = vmatprep.subr.bf16.mxu0 %v20319_v0 }
0x1cc7   :  { %19100 = vmatpush3.bf16.msra.mxu0 %v20881_v14 }
0x1cc8   :  { %19101 = vmatprep.subr.bf16.mxu0 %v20319_v0 }
0x1ccb   :  { %19103 = vmatpush3.bf16.msra.mxu0 %v20891_v24 }
0x1ccc   :  { %19176 = vmatprep.subr.bf16.mxu0 %v20319_v0 }
0x1cce   :  { %17236 = vmatmul.mubr.msk.f32.vlgmr.msra.gmra.mrb[10].mxu0 %vm4355_vm2, %v15276_v41 }
0x1ccf   :  { %19178 = vmatpush3.bf16.msra.mxu0 %v20858_v1  ;;  %17386 = vmatprep.mubr.msk.f32.mxu0 %vm20320_vm0, %v20321_v4 }
0x1cd0   :  { %19179 = vmatprep.subr.bf16.mxu0 %v20319_v0 }
0x1cd3   :  { %19181 = vmatpush3.bf16.msra.mxu0 %v20871_v8 }
0x1cd4   :  { %19182 = vmatprep.subr.bf16.mxu0 %v20319_v0 }
0x1cd7   :  { %19184 = vmatpush3.bf16.msra.mxu0 %v20881_v14 }
0x1cd8   :  { %19185 = vmatprep.subr.bf16.mxu0 %v20319_v0 }
0x1cdb   :  { %19187 = vmatpush3.bf16.msra.mxu0 %v20891_v24 }
0x1cdc   :  { %19188 = vmatprep.subr.bf16.mxu0 %v20319_v0 }
0x1da1   :  { %v6463_v12 = vpop.f32.mrb[10].mxu0 }
0x1da2   :  { %v19907_v29 = vadd.f32 %v21075_v38, %v6463_v12  ;;  %v17237_v30 = vpop.f32.mrb[11].mxu0 }
0x1da4   :  { %v6952_v55 = vadd.f32 %v21216_v23, %v19907_v29 }
0x1da6   :  { %v15280_v32 = vmul.f32 -1.442695, %v6952_v55 }
0x1da8   :  { %20277 = vpow2.f32 %v15280_v32 }
0x1db2   :  { %v20278_v33 = vpop.eup %20277 }
0x1db3   :  { %v6956_v6 = vadd.f32 1.0, %v20278_v33 }
0x1db5   :  { %20279 = vrcp.f32 %v6956_v6 }
0x1dbf   :  { %v20280_v7 = vpop.eup %20279 }
0x1dc0   :  { %v6963_v19 = vmul.f32 %v20280_v7, %v6961_v18  ;;  %v6970_v37 = vsub.f32 1.0, %v20280_v7  ;;  %v6976_v23 = vmul.f32 %v20280_v7, %v21103_v47 }
0x1dc2   :  { %6965 = vrot.lane.b32.xlu1 %v6963_v19, %s20323_s28 }
0x1e34   :  { %v6966_v20 = vpop.permute.xlu1 %6965 }
0x1e35   :  { %v6968_v21 = vadd.f32 %v19907_v29, %v6966_v20 }
0x1e37   :  { %20281 = vtanh.f32 %v6968_v21 }
0x1e41   :  { %v20282_v22 = vpop.eup %20281 }
0x1e42   :  { %6972 = vrot.lane.b32.xlu0 %v20282_v22, %s20324_s12 }
0x1eb4   :  { %v6973_v34 = vpop.permute.xlu0 %6972 }
0x1eb5   :  { %v6975_v35 = vmul.f32 %v6973_v34, %v6970_v37 }
0x1eb7   :  { %v21296_v36 = vadd.f32 %v6976_v23, %v6975_v35 }
0x1eb9   :  { %6979 = vrot.lane.b32.xlu1 %v21296_v36, %s20324_s12 }
0x1f2b   :  { %v6980_v40 = vpop.permute.xlu1 %6979 }
0x1f2c   :  { %v6981_v41 = vsel %vm50_vm1, %v6980_v40, 0 }
0x1f2d   :  { %v21301_v42 = vand.u32 4294901760, %v6981_v41 }
0x1f2f   :  { %v7053_v44 = vsub.f32 %v6981_v41, %v21301_v42 }
0x1f31   :  { %v7054_v48 = vand.u32 4294901760, %v7053_v44 }
0x1f33   :  { %v7055_v50 = vsub.f32 %v7053_v44, %v7054_v48 }
0x1f35   :  { %v7056_v51 = vand.u32 4294901760, %v7055_v50 }
0x1f37   :  { %17313 = vmatmul.mubr.f32.vlgmr.msra.gmra.mrb[14].mxu1 %v7056_v51 }
0x1f38   :  { %19148 = vmatpush3.bf16.msra.mxu1 %v21101_v43  ;;  %17323 = vmatprep.mubr.msk.f32.mxu1 %vm20320_vm0, %v20321_v4 }
0x1f39   :  { %19149 = vmatprep.subr.bf16.mxu1 %v20319_v0 }
0x1f3c   :  { %19151 = vmatpush3.bf16.msra.mxu1 %v21107_v52 }
0x1f3d   :  { %19152 = vmatprep.subr.bf16.mxu1 %v20319_v0 }
0x1f3f   :  { %17324 = vmatmul.mubr.f32.vlgmr.msra.gmra.mrb[14].mxu1 %v21301_v42 }
0x1f40   :  { %19154 = vmatpush3.bf16.msra.mxu1 %v21109_v53  ;;  %17334 = vmatprep.mubr.msk.f32.mxu1 %vm20320_vm0, %v20321_v4 }
0x1f41   :  { %19155 = vmatprep.subr.bf16.mxu1 %v20319_v0 }
0x1f44   :  { %19157 = vmatpush3.bf16.msra.mxu1 %v21111_v54 }
0x1f45   :  { %19158 = vmatprep.subr.bf16.mxu1 %v20319_v0 }
0x1f47   :  { %17335 = vmatmul.mubr.f32.vlgmr.msra.gmra.mrb[14].mxu1 %v7053_v44 }
0x1f48   :  { %19160 = vmatpush3.bf16.msra.mxu1 %v21086_v10  ;;  %17345 = vmatprep.mubr.msk.f32.mxu1 %vm20320_vm0, %v20321_v4 }
0x1f49   :  { %19161 = vmatprep.subr.bf16.mxu1 %v20319_v0 }
0x1f4c   :  { %19163 = vmatpush3.bf16.msra.mxu1 %v21096_v15 }
0x1f4d   :  { %19164 = vmatprep.subr.bf16.mxu1 %v20319_v0 }
0x1f4f   :  { %17346 = vmatmul.mubr.f32.vlgmr.msra.gmra.mrb[14].mxu1 %v7054_v48 }
0x1f50   :  { %19166 = vmatpush3.bf16.msra.mxu1 %v21113_v45  ;;  %17356 = vmatprep.mubr.msk.f32.mxu1 %vm20320_vm0, %v20321_v4 }
0x1f51   :  { %19167 = vmatprep.subr.bf16.mxu1 %v20319_v0 }
0x1f54   :  { %19169 = vmatpush3.bf16.msra.mxu1 %v21115_v28 }
0x1f55   :  { %19170 = vmatprep.subr.bf16.mxu1 %v20319_v0 }
0x1f57   :  { %17357 = vmatmul.mubr.f32.vlgmr.msra.gmra.mrb[14].mxu1 %v21301_v42 }
0x1f58   :  { %19172 = vmatpush3.bf16.msra.mxu1 %v21086_v10  ;;  %17367 = vmatprep.mubr.msk.f32.mxu1 %vm20320_vm0, %v20321_v4 }
0x1f59   :  { %19173 = vmatprep.subr.bf16.mxu1 %v20319_v0 }
0x1f5c   :  { %19175 = vmatpush3.bf16.msra.mxu1 %v21096_v15 }
0x1f5d   :  { %19248 = vmatprep.subr.bf16.mxu1 %v20319_v0 }
0x1f5f   :  { %17368 = vmatmul.mubr.f32.vlgmr.msra.gmra.mrb[14].mxu1 %v21301_v42 }
0x1f60   :  { %19250 = vmatpush3.bf16.msra.mxu1 %v20997_v27  ;;  %17492 = vmatprep.mubr.msk.f32.mxu1 %vm20320_vm0, %v20321_v4 }
0x1f61   :  { %19251 = vmatprep.subr.bf16.mxu1 %v20319_v0 }
0x1f64   :  { %19253 = vmatpush3.bf16.msra.mxu1 %v21010_v56 }
0x1f65   :  { %19254 = vmatprep.subr.bf16.mxu1 %v20319_v0 }
0x1f67   :  { %17493 = vmatmul.mubr.f32.vlgmr.msra.gmra.mrb[16].mxu1 %v7056_v51 }
0x1f68   :  { %19256 = vmatpush3.bf16.msra.mxu1 %v21018_v5  ;;  %17503 = vmatprep.mubr.msk.f32.mxu1 %vm20320_vm0, %v20321_v4 }
0x1f69   :  { %19257 = vmatprep.subr.bf16.mxu1 %v20319_v0 }
0x1f6c   :  { %19259 = vmatpush3.bf16.msra.mxu1 %v21022_v9 }
0x1f6d   :  { %19260 = vmatprep.subr.bf16.mxu1 %v20319_v0 }
0x1f6f   :  { %17504 = vmatmul.mubr.f32.vlgmr.msra.gmra.mrb[16].mxu1 %v21301_v42 }
0x1f70   :  { %19262 = vmatpush3.bf16.msra.mxu1 %v21024_v11  ;;  %17514 = vmatprep.mubr.msk.f32.mxu1 %vm20320_vm0, %v20321_v4 }
0x1f71   :  { %19263 = vmatprep.subr.bf16.mxu1 %v20319_v0 }
0x1f74   :  { %19265 = vmatpush3.bf16.msra.mxu1 %v21026_v13 }
0x1f75   :  { %19266 = vmatprep.subr.bf16.mxu1 %v20319_v0 }
0x1f77   :  { %17515 = vmatmul.mubr.f32.vlgmr.msra.gmra.mrb[16].mxu1 %v7053_v44 }
0x1f78   :  { %19268 = vmatpush3.bf16.msra.mxu1 %v20997_v27  ;;  %17525 = vmatprep.mubr.msk.f32.mxu1 %vm20320_vm0, %v20321_v4 }
0x1f79   :  { %19269 = vmatprep.subr.bf16.mxu1 %v20319_v0 }
0x1f7c   :  { %19271 = vmatpush3.bf16.msra.mxu1 %v21010_v56 }
0x1f7d   :  { %19272 = vmatprep.subr.bf16.mxu1 %v20319_v0 }
0x1f7f   :  { %17526 = vmatmul.mubr.f32.vlgmr.msra.gmra.mrb[16].mxu1 %v7054_v48 }
0x1f80   :  { %19274 = vmatpush3.bf16.msra.mxu1 %v21028_v16  ;;  %17536 = vmatprep.mubr.msk.f32.mxu1 %vm20320_vm0, %v20321_v4 }
0x1f81   :  { %19275 = vmatprep.subr.bf16.mxu1 %v20319_v0 }
0x1f84   :  { %19277 = vmatpush3.bf16.msra.mxu1 %v21030_v17 }
0x1f85   :  { %19278 = vmatprep.subr.bf16.mxu1 %v20319_v0 }
0x1f87   :  { %17537 = vmatmul.mubr.f32.vlgmr.msra.gmra.mrb[16].mxu1 %v21301_v42 }
0x1f88   :  { %19280 = vmatpush3.bf16.msra.mxu1 %v20997_v27  ;;  %17547 = vmatprep.mubr.msk.f32.mxu1 %vm20320_vm0, %v20321_v4 }
0x1f89   :  { %19281 = vmatprep.subr.bf16.mxu1 %v20319_v0 }
0x1f8c   :  { %19283 = vmatpush3.bf16.msra.mxu1 %v21010_v56 }
0x1f8d   :  { %19284 = vmatprep.subr.bf16.mxu1 %v20319_v0 }
0x1f8f   :  { %17548 = vmatmul.mubr.f32.vlgmr.msra.gmra.mrb[16].mxu1 %v21301_v42 }
0x1f90   :  { %19286 = vmatpush3.bf16.msra.mxu1 %v21086_v10  ;;  %17558 = vmatprep.mubr.msk.f32.mxu1 %vm20320_vm0, %v20321_v4 }
0x1f91   :  { %19287 = vmatprep.subr.bf16.mxu1 %v20319_v0 }
0x1f94   :  { %19289 = vmatpush3.bf16.msra.mxu1 %v21096_v15 }
0x1f95   :  { %19290 = vmatprep.subr.bf16.mxu1 %v20319_v0 }
0x2032   :  { %v7464_v47 = vpop.f32.mrb[14].mxu1 }
0x2033   :  { %v19909_v12 = vadd.f32 %v21207_v46, %v7464_v47  ;;  %v17369_v29 = vpop.f32.mrb[15].mxu1 }
0x2035   :  { %15281 = vst.msk [vmem:[%s22200_s11 + $0x4] sm:$0x3] %vm4347_vm4, %v19909_v12  ;;  %v7470_v30 = vsel %vm4347_vm4, %v19909_v12, -inf }
0x2036   :  { %7471 = vmax.xlane.f32.xlu0 %v7470_v30 }
0x2062   :  { %v8502_v55 = vpop.f32.mrb[16].mxu1 }
0x2063   :  { %v21389_v32 = vadd.f32 %v21068_v26, %v8502_v55  ;;  %v17549_v33 = vpop.f32.mrb[17].mxu1 }
0x2065   :  { %8514 = vrot.lane.b32.xlu0 %v21389_v32, %s20323_s28 }
0x20c3   :  { %v7472_v6 = vpop.xlane.xlu0 %7471 }
0x20c4   :  { %vm7473_vm7 = vcmp.eq.f32.partialorder %v19909_v12, %v7472_v6 }
0x20c5   :  { %v7474_v7 = vsel %vm7473_vm7, %v21221_v25, 64.0 }
0x20c6   :  { %v7475_v18 = vsel %vm4347_vm4, %v7474_v7, inf }
0x20c7   :  { %7476 = vmin.xlane.f32.xlu1 %v7475_v18 }
0x20d7   :  { %v8515_v51 = vpop.permute.xlu0 %8514 }
0x2154   :  { %v7477_v19 = vpop.xlane.xlu1 %7476 }
0x2155   :  { %vm7478_vm8 = vcmp.eq.f32.partialorder %v21221_v25, %v7477_v19 }
0x2156   :  { %v15282_v20 = vsel %vm7478_vm8, 1.0, %v20321_v4 }
0x2157   :  { %v7482_v21 = vsel %vm4355_vm2, %v15282_v20, 0 }
0x2158   :  { %v7558_v26 = vsub.f32 %v7482_v21, %v7482_v21 }
0x215a   :  { %v7559_v22 = vand.u32 4294901760, %v7558_v26 }
0x215c   :  { %v7560_v37 = vsub.f32 %v7558_v26, %v7559_v22 }
0x215e   :  { %v7561_v34 = vand.u32 4294901760, %v7560_v37 }
0x2160   :  { %17387 = vmatmul.mubr.f32.vlgmr.msra.gmra.mrb[12].mxu0 %v7561_v34 }
0x2161   :  { %19190 = vmatpush3.bf16.msra.mxu0 %v20895_v39  ;;  %17405 = vmatprep.mubr.msk.f32.mxu0 %vm20320_vm0, %v20321_v4 }
0x2162   :  { %19191 = vmatprep.subr.bf16.mxu0 %v20319_v0 }
0x2165   :  { %19193 = vmatpush3.bf16.msra.mxu0 %v20897_v49 }
0x2166   :  { %19194 = vmatprep.subr.bf16.mxu0 %v20319_v0 }
0x2169   :  { %19196 = vmatpush3.bf16.msra.mxu0 %v20899_v31 }
0x216a   :  { %19197 = vmatprep.subr.bf16.mxu0 %v20319_v0 }
0x216d   :  { %19199 = vmatpush3.bf16.msra.mxu0 %v20901_v57 }
0x216e   :  { %19200 = vmatprep.subr.bf16.mxu0 %v20319_v0 }
0x2170   :  { %17406 = vmatmul.mubr.msk.f32.vlgmr.msra.gmra.mrb[12].mxu0 %vm4355_vm2, %v15282_v20 }
0x2171   :  { %19202 = vmatpush3.bf16.msra.mxu0 %v20903_v58  ;;  %17424 = vmatprep.mubr.msk.f32.mxu0 %vm20320_vm0, %v20321_v4 }
0x2172   :  { %19203 = vmatprep.subr.bf16.mxu0 %v20319_v0 }
0x2175   :  { %19205 = vmatpush3.bf16.msra.mxu0 %v20905_v59 }
0x2176   :  { %19206 = vmatprep.subr.bf16.mxu0 %v20319_v0 }
0x2179   :  { %19208 = vmatpush3.bf16.msra.mxu0 %v20907_v60 }
0x217a   :  { %19209 = vmatprep.subr.bf16.mxu0 %v20319_v0 }
0x217d   :  { %19211 = vmatpush3.bf16.msra.mxu0 %v20909_v61 }
0x217e   :  { %19212 = vmatprep.subr.bf16.mxu0 %v20319_v0 }
0x2180   :  { %17425 = vmatmul.mubr.f32.vlgmr.msra.gmra.mrb[12].mxu0 %v7558_v26 }
0x2181   :  { %19214 = vmatpush3.bf16.msra.mxu0 %v20858_v1  ;;  %17443 = vmatprep.mubr.msk.f32.mxu0 %vm20320_vm0, %v20321_v4 }
0x2182   :  { %19215 = vmatprep.subr.bf16.mxu0 %v20319_v0 }
0x2185   :  { %19217 = vmatpush3.bf16.msra.mxu0 %v20871_v8 }
0x2186   :  { %19218 = vmatprep.subr.bf16.mxu0 %v20319_v0 }
0x2189   :  { %19220 = vmatpush3.bf16.msra.mxu0 %v20881_v14 }
0x218a   :  { %19221 = vmatprep.subr.bf16.mxu0 %v20319_v0 }
0x218d   :  { %19223 = vmatpush3.bf16.msra.mxu0 %v20891_v24 }
0x218e   :  { %19224 = vmatprep.subr.bf16.mxu0 %v20319_v0 }
0x2190   :  { %17444 = vmatmul.mubr.f32.vlgmr.msra.gmra.mrb[12].mxu0 %v7559_v22 }
0x2191   :  { %19226 = vmatpush3.bf16.msra.mxu0 %v20911_v62  ;;  %17462 = vmatprep.mubr.msk.f32.mxu0 %vm20320_vm0, %v20321_v4 }
0x2192   :  { %19227 = vmatprep.subr.bf16.mxu0 %v20319_v0 }
0x2195   :  { %19229 = vmatpush3.bf16.msra.mxu0 %v20913_v63 }
0x2196   :  { %19230 = vmatprep.subr.bf16.mxu0 %v20319_v0 }
0x2199   :  { %19232 = vmatpush3.bf16.msra.mxu0 %v20915_v2 }
0x219a   :  { %19233 = vmatprep.subr.bf16.mxu0 %v20319_v0 }
0x219d   :  { %19235 = vmatpush3.bf16.msra.mxu0 %v20917_v3 }
0x219e   :  { %19236 = vmatprep.subr.bf16.mxu0 %v20319_v0 }
0x21a0   :  { %17463 = vmatmul.mubr.msk.f32.vlgmr.msra.gmra.mrb[12].mxu0 %vm4355_vm2, %v15282_v20 }
0x21a1   :  { %19238 = vmatpush3.bf16.msra.mxu0 %v20858_v1  ;;  %17481 = vmatprep.mubr.msk.f32.mxu0 %vm20320_vm0, %v20321_v4 }
0x21a2   :  { %19239 = vmatprep.subr.bf16.mxu0 %v20319_v0 }
0x21a5   :  { %19241 = vmatpush3.bf16.msra.mxu0 %v20871_v8 }
0x21a6   :  { %19242 = vmatprep.subr.bf16.mxu0 %v20319_v0 }
0x21a9   :  { %19244 = vmatpush3.bf16.msra.mxu0 %v20881_v14 }
0x21aa   :  { %19245 = vmatprep.subr.bf16.mxu0 %v20319_v0 }
0x21ad   :  { %19247 = vmatpush3.bf16.msra.mxu0 %v20891_v24 }
0x21ae   :  { %19320 = vmatprep.subr.bf16.mxu0 %v20319_v0 }
0x21b0   :  { %17482 = vmatmul.mubr.msk.f32.vlgmr.msra.gmra.mrb[12].mxu0 %vm4355_vm2, %v15282_v20 }
0x21b1   :  { %19322 = vmatpush3.bf16.msra.mxu0 %v20858_v1  ;;  %17632 = vmatprep.mubr.msk.f32.mxu0 %vm20320_vm0, %v20321_v4 }
0x21b2   :  { %19323 = vmatprep.subr.bf16.mxu0 %v20319_v0 }
0x21b5   :  { %19325 = vmatpush3.bf16.msra.mxu0 %v20871_v8 }
0x21b6   :  { %19326 = vmatprep.subr.bf16.mxu0 %v20319_v0 }
0x21b9   :  { %19328 = vmatpush3.bf16.msra.mxu0 %v20881_v14 }
0x21ba   :  { %19329 = vmatprep.subr.bf16.mxu0 %v20319_v0 }
0x21bd   :  { %19331 = vmatpush3.bf16.msra.mxu0 %v20891_v24 }
0x21be   :  { %19332 = vmatprep.subr.bf16.mxu0 %v20319_v0 }
0x2283   :  { %v8017_v23 = vpop.f32.mrb[12].mxu0 }
0x2284   :  { %v19910_v35 = vadd.f32 %v21075_v38, %v8017_v23  ;;  %v17483_v40 = vpop.f32.mrb[13].mxu0 }
0x2285   :  { %v21561_v40 = vld [vmem:[%s22197_s8] ss:$0 sm:$0xff] }
0x2286   :  { %v8506_v41 = vadd.f32 %v21389_v32, %v19910_v35 }
0x2288   :  { %v15286_v42 = vmul.f32 -1.442695, %v8506_v41 }
0x228a   :  { %20283 = vpow2.f32 %v15286_v42 }
0x2294   :  { %v20284_v44 = vpop.eup %20283 }
0x2295   :  { %v8510_v48 = vadd.f32 1.0, %v20284_v44 }
0x2297   :  { %20285 = vrcp.f32 %v8510_v48 }
0x22a1   :  { %v20286_v50 = vpop.eup %20285 }
0x22a2   :  { %v8517_v47 = vmul.f32 %v20286_v50, %v8515_v51  ;;  %v8524_v38 = vsub.f32 1.0, %v20286_v50  ;;  %v8530_v32 = vmul.f32 %v20286_v50, %v21296_v36 }
0x22a4   :  { %8519 = vrot.lane.b32.xlu1 %v8517_v47, %s20323_s28 }
0x2316   :  { %v8520_v12 = vpop.permute.xlu1 %8519 }
0x2317   :  { %v8522_v29 = vadd.f32 %v19910_v35, %v8520_v12 }
0x2319   :  { %20287 = vtanh.f32 %v8522_v29 }
0x2323   :  { %v20288_v30 = vpop.eup %20287 }
0x2324   :  { %8526 = vrot.lane.b32.xlu0 %v20288_v30, %s20324_s12 }
0x2396   :  { %v8527_v55 = vpop.permute.xlu0 %8526 }
0x2397   :  { %v8529_v33 = vmul.f32 %v8527_v55, %v8524_v38 }
0x2399   :  { %v21466_v6 = vadd.f32 %v8530_v32, %v8529_v33  ;;  %v21639_v32 = vld [vmem:[%s22198_s7] ss:$0 sm:$0xff] }
0x239b   :  { %8533 = vrot.lane.b32.xlu1 %v21466_v6, %s20324_s12 }
0x240d   :  { %v8534_v7 = vpop.permute.xlu1 %8533 }
0x240e   :  { %v8535_v18 = vsel %vm50_vm1, %v8534_v7, 0 }
0x240f   :  { %v21471_v19 = vand.u32 4294901760, %v8535_v18 }
0x2411   :  { %v8607_v20 = vsub.f32 %v8535_v18, %v21471_v19 }
0x2413   :  { %v8608_v21 = vand.u32 4294901760, %v8607_v20 }
0x2415   :  { %v8609_v26 = vsub.f32 %v8607_v20, %v8608_v21 }
0x2417   :  { %v8610_v22 = vand.u32 4294901760, %v8609_v26 }
0x2419   :  { %17559 = vmatmul.mubr.f32.vlgmr.msra.gmra.mrb[18].mxu1 %v8610_v22 }
0x241a   :  { %19292 = vmatpush3.bf16.msra.mxu1 %v21101_v43  ;;  %17569 = vmatprep.mubr.msk.f32.mxu1 %vm20320_vm0, %v20321_v4 }
0x241b   :  { %19293 = vmatprep.subr.bf16.mxu1 %v20319_v0 }
0x241e   :  { %19295 = vmatpush3.bf16.msra.mxu1 %v21107_v52 }
0x241f   :  { %19296 = vmatprep.subr.bf16.mxu1 %v20319_v0 }
0x2421   :  { %17570 = vmatmul.mubr.f32.vlgmr.msra.gmra.mrb[18].mxu1 %v21471_v19 }
0x2422   :  { %19298 = vmatpush3.bf16.msra.mxu1 %v21109_v53  ;;  %17580 = vmatprep.mubr.msk.f32.mxu1 %vm20320_vm0, %v20321_v4 }
0x2423   :  { %19299 = vmatprep.subr.bf16.mxu1 %v20319_v0 }
0x2426   :  { %19301 = vmatpush3.bf16.msra.mxu1 %v21111_v54 }
0x2427   :  { %19302 = vmatprep.subr.bf16.mxu1 %v20319_v0 }
0x2429   :  { %17581 = vmatmul.mubr.f32.vlgmr.msra.gmra.mrb[18].mxu1 %v8607_v20 }
0x242a   :  { %19304 = vmatpush3.bf16.msra.mxu1 %v21086_v10  ;;  %17591 = vmatprep.mubr.msk.f32.mxu1 %vm20320_vm0, %v20321_v4 }
0x242b   :  { %19305 = vmatprep.subr.bf16.mxu1 %v20319_v0 }
0x242e   :  { %19307 = vmatpush3.bf16.msra.mxu1 %v21096_v15 }
0x242f   :  { %19308 = vmatprep.subr.bf16.mxu1 %v20319_v0 }
0x2431   :  { %17592 = vmatmul.mubr.f32.vlgmr.msra.gmra.mrb[18].mxu1 %v8608_v21 }
0x2432   :  { %19310 = vmatpush3.bf16.msra.mxu1 %v21113_v45  ;;  %17602 = vmatprep.mubr.msk.f32.mxu1 %vm20320_vm0, %v20321_v4 }
0x2433   :  { %19311 = vmatprep.subr.bf16.mxu1 %v20319_v0 }
0x2436   :  { %19313 = vmatpush3.bf16.msra.mxu1 %v21115_v28 }
0x2437   :  { %19314 = vmatprep.subr.bf16.mxu1 %v20319_v0 }
0x2439   :  { %17603 = vmatmul.mubr.f32.vlgmr.msra.gmra.mrb[18].mxu1 %v21471_v19 }
0x243a   :  { %19316 = vmatpush3.bf16.msra.mxu1 %v21086_v10  ;;  %17613 = vmatprep.mubr.msk.f32.mxu1 %vm20320_vm0, %v20321_v4 }
0x243b   :  { %19317 = vmatprep.subr.bf16.mxu1 %v20319_v0 }
0x243e   :  { %19319 = vmatpush3.bf16.msra.mxu1 %v21096_v15 }
0x243f   :  { %19392 = vmatprep.subr.bf16.mxu1 %v20319_v0 }
0x2441   :  { %17614 = vmatmul.mubr.f32.vlgmr.msra.gmra.mrb[18].mxu1 %v21471_v19 }
0x2442   :  { %19394 = vmatpush3.bf16.msra.mxu1 %v20997_v27  ;;  %17738 = vmatprep.mubr.msk.f32.mxu1 %vm20320_vm0, %v20321_v4 }
0x2443   :  { %19395 = vmatprep.subr.bf16.mxu1 %v20319_v0 }
0x2446   :  { %19397 = vmatpush3.bf16.msra.mxu1 %v21010_v56 }
0x2447   :  { %19398 = vmatprep.subr.bf16.mxu1 %v20319_v0 }
0x2449   :  { %17739 = vmatmul.mubr.f32.vlgmr.msra.gmra.mrb[20].mxu1 %v8610_v22 }
0x244a   :  { %19400 = vmatpush3.bf16.msra.mxu1 %v21018_v5  ;;  %17749 = vmatprep.mubr.msk.f32.mxu1 %vm20320_vm0, %v20321_v4 }
0x244b   :  { %19401 = vmatprep.subr.bf16.mxu1 %v20319_v0 }
0x244e   :  { %19403 = vmatpush3.bf16.msra.mxu1 %v21022_v9 }
0x244f   :  { %19404 = vmatprep.subr.bf16.mxu1 %v20319_v0 }
0x2451   :  { %17750 = vmatmul.mubr.f32.vlgmr.msra.gmra.mrb[20].mxu1 %v21471_v19 }
0x2452   :  { %19406 = vmatpush3.bf16.msra.mxu1 %v21024_v11  ;;  %17760 = vmatprep.mubr.msk.f32.mxu1 %vm20320_vm0, %v20321_v4 }
0x2453   :  { %19407 = vmatprep.subr.bf16.mxu1 %v20319_v0 }
0x2456   :  { %19409 = vmatpush3.bf16.msra.mxu1 %v21026_v13 }
0x2457   :  { %19410 = vmatprep.subr.bf16.mxu1 %v20319_v0 }
0x2459   :  { %17761 = vmatmul.mubr.f32.vlgmr.msra.gmra.mrb[20].mxu1 %v8607_v20 }
0x245a   :  { %19412 = vmatpush3.bf16.msra.mxu1 %v20997_v27  ;;  %17771 = vmatprep.mubr.msk.f32.mxu1 %vm20320_vm0, %v20321_v4 }
0x245b   :  { %19413 = vmatprep.subr.bf16.mxu1 %v20319_v0 }
0x245e   :  { %19415 = vmatpush3.bf16.msra.mxu1 %v21010_v56 }
0x245f   :  { %19416 = vmatprep.subr.bf16.mxu1 %v20319_v0 }
0x2461   :  { %17772 = vmatmul.mubr.f32.vlgmr.msra.gmra.mrb[20].mxu1 %v8608_v21 }
0x2462   :  { %19418 = vmatpush3.bf16.msra.mxu1 %v21028_v16  ;;  %17782 = vmatprep.mubr.msk.f32.mxu1 %vm20320_vm0, %v20321_v4 }
0x2463   :  { %19419 = vmatprep.subr.bf16.mxu1 %v20319_v0 }
0x2466   :  { %19421 = vmatpush3.bf16.msra.mxu1 %v21030_v17 }
0x2467   :  { %19422 = vmatprep.subr.bf16.mxu1 %v20319_v0 }
0x2469   :  { %17783 = vmatmul.mubr.f32.vlgmr.msra.gmra.mrb[20].mxu1 %v21471_v19 }
0x246a   :  { %19424 = vmatpush3.bf16.msra.mxu1 %v20997_v27  ;;  %17793 = vmatprep.mubr.msk.f32.mxu1 %vm20320_vm0, %v20321_v4 }
0x246b   :  { %19425 = vmatprep.subr.bf16.mxu1 %v20319_v0 }
0x246e   :  { %19427 = vmatpush3.bf16.msra.mxu1 %v21010_v56 }
0x246f   :  { %19428 = vmatprep.subr.bf16.mxu1 %v20319_v0 }
0x2471   :  { %17794 = vmatmul.mubr.f32.vlgmr.msra.gmra.mrb[20].mxu1 %v21471_v19 }
0x2472   :  { %19430 = vmatpush3.bf16.msra.mxu1 %v21086_v10  ;;  %17804 = vmatprep.mubr.msk.f32.mxu1 %vm20320_vm0, %v20321_v4 }
0x2473   :  { %19431 = vmatprep.subr.bf16.mxu1 %v20319_v0 }
0x2476   :  { %19433 = vmatpush3.bf16.msra.mxu1 %v21096_v15 }
0x2477   :  { %19434 = vmatprep.subr.bf16.mxu1 %v20319_v0 }
0x2514   :  { %v9018_v36 = vpop.f32.mrb[18].mxu1 }
0x2515   :  { %v19912_v37 = vadd.f32 %v21207_v46, %v9018_v36  ;;  %v17615_v34 = vpop.f32.mrb[19].mxu1 }
0x2517   :  { %15287 = vst.msk [vmem:[%s22200_s11 + $0x6] sm:$0x3] %vm4347_vm4, %v19912_v37  ;;  %v9024_v23 = vsel %vm4347_vm4, %v19912_v37, -inf }
0x2518   :  { %9025 = vmax.xlane.f32.xlu0 %v9024_v23 }
0x2544   :  { %v10056_v35 = vpop.f32.mrb[20].mxu1 }
0x2545   :  { %v21564_v41 = vadd.f32 %v21561_v40, %v10056_v35  ;;  %v17795_v42 = vpop.f32.mrb[21].mxu1 }
0x2547   :  { %10068 = vrot.lane.b32.xlu0 %v21564_v41, %s20323_s28 }
0x25a5   :  { %v9026_v46 = vpop.xlane.xlu0 %9025 }
0x25a6   :  { %vm9027_vm9 = vcmp.eq.f32.partialorder %v19912_v37, %v9026_v46 }
0x25a7   :  { %v9028_v44 = vsel %vm9027_vm9, %v21221_v25, 64.0 }
0x25a8   :  { %v9029_v48 = vsel %vm4347_vm4, %v9028_v44, inf }
0x25a9   :  { %9030 = vmin.xlane.f32.xlu1 %v9029_v48 }
0x25b9   :  { %v10069_v22 = vpop.permute.xlu0 %10068 }
0x2636   :  { %v9031_v50 = vpop.xlane.xlu1 %9030 }
0x2637   :  { %vm9032_vm10 = vcmp.eq.f32.partialorder %v21221_v25, %v9031_v50 }
0x2638   :  { %v15288_v51 = vsel %vm9032_vm10, 1.0, %v20321_v4 }
0x2639   :  { %v9036_v47 = vsel %vm4355_vm2, %v15288_v51, 0 }
0x263a   :  { %v9112_v12 = vsub.f32 %v9036_v47, %v9036_v47 }
0x263c   :  { %v9113_v29 = vand.u32 4294901760, %v9112_v12 }
0x263e   :  { %v9114_v30 = vsub.f32 %v9112_v12, %v9113_v29 }
0x2640   :  { %v9115_v38 = vand.u32 4294901760, %v9114_v30 }
0x2642   :  { %17633 = vmatmul.mubr.f32.vlgmr.msra.gmra.mrb[14].mxu0 %v9115_v38  ;;  %v21735_v38 = vld [vmem:[%s22201_s10] ss:$0 sm:$0xff] }
0x2643   :  { %19334 = vmatpush3.bf16.msra.mxu0 %v20895_v39  ;;  %17651 = vmatprep.mubr.msk.f32.mxu0 %vm20320_vm0, %v20321_v4 }
0x2644   :  { %19335 = vmatprep.subr.bf16.mxu0 %v20319_v0 }
0x2647   :  { %19337 = vmatpush3.bf16.msra.mxu0 %v20897_v49 }
0x2648   :  { %19338 = vmatprep.subr.bf16.mxu0 %v20319_v0 }
0x264b   :  { %19340 = vmatpush3.bf16.msra.mxu0 %v20899_v31 }
0x264c   :  { %19341 = vmatprep.subr.bf16.mxu0 %v20319_v0 }
0x264f   :  { %19343 = vmatpush3.bf16.msra.mxu0 %v20901_v57 }
0x2650   :  { %19344 = vmatprep.subr.bf16.mxu0 %v20319_v0 }
0x2652   :  { %17652 = vmatmul.mubr.msk.f32.vlgmr.msra.gmra.mrb[14].mxu0 %vm4355_vm2, %v15288_v51 }
0x2653   :  { %19346 = vmatpush3.bf16.msra.mxu0 %v20903_v58  ;;  %17670 = vmatprep.mubr.msk.f32.mxu0 %vm20320_vm0, %v20321_v4 }
0x2654   :  { %19347 = vmatprep.subr.bf16.mxu0 %v20319_v0 }
0x2657   :  { %19349 = vmatpush3.bf16.msra.mxu0 %v20905_v59 }
0x2658   :  { %19350 = vmatprep.subr.bf16.mxu0 %v20319_v0 }
0x265b   :  { %19352 = vmatpush3.bf16.msra.mxu0 %v20907_v60 }
0x265c   :  { %19353 = vmatprep.subr.bf16.mxu0 %v20319_v0 }
0x265f   :  { %19355 = vmatpush3.bf16.msra.mxu0 %v20909_v61 }
0x2660   :  { %19356 = vmatprep.subr.bf16.mxu0 %v20319_v0 }
0x2662   :  { %17671 = vmatmul.mubr.f32.vlgmr.msra.gmra.mrb[14].mxu0 %v9112_v12 }
0x2663   :  { %19358 = vmatpush3.bf16.msra.mxu0 %v20858_v1  ;;  %17689 = vmatprep.mubr.msk.f32.mxu0 %vm20320_vm0, %v20321_v4 }
0x2664   :  { %19359 = vmatprep.subr.bf16.mxu0 %v20319_v0 }
0x2667   :  { %19361 = vmatpush3.bf16.msra.mxu0 %v20871_v8 }
0x2668   :  { %19362 = vmatprep.subr.bf16.mxu0 %v20319_v0 }
0x266b   :  { %19364 = vmatpush3.bf16.msra.mxu0 %v20881_v14 }
0x266c   :  { %19365 = vmatprep.subr.bf16.mxu0 %v20319_v0 }
0x266f   :  { %19367 = vmatpush3.bf16.msra.mxu0 %v20891_v24 }
0x2670   :  { %19368 = vmatprep.subr.bf16.mxu0 %v20319_v0 }
0x2672   :  { %17690 = vmatmul.mubr.f32.vlgmr.msra.gmra.mrb[14].mxu0 %v9113_v29 }
0x2673   :  { %19370 = vmatpush3.bf16.msra.mxu0 %v20911_v62  ;;  %17708 = vmatprep.mubr.msk.f32.mxu0 %vm20320_vm0, %v20321_v4 }
0x2674   :  { %19371 = vmatprep.subr.bf16.mxu0 %v20319_v0 }
0x2677   :  { %19373 = vmatpush3.bf16.msra.mxu0 %v20913_v63 }
0x2678   :  { %19374 = vmatprep.subr.bf16.mxu0 %v20319_v0 }
0x267b   :  { %19376 = vmatpush3.bf16.msra.mxu0 %v20915_v2 }
0x267c   :  { %19377 = vmatprep.subr.bf16.mxu0 %v20319_v0 }
0x267f   :  { %19379 = vmatpush3.bf16.msra.mxu0 %v20917_v3 }
0x2680   :  { %19380 = vmatprep.subr.bf16.mxu0 %v20319_v0 }
0x2682   :  { %17709 = vmatmul.mubr.msk.f32.vlgmr.msra.gmra.mrb[14].mxu0 %vm4355_vm2, %v15288_v51 }
0x2683   :  { %19382 = vmatpush3.bf16.msra.mxu0 %v20858_v1  ;;  %17727 = vmatprep.mubr.msk.f32.mxu0 %vm20320_vm0, %v20321_v4 }
0x2684   :  { %19383 = vmatprep.subr.bf16.mxu0 %v20319_v0 }
0x2687   :  { %19385 = vmatpush3.bf16.msra.mxu0 %v20871_v8 }
0x2688   :  { %19386 = vmatprep.subr.bf16.mxu0 %v20319_v0 }
0x268b   :  { %19388 = vmatpush3.bf16.msra.mxu0 %v20881_v14 }
0x268c   :  { %19389 = vmatprep.subr.bf16.mxu0 %v20319_v0 }
0x268f   :  { %19391 = vmatpush3.bf16.msra.mxu0 %v20891_v24 }
0x2690   :  { %19464 = vmatprep.subr.bf16.mxu0 %v20319_v0 }
0x2692   :  { %17728 = vmatmul.mubr.msk.f32.vlgmr.msra.gmra.mrb[14].mxu0 %vm4355_vm2, %v15288_v51 }
0x2693   :  { %19466 = vmatpush3.bf16.msra.mxu0 %v20858_v1  ;;  %17878 = vmatprep.mubr.msk.f32.mxu0 %vm20320_vm0, %v20321_v4 }
0x2694   :  { %19467 = vmatprep.subr.bf16.mxu0 %v20319_v0 }
0x2697   :  { %19469 = vmatpush3.bf16.msra.mxu0 %v20871_v8 }
0x2698   :  { %19470 = vmatprep.subr.bf16.mxu0 %v20319_v0 }
0x269b   :  { %19472 = vmatpush3.bf16.msra.mxu0 %v20881_v14 }
0x269c   :  { %19473 = vmatprep.subr.bf16.mxu0 %v20319_v0 }
0x269f   :  { %19475 = vmatpush3.bf16.msra.mxu0 %v20891_v24 }
0x26a0   :  { %19476 = vmatprep.subr.bf16.mxu0 %v20319_v0 }
0x2765   :  { %v9571_v55 = vpop.f32.mrb[14].mxu0 }
0x2766   :  { %v19913_v33 = vadd.f32 %v21639_v32, %v9571_v55  ;;  %v17729_v7 = vpop.f32.mrb[15].mxu0 }
0x2768   :  { %v10060_v18 = vadd.f32 %v21564_v41, %v19913_v33 }
0x276a   :  { %v15292_v19 = vmul.f32 -1.442695, %v10060_v18 }
0x276c   :  { %20289 = vpow2.f32 %v15292_v19 }
0x2776   :  { %v20290_v20 = vpop.eup %20289 }
0x2777   :  { %v10064_v21 = vadd.f32 1.0, %v20290_v20 }
0x2779   :  { %20291 = vrcp.f32 %v10064_v21 }
0x2783   :  { %v20292_v26 = vpop.eup %20291 }
0x2784   :  { %v10071_v36 = vmul.f32 %v20292_v26, %v10069_v22  ;;  %v10078_v35 = vsub.f32 1.0, %v20292_v26  ;;  %v10084_v41 = vmul.f32 %v20292_v26, %v21466_v6 }
0x2786   :  { %10073 = vrot.lane.b32.xlu1 %v10071_v36, %s20323_s28 }
0x27f8   :  { %v10074_v37 = vpop.permute.xlu1 %10073 }
0x27f9   :  { %v10076_v34 = vadd.f32 %v19913_v33, %v10074_v37 }
0x27fb   :  { %20293 = vtanh.f32 %v10076_v34 }
0x2805   :  { %v20294_v23 = vpop.eup %20293 }
0x2806   :  { %10080 = vrot.lane.b32.xlu0 %v20294_v23, %s20324_s12 }
0x2878   :  { %v10081_v42 = vpop.permute.xlu0 %10080 }
0x2879   :  { %v10083_v46 = vmul.f32 %v10081_v42, %v10078_v35 }
0x287b   :  { %v21646_v44 = vadd.f32 %v10084_v41, %v10083_v46 }
0x287d   :  { %10087 = vrot.lane.b32.xlu1 %v21646_v44, %s20324_s12 }
0x28ef   :  { %v10088_v48 = vpop.permute.xlu1 %10087 }
0x28f0   :  { %v10089_v50 = vsel %vm50_vm1, %v10088_v48, 0 }
0x28f1   :  { %v21651_v51 = vand.u32 4294901760, %v10089_v50 }
0x28f3   :  { %v10161_v47 = vsub.f32 %v10089_v50, %v21651_v51 }
0x28f5   :  { %v10162_v12 = vand.u32 4294901760, %v10161_v47 }
0x28f7   :  { %v10163_v29 = vsub.f32 %v10161_v47, %v10162_v12 }
0x28f9   :  { %v10164_v30 = vand.u32 4294901760, %v10163_v29 }
0x28fb   :  { %17805 = vmatmul.mubr.f32.vlgmr.msra.gmra.mrb[22].mxu1 %v10164_v30 }
0x28fc   :  { %19436 = vmatpush3.bf16.msra.mxu1 %v21101_v43  ;;  %17815 = vmatprep.mubr.msk.f32.mxu1 %vm20320_vm0, %v20321_v4 }
0x28fd   :  { %19437 = vmatprep.subr.bf16.mxu1 %v20319_v0 }
0x2900   :  { %19439 = vmatpush3.bf16.msra.mxu1 %v21107_v52 }
0x2901   :  { %19440 = vmatprep.subr.bf16.mxu1 %v20319_v0 }
0x2903   :  { %17816 = vmatmul.mubr.f32.vlgmr.msra.gmra.mrb[22].mxu1 %v21651_v51 }
0x2904   :  { %19442 = vmatpush3.bf16.msra.mxu1 %v21109_v53  ;;  %17826 = vmatprep.mubr.msk.f32.mxu1 %vm20320_vm0, %v20321_v4 }
0x2905   :  { %19443 = vmatprep.subr.bf16.mxu1 %v20319_v0 }
0x2908   :  { %19445 = vmatpush3.bf16.msra.mxu1 %v21111_v54 }
0x2909   :  { %19446 = vmatprep.subr.bf16.mxu1 %v20319_v0 }
0x290b   :  { %17827 = vmatmul.mubr.f32.vlgmr.msra.gmra.mrb[22].mxu1 %v10161_v47 }
0x290c   :  { %19448 = vmatpush3.bf16.msra.mxu1 %v21086_v10  ;;  %17837 = vmatprep.mubr.msk.f32.mxu1 %vm20320_vm0, %v20321_v4 }
0x290d   :  { %19449 = vmatprep.subr.bf16.mxu1 %v20319_v0 }
0x2910   :  { %19451 = vmatpush3.bf16.msra.mxu1 %v21096_v15 }
0x2911   :  { %19452 = vmatprep.subr.bf16.mxu1 %v20319_v0 }
0x2913   :  { %17838 = vmatmul.mubr.f32.vlgmr.msra.gmra.mrb[22].mxu1 %v10162_v12 }
0x2914   :  { %19454 = vmatpush3.bf16.msra.mxu1 %v21113_v45  ;;  %17848 = vmatprep.mubr.msk.f32.mxu1 %vm20320_vm0, %v20321_v4 }
0x2915   :  { %19455 = vmatprep.subr.bf16.mxu1 %v20319_v0 }
0x2918   :  { %19457 = vmatpush3.bf16.msra.mxu1 %v21115_v28 }
0x2919   :  { %19458 = vmatprep.subr.bf16.mxu1 %v20319_v0 }
0x291b   :  { %17849 = vmatmul.mubr.f32.vlgmr.msra.gmra.mrb[22].mxu1 %v21651_v51 }
0x291c   :  { %19460 = vmatpush3.bf16.msra.mxu1 %v21086_v10  ;;  %17859 = vmatprep.mubr.msk.f32.mxu1 %vm20320_vm0, %v20321_v4 }
0x291d   :  { %19461 = vmatprep.subr.bf16.mxu1 %v20319_v0 }
0x2920   :  { %19463 = vmatpush3.bf16.msra.mxu1 %v21096_v15 }
0x2921   :  { %19536 = vmatprep.subr.bf16.mxu1 %v20319_v0 }
0x2923   :  { %17860 = vmatmul.mubr.f32.vlgmr.msra.gmra.mrb[22].mxu1 %v21651_v51 }
0x2924   :  { %19538 = vmatpush3.bf16.msra.mxu1 %v20997_v27  ;;  %17984 = vmatprep.mubr.msk.f32.mxu1 %vm20320_vm0, %v20321_v4 }
0x2925   :  { %19539 = vmatprep.subr.bf16.mxu1 %v20319_v0 }
0x2928   :  { %19541 = vmatpush3.bf16.msra.mxu1 %v21010_v56 }
0x2929   :  { %19542 = vmatprep.subr.bf16.mxu1 %v20319_v0 }
0x292b   :  { %17985 = vmatmul.mubr.f32.vlgmr.msra.gmra.mrb[24].mxu1 %v10164_v30 }
0x292c   :  { %19544 = vmatpush3.bf16.msra.mxu1 %v21018_v5  ;;  %17995 = vmatprep.mubr.msk.f32.mxu1 %vm20320_vm0, %v20321_v4 }
0x292d   :  { %19545 = vmatprep.subr.bf16.mxu1 %v20319_v0 }
0x2930   :  { %19547 = vmatpush3.bf16.msra.mxu1 %v21022_v9 }
0x2931   :  { %19548 = vmatprep.subr.bf16.mxu1 %v20319_v0 }
0x2933   :  { %17996 = vmatmul.mubr.f32.vlgmr.msra.gmra.mrb[24].mxu1 %v21651_v51 }
0x2934   :  { %19550 = vmatpush3.bf16.msra.mxu1 %v21024_v11  ;;  %18006 = vmatprep.mubr.msk.f32.mxu1 %vm20320_vm0, %v20321_v4 }
0x2935   :  { %19551 = vmatprep.subr.bf16.mxu1 %v20319_v0 }
0x2938   :  { %19553 = vmatpush3.bf16.msra.mxu1 %v21026_v13 }
0x2939   :  { %19554 = vmatprep.subr.bf16.mxu1 %v20319_v0 }
0x293b   :  { %18007 = vmatmul.mubr.f32.vlgmr.msra.gmra.mrb[24].mxu1 %v10161_v47 }
0x293c   :  { %19556 = vmatpush3.bf16.msra.mxu1 %v20997_v27  ;;  %18017 = vmatprep.mubr.msk.f32.mxu1 %vm20320_vm0, %v20321_v4 }
0x293d   :  { %19557 = vmatprep.subr.bf16.mxu1 %v20319_v0 }
0x2940   :  { %19559 = vmatpush3.bf16.msra.mxu1 %v21010_v56 }
0x2941   :  { %19560 = vmatprep.subr.bf16.mxu1 %v20319_v0 }
0x2943   :  { %18018 = vmatmul.mubr.f32.vlgmr.msra.gmra.mrb[24].mxu1 %v10162_v12 }
0x2944   :  { %19562 = vmatpush3.bf16.msra.mxu1 %v21028_v16  ;;  %18028 = vmatprep.mubr.msk.f32.mxu1 %vm20320_vm0, %v20321_v4 }
0x2945   :  { %19563 = vmatprep.subr.bf16.mxu1 %v20319_v0 }
0x2948   :  { %19565 = vmatpush3.bf16.msra.mxu1 %v21030_v17 }
0x2949   :  { %19566 = vmatprep.subr.bf16.mxu1 %v20319_v0 }
0x294b   :  { %18029 = vmatmul.mubr.f32.vlgmr.msra.gmra.mrb[24].mxu1 %v21651_v51 }
0x294c   :  { %19568 = vmatpush3.bf16.msra.mxu1 %v20997_v27  ;;  %18039 = vmatprep.mubr.msk.f32.mxu1 %vm20320_vm0, %v20321_v4 }
0x294d   :  { %19569 = vmatprep.subr.bf16.mxu1 %v20319_v0 }
0x2950   :  { %19571 = vmatpush3.bf16.msra.mxu1 %v21010_v56 }
0x2951   :  { %19572 = vmatprep.subr.bf16.mxu1 %v20319_v0 }
0x2953   :  { %18040 = vmatmul.mubr.f32.vlgmr.msra.gmra.mrb[24].mxu1 %v21651_v51 }
0x2954   :  { %19574 = vmatpush3.bf16.msra.mxu1 %v21086_v10  ;;  %18050 = vmatprep.mubr.msk.f32.mxu1 %vm20320_vm0, %v20321_v4 }
0x2955   :  { %19575 = vmatprep.subr.bf16.mxu1 %v20319_v0 }
0x2958   :  { %19577 = vmatpush3.bf16.msra.mxu1 %v21096_v15 }
0x2959   :  { %19578 = vmatprep.subr.bf16.mxu1 %v20319_v0 }
0x29f6   :  { %v10572_v6 = vpop.f32.mrb[22].mxu1 }
0x29f7   :  { %v19915_v55 = vadd.f32 %v21735_v38, %v10572_v6  ;;  %v17861_v33 = vpop.f32.mrb[23].mxu1 }
0x29f9   :  { %15293 = vst.msk [vmem:[%s22200_s11 + $0x8] sm:$0x3] %vm4347_vm4, %v19915_v55  ;;  %v10578_v7 = vsel %vm4347_vm4, %v19915_v55, -inf }
0x29fa   :  { %10579 = vmax.xlane.f32.xlu0 %v10578_v7 }
0x2a26   :  { %v11610_v18 = vpop.f32.mrb[24].mxu1 }
0x2a27   :  { %v21744_v19 = vadd.f32 %v21561_v40, %v11610_v18  ;;  %v18041_v20 = vpop.f32.mrb[25].mxu1 }
0x2a29   :  { %11622 = vrot.lane.b32.xlu0 %v21744_v19, %s20323_s28 }
0x2a87   :  { %v10580_v21 = vpop.xlane.xlu0 %10579 }
0x2a88   :  { %vm10581_vm11 = vcmp.eq.f32.partialorder %v19915_v55, %v10580_v21 }
0x2a89   :  { %v10582_v26 = vsel %vm10581_vm11, %v21221_v25, 64.0 }
0x2a8a   :  { %v10583_v22 = vsel %vm4347_vm4, %v10582_v26, inf }
0x2a8b   :  { %10584 = vmin.xlane.f32.xlu1 %v10583_v22 }
0x2a9b   :  { %v11623_v6 = vpop.permute.xlu0 %11622 }
0x2b18   :  { %v10585_v36 = vpop.xlane.xlu1 %10584 }
0x2b19   :  { %vm10586_vm12 = vcmp.eq.f32.partialorder %v21221_v25, %v10585_v36 }
0x2b1a   :  { %v15294_v37 = vsel %vm10586_vm12, 1.0, %v20321_v4 }
0x2b1b   :  { %v10590_v34 = vsel %vm4355_vm2, %v15294_v37, 0 }
0x2b1c   :  { %v10666_v23 = vsub.f32 %v10590_v34, %v10590_v34 }
0x2b1e   :  { %v10667_v35 = vand.u32 4294901760, %v10666_v23 }
0x2b20   :  { %v10668_v42 = vsub.f32 %v10666_v23, %v10667_v35 }
0x2b22   :  { %v10669_v41 = vand.u32 4294901760, %v10668_v42 }
0x2b24   :  { %17879 = vmatmul.mubr.f32.vlgmr.msra.gmra.mrb[16].mxu0 %v10669_v41 }
0x2b25   :  { %19478 = vmatpush3.bf16.msra.mxu0 %v20895_v39  ;;  %17897 = vmatprep.mubr.msk.f32.mxu0 %vm20320_vm0, %v20321_v4 }
0x2b26   :  { %19479 = vmatprep.subr.bf16.mxu0 %v20319_v0 }
0x2b29   :  { %19481 = vmatpush3.bf16.msra.mxu0 %v20897_v49 }
0x2b2a   :  { %19482 = vmatprep.subr.bf16.mxu0 %v20319_v0 }
0x2b2d   :  { %19484 = vmatpush3.bf16.msra.mxu0 %v20899_v31 }
0x2b2e   :  { %19485 = vmatprep.subr.bf16.mxu0 %v20319_v0 }
0x2b31   :  { %19487 = vmatpush3.bf16.msra.mxu0 %v20901_v57 }
0x2b32   :  { %19488 = vmatprep.subr.bf16.mxu0 %v20319_v0 }
0x2b34   :  { %17898 = vmatmul.mubr.msk.f32.vlgmr.msra.gmra.mrb[16].mxu0 %vm4355_vm2, %v15294_v37 }
0x2b35   :  { %19490 = vmatpush3.bf16.msra.mxu0 %v20903_v58  ;;  %17916 = vmatprep.mubr.msk.f32.mxu0 %vm20320_vm0, %v20321_v4 }
0x2b36   :  { %19491 = vmatprep.subr.bf16.mxu0 %v20319_v0 }
0x2b39   :  { %19493 = vmatpush3.bf16.msra.mxu0 %v20905_v59 }
0x2b3a   :  { %19494 = vmatprep.subr.bf16.mxu0 %v20319_v0 }
0x2b3d   :  { %19496 = vmatpush3.bf16.msra.mxu0 %v20907_v60 }
0x2b3e   :  { %19497 = vmatprep.subr.bf16.mxu0 %v20319_v0 }
0x2b41   :  { %19499 = vmatpush3.bf16.msra.mxu0 %v20909_v61 }
0x2b42   :  { %19500 = vmatprep.subr.bf16.mxu0 %v20319_v0 }
0x2b44   :  { %17917 = vmatmul.mubr.f32.vlgmr.msra.gmra.mrb[16].mxu0 %v10666_v23 }
0x2b45   :  { %19502 = vmatpush3.bf16.msra.mxu0 %v20858_v1  ;;  %17935 = vmatprep.mubr.msk.f32.mxu0 %vm20320_vm0, %v20321_v4 }
0x2b46   :  { %19503 = vmatprep.subr.bf16.mxu0 %v20319_v0 }
0x2b49   :  { %19505 = vmatpush3.bf16.msra.mxu0 %v20871_v8 }
0x2b4a   :  { %19506 = vmatprep.subr.bf16.mxu0 %v20319_v0 }
0x2b4d   :  { %19508 = vmatpush3.bf16.msra.mxu0 %v20881_v14 }
0x2b4e   :  { %19509 = vmatprep.subr.bf16.mxu0 %v20319_v0 }
0x2b51   :  { %19511 = vmatpush3.bf16.msra.mxu0 %v20891_v24 }
0x2b52   :  { %19512 = vmatprep.subr.bf16.mxu0 %v20319_v0 }
0x2b54   :  { %17936 = vmatmul.mubr.f32.vlgmr.msra.gmra.mrb[16].mxu0 %v10667_v35 }
0x2b55   :  { %19514 = vmatpush3.bf16.msra.mxu0 %v20911_v62  ;;  %17954 = vmatprep.mubr.msk.f32.mxu0 %vm20320_vm0, %v20321_v4 }
0x2b56   :  { %19515 = vmatprep.subr.bf16.mxu0 %v20319_v0 }
0x2b59   :  { %19517 = vmatpush3.bf16.msra.mxu0 %v20913_v63 }
0x2b5a   :  { %19518 = vmatprep.subr.bf16.mxu0 %v20319_v0 }
0x2b5d   :  { %19520 = vmatpush3.bf16.msra.mxu0 %v20915_v2 }
0x2b5e   :  { %19521 = vmatprep.subr.bf16.mxu0 %v20319_v0 }
0x2b61   :  { %19523 = vmatpush3.bf16.msra.mxu0 %v20917_v3 }
0x2b62   :  { %19524 = vmatprep.subr.bf16.mxu0 %v20319_v0 }
0x2b64   :  { %17955 = vmatmul.mubr.msk.f32.vlgmr.msra.gmra.mrb[16].mxu0 %vm4355_vm2, %v15294_v37 }
0x2b65   :  { %19526 = vmatpush3.bf16.msra.mxu0 %v20858_v1  ;;  %17973 = vmatprep.mubr.msk.f32.mxu0 %vm20320_vm0, %v20321_v4 }
0x2b66   :  { %19527 = vmatprep.subr.bf16.mxu0 %v20319_v0 }
0x2b69   :  { %19529 = vmatpush3.bf16.msra.mxu0 %v20871_v8 }
0x2b6a   :  { %19530 = vmatprep.subr.bf16.mxu0 %v20319_v0 }
0x2b6d   :  { %19532 = vmatpush3.bf16.msra.mxu0 %v20881_v14 }
0x2b6e   :  { %19533 = vmatprep.subr.bf16.mxu0 %v20319_v0 }
0x2b71   :  { %19535 = vmatpush3.bf16.msra.mxu0 %v20891_v24 }
0x2b72   :  { %19608 = vmatprep.subr.bf16.mxu0 %v20319_v0 }
0x2b74   :  { %17974 = vmatmul.mubr.msk.f32.vlgmr.msra.gmra.mrb[16].mxu0 %vm4355_vm2, %v15294_v37 }
0x2b75   :  { %19610 = vmatpush3.bf16.msra.mxu0 %v20858_v1  ;;  %18124 = vmatprep.mubr.msk.f32.mxu0 %vm20320_vm0, %v20321_v4 }
0x2b76   :  { %19611 = vmatprep.subr.bf16.mxu0 %v20319_v0 }
0x2b79   :  { %19613 = vmatpush3.bf16.msra.mxu0 %v20871_v8 }
0x2b7a   :  { %19614 = vmatprep.subr.bf16.mxu0 %v20319_v0 }
0x2b7d   :  { %19616 = vmatpush3.bf16.msra.mxu0 %v20881_v14 }
0x2b7e   :  { %19617 = vmatprep.subr.bf16.mxu0 %v20319_v0 }
0x2b81   :  { %19619 = vmatpush3.bf16.msra.mxu0 %v20891_v24 }
0x2b82   :  { %19620 = vmatprep.subr.bf16.mxu0 %v20319_v0 }
0x2c47   :  { %v11125_v46 = vpop.f32.mrb[16].mxu0 }
0x2c48   :  { %v19916_v48 = vadd.f32 %v21639_v32, %v11125_v46  ;;  %v17975_v50 = vpop.f32.mrb[17].mxu0 }
0x2c4a   :  { %v11614_v51 = vadd.f32 %v21744_v19, %v19916_v48 }
0x2c4c   :  { %v15298_v47 = vmul.f32 -1.442695, %v11614_v51 }
0x2c4e   :  { %20295 = vpow2.f32 %v15298_v47 }
0x2c58   :  { %v20296_v12 = vpop.eup %20295 }
0x2c59   :  { %v11618_v29 = vadd.f32 1.0, %v20296_v12 }
0x2c5b   :  { %20297 = vrcp.f32 %v11618_v29 }
0x2c65   :  { %v20298_v30 = vpop.eup %20297 }
0x2c66   :  { %v11625_v55 = vmul.f32 %v20298_v30, %v11623_v6  ;;  %v11632_v20 = vsub.f32 1.0, %v20298_v30  ;;  %v11638_v19 = vmul.f32 %v20298_v30, %v21646_v44 }
0x2c68   :  { %11627 = vrot.lane.b32.xlu1 %v11625_v55, %s20323_s28 }
0x2cda   :  { %v11628_v33 = vpop.permute.xlu1 %11627 }
0x2cdb   :  { %v11630_v7 = vadd.f32 %v19916_v48, %v11628_v33 }
0x2cdd   :  { %20299 = vtanh.f32 %v11630_v7 }
0x2ce7   :  { %v20300_v18 = vpop.eup %20299 }
0x2ce8   :  { %11634 = vrot.lane.b32.xlu0 %v20300_v18, %s20324_s12 }
0x2d5a   :  { %v11635_v21 = vpop.permute.xlu0 %11634 }
0x2d5b   :  { %v11637_v26 = vmul.f32 %v11635_v21, %v11632_v20 }
0x2d5d   :  { %v21821_v22 = vadd.f32 %v11638_v19, %v11637_v26 }
0x2d5f   :  { %11641 = vrot.lane.b32.xlu1 %v21821_v22, %s20324_s12 }
0x2dd1   :  { %v11642_v36 = vpop.permute.xlu1 %11641 }
0x2dd2   :  { %v11643_v37 = vsel %vm50_vm1, %v11642_v36, 0 }
0x2dd3   :  { %v21826_v34 = vand.u32 4294901760, %v11643_v37 }
0x2dd5   :  { %v11715_v23 = vsub.f32 %v11643_v37, %v21826_v34 }
0x2dd7   :  { %v11716_v35 = vand.u32 4294901760, %v11715_v23 }
0x2dd9   :  { %v11717_v42 = vsub.f32 %v11715_v23, %v11716_v35 }
0x2ddb   :  { %v11718_v41 = vand.u32 4294901760, %v11717_v42 }
0x2ddd   :  { %18051 = vmatmul.mubr.f32.vlgmr.msra.gmra.mrb[26].mxu1 %v11718_v41 }
0x2dde   :  { %19580 = vmatpush3.bf16.msra.mxu1 %v21101_v43  ;;  %18061 = vmatprep.mubr.msk.f32.mxu1 %vm20320_vm0, %v20321_v4 }
0x2ddf   :  { %19581 = vmatprep.subr.bf16.mxu1 %v20319_v0 }
0x2de2   :  { %19583 = vmatpush3.bf16.msra.mxu1 %v21107_v52 }
0x2de3   :  { %19584 = vmatprep.subr.bf16.mxu1 %v20319_v0 }
0x2de5   :  { %18062 = vmatmul.mubr.f32.vlgmr.msra.gmra.mrb[26].mxu1 %v21826_v34 }
0x2de6   :  { %19586 = vmatpush3.bf16.msra.mxu1 %v21109_v53  ;;  %18072 = vmatprep.mubr.msk.f32.mxu1 %vm20320_vm0, %v20321_v4 }
0x2de7   :  { %19587 = vmatprep.subr.bf16.mxu1 %v20319_v0 }
0x2dea   :  { %19589 = vmatpush3.bf16.msra.mxu1 %v21111_v54 }
0x2deb   :  { %19590 = vmatprep.subr.bf16.mxu1 %v20319_v0 }
0x2ded   :  { %18073 = vmatmul.mubr.f32.vlgmr.msra.gmra.mrb[26].mxu1 %v11715_v23 }
0x2dee   :  { %19592 = vmatpush3.bf16.msra.mxu1 %v21086_v10  ;;  %18083 = vmatprep.mubr.msk.f32.mxu1 %vm20320_vm0, %v20321_v4 }
0x2def   :  { %19593 = vmatprep.subr.bf16.mxu1 %v20319_v0 }
0x2df2   :  { %19595 = vmatpush3.bf16.msra.mxu1 %v21096_v15 }
0x2df3   :  { %19596 = vmatprep.subr.bf16.mxu1 %v20319_v0 }
0x2df5   :  { %18084 = vmatmul.mubr.f32.vlgmr.msra.gmra.mrb[26].mxu1 %v11716_v35 }
0x2df6   :  { %19598 = vmatpush3.bf16.msra.mxu1 %v21113_v45  ;;  %18094 = vmatprep.mubr.msk.f32.mxu1 %vm20320_vm0, %v20321_v4 }
0x2df7   :  { %19599 = vmatprep.subr.bf16.mxu1 %v20319_v0 }
0x2dfa   :  { %19601 = vmatpush3.bf16.msra.mxu1 %v21115_v28 }
0x2dfb   :  { %19602 = vmatprep.subr.bf16.mxu1 %v20319_v0 }
0x2dfd   :  { %18095 = vmatmul.mubr.f32.vlgmr.msra.gmra.mrb[26].mxu1 %v21826_v34 }
0x2dfe   :  { %19604 = vmatpush3.bf16.msra.mxu1 %v21086_v10  ;;  %18105 = vmatprep.mubr.msk.f32.mxu1 %vm20320_vm0, %v20321_v4 }
0x2dff   :  { %19605 = vmatprep.subr.bf16.mxu1 %v20319_v0 }
0x2e02   :  { %19607 = vmatpush3.bf16.msra.mxu1 %v21096_v15 }
0x2e03   :  { %19680 = vmatprep.subr.bf16.mxu1 %v20319_v0 }
0x2e05   :  { %18106 = vmatmul.mubr.f32.vlgmr.msra.gmra.mrb[26].mxu1 %v21826_v34 }
0x2e06   :  { %19682 = vmatpush3.bf16.msra.mxu1 %v20997_v27  ;;  %18230 = vmatprep.mubr.msk.f32.mxu1 %vm20320_vm0, %v20321_v4 }
0x2e07   :  { %19683 = vmatprep.subr.bf16.mxu1 %v20319_v0 }
0x2e0a   :  { %19685 = vmatpush3.bf16.msra.mxu1 %v21010_v56 }
0x2e0b   :  { %19686 = vmatprep.subr.bf16.mxu1 %v20319_v0 }
0x2e0d   :  { %18231 = vmatmul.mubr.f32.vlgmr.msra.gmra.mrb[28].mxu1 %v11718_v41 }
0x2e0e   :  { %19688 = vmatpush3.bf16.msra.mxu1 %v21018_v5  ;;  %18241 = vmatprep.mubr.msk.f32.mxu1 %vm20320_vm0, %v20321_v4 }
0x2e0f   :  { %19689 = vmatprep.subr.bf16.mxu1 %v20319_v0 }
0x2e12   :  { %19691 = vmatpush3.bf16.msra.mxu1 %v21022_v9 }
0x2e13   :  { %19692 = vmatprep.subr.bf16.mxu1 %v20319_v0 }
0x2e15   :  { %18242 = vmatmul.mubr.f32.vlgmr.msra.gmra.mrb[28].mxu1 %v21826_v34 }
0x2e16   :  { %19694 = vmatpush3.bf16.msra.mxu1 %v21024_v11  ;;  %18252 = vmatprep.mubr.msk.f32.mxu1 %vm20320_vm0, %v20321_v4 }
0x2e17   :  { %19695 = vmatprep.subr.bf16.mxu1 %v20319_v0 }
0x2e1a   :  { %19697 = vmatpush3.bf16.msra.mxu1 %v21026_v13 }
0x2e1b   :  { %19698 = vmatprep.subr.bf16.mxu1 %v20319_v0 }
0x2e1d   :  { %18253 = vmatmul.mubr.f32.vlgmr.msra.gmra.mrb[28].mxu1 %v11715_v23 }
0x2e1e   :  { %19700 = vmatpush3.bf16.msra.mxu1 %v20997_v27  ;;  %18263 = vmatprep.mubr.msk.f32.mxu1 %vm20320_vm0, %v20321_v4 }
0x2e1f   :  { %19701 = vmatprep.subr.bf16.mxu1 %v20319_v0 }
0x2e22   :  { %19703 = vmatpush3.bf16.msra.mxu1 %v21010_v56 }
0x2e23   :  { %19704 = vmatprep.subr.bf16.mxu1 %v20319_v0 }
0x2e25   :  { %18264 = vmatmul.mubr.f32.vlgmr.msra.gmra.mrb[28].mxu1 %v11716_v35 }
0x2e26   :  { %19706 = vmatpush3.bf16.msra.mxu1 %v21028_v16  ;;  %18274 = vmatprep.mubr.msk.f32.mxu1 %vm20320_vm0, %v20321_v4 }
0x2e27   :  { %19707 = vmatprep.subr.bf16.mxu1 %v20319_v0 }
0x2e2a   :  { %19709 = vmatpush3.bf16.msra.mxu1 %v21030_v17 }
0x2e2b   :  { %19710 = vmatprep.subr.bf16.mxu1 %v20319_v0 }
0x2e2d   :  { %18275 = vmatmul.mubr.f32.vlgmr.msra.gmra.mrb[28].mxu1 %v21826_v34 }
0x2e2e   :  { %19712 = vmatpush3.bf16.msra.mxu1 %v20997_v27  ;;  %18285 = vmatprep.mubr.msk.f32.mxu1 %vm20320_vm0, %v20321_v4 }
0x2e2f   :  { %19713 = vmatprep.subr.bf16.mxu1 %v20319_v0 }
0x2e32   :  { %19715 = vmatpush3.bf16.msra.mxu1 %v21010_v56 }
0x2e33   :  { %19716 = vmatprep.subr.bf16.mxu1 %v20319_v0 }
0x2e35   :  { %18286 = vmatmul.mubr.f32.vlgmr.msra.gmra.mrb[28].mxu1 %v21826_v34 }
0x2e36   :  { %19718 = vmatpush3.bf16.msra.mxu1 %v21086_v10  ;;  %18296 = vmatprep.mubr.msk.f32.mxu1 %vm20320_vm0, %v20321_v4 }
0x2e37   :  { %19719 = vmatprep.subr.bf16.mxu1 %v20319_v0 }
0x2e3a   :  { %19721 = vmatpush3.bf16.msra.mxu1 %v21096_v15 }
0x2e3b   :  { %19722 = vmatprep.subr.bf16.mxu1 %v20319_v0 }
0x2ed8   :  { %v12126_v44 = vpop.f32.mrb[26].mxu1 }
0x2ed9   :  { %v19918_v46 = vadd.f32 %v21735_v38, %v12126_v44  ;;  %v18107_v48 = vpop.f32.mrb[27].mxu1 }
0x2edb   :  { %15299 = vst.msk [vmem:[%s22200_s11 + $0xa] sm:$0x3] %vm4347_vm4, %v19918_v46  ;;  %v12132_v50 = vsel %vm4347_vm4, %v19918_v46, -inf }
0x2edc   :  { %12133 = vmax.xlane.f32.xlu0 %v12132_v50 }
0x2f08   :  { %v13164_v51 = vpop.f32.mrb[28].mxu1 }
0x2f09   :  { %v21914_v47 = vadd.f32 %v21561_v40, %v13164_v51  ;;  %v18287_v12 = vpop.f32.mrb[29].mxu1 }
0x2f0b   :  { %13176 = vrot.lane.b32.xlu0 %v21914_v47, %s20323_s28 }
0x2f69   :  { %v12134_v29 = vpop.xlane.xlu0 %12133 }
0x2f6a   :  { %vm12135_vm13 = vcmp.eq.f32.partialorder %v19918_v46, %v12134_v29 }
0x2f6b   :  { %v12136_v30 = vsel %vm12135_vm13, %v21221_v25, 64.0 }
0x2f6c   :  { %v12137_v6 = vsel %vm4347_vm4, %v12136_v30, inf }
0x2f6d   :  { %12138 = vmin.xlane.f32.xlu1 %v12137_v6 }
0x2f7d   :  { %v13177_v41 = vpop.permute.xlu0 %13176 }
0x2ffa   :  { %v12139_v55 = vpop.xlane.xlu1 %12138 }
0x2ffb   :  { %vm12140_vm14 = vcmp.eq.f32.partialorder %v21221_v25, %v12139_v55 }
0x2ffc   :  { %v15300_v33 = vsel %vm12140_vm14, 1.0, %v20321_v4 }
0x2ffd   :  { %v12144_v7 = vsel %vm4355_vm2, %v15300_v33, 0 }
0x2ffe   :  { %v12220_v40 = vsub.f32 %v12144_v7, %v12144_v7 }
0x3000   :  { %v12221_v18 = vand.u32 4294901760, %v12220_v40 }
0x3002   :  { %v12222_v20 = vsub.f32 %v12220_v40, %v12221_v18 }
0x3004   :  { %v12223_v21 = vand.u32 4294901760, %v12222_v20 }
0x3006   :  { %18125 = vmatmul.mubr.f32.vlgmr.msra.gmra.mrb[18].mxu0 %v12223_v21 }
0x3007   :  { %19622 = vmatpush3.bf16.msra.mxu0 %v20895_v39  ;;  %18143 = vmatprep.mubr.msk.f32.mxu0 %vm20320_vm0, %v20321_v4 }
0x3008   :  { %19623 = vmatprep.subr.bf16.mxu0 %v20319_v0 }
0x300b   :  { %19625 = vmatpush3.bf16.msra.mxu0 %v20897_v49 }
0x300c   :  { %19626 = vmatprep.subr.bf16.mxu0 %v20319_v0 }
0x300f   :  { %19628 = vmatpush3.bf16.msra.mxu0 %v20899_v31 }
0x3010   :  { %19629 = vmatprep.subr.bf16.mxu0 %v20319_v0 }
0x3013   :  { %19631 = vmatpush3.bf16.msra.mxu0 %v20901_v57 }
0x3014   :  { %19632 = vmatprep.subr.bf16.mxu0 %v20319_v0 }
0x3016   :  { %18144 = vmatmul.mubr.msk.f32.vlgmr.msra.gmra.mrb[18].mxu0 %vm4355_vm2, %v15300_v33 }
0x3017   :  { %19634 = vmatpush3.bf16.msra.mxu0 %v20903_v58  ;;  %18162 = vmatprep.mubr.msk.f32.mxu0 %vm20320_vm0, %v20321_v4 }
0x3018   :  { %19635 = vmatprep.subr.bf16.mxu0 %v20319_v0 }
0x301b   :  { %19637 = vmatpush3.bf16.msra.mxu0 %v20905_v59 }
0x301c   :  { %19638 = vmatprep.subr.bf16.mxu0 %v20319_v0 }
0x301f   :  { %19640 = vmatpush3.bf16.msra.mxu0 %v20907_v60 }
0x3020   :  { %19641 = vmatprep.subr.bf16.mxu0 %v20319_v0 }
0x3023   :  { %19643 = vmatpush3.bf16.msra.mxu0 %v20909_v61 }
0x3024   :  { %19644 = vmatprep.subr.bf16.mxu0 %v20319_v0 }
0x3026   :  { %18163 = vmatmul.mubr.f32.vlgmr.msra.gmra.mrb[18].mxu0 %v12220_v40 }
0x3027   :  { %19646 = vmatpush3.bf16.msra.mxu0 %v20858_v1  ;;  %18181 = vmatprep.mubr.msk.f32.mxu0 %vm20320_vm0, %v20321_v4 }
0x3028   :  { %19647 = vmatprep.subr.bf16.mxu0 %v20319_v0 }
0x302b   :  { %19649 = vmatpush3.bf16.msra.mxu0 %v20871_v8 }
0x302c   :  { %19650 = vmatprep.subr.bf16.mxu0 %v20319_v0 }
0x302f   :  { %19652 = vmatpush3.bf16.msra.mxu0 %v20881_v14 }
0x3030   :  { %19653 = vmatprep.subr.bf16.mxu0 %v20319_v0 }
0x3033   :  { %19655 = vmatpush3.bf16.msra.mxu0 %v20891_v24 }
0x3034   :  { %19656 = vmatprep.subr.bf16.mxu0 %v20319_v0 }
0x3036   :  { %18182 = vmatmul.mubr.f32.vlgmr.msra.gmra.mrb[18].mxu0 %v12221_v18 }
0x3037   :  { %19658 = vmatpush3.bf16.msra.mxu0 %v20911_v62  ;;  %18200 = vmatprep.mubr.msk.f32.mxu0 %vm20320_vm0, %v20321_v4 }
0x3038   :  { %19659 = vmatprep.subr.bf16.mxu0 %v20319_v0 }
0x303b   :  { %19661 = vmatpush3.bf16.msra.mxu0 %v20913_v63 }
0x303c   :  { %19662 = vmatprep.subr.bf16.mxu0 %v20319_v0 }
0x303f   :  { %19664 = vmatpush3.bf16.msra.mxu0 %v20915_v2 }
0x3040   :  { %19665 = vmatprep.subr.bf16.mxu0 %v20319_v0 }
0x3043   :  { %19667 = vmatpush3.bf16.msra.mxu0 %v20917_v3 }
0x3044   :  { %19668 = vmatprep.subr.bf16.mxu0 %v20319_v0 }
0x3046   :  { %18201 = vmatmul.mubr.msk.f32.vlgmr.msra.gmra.mrb[18].mxu0 %vm4355_vm2, %v15300_v33 }
0x3047   :  { %19670 = vmatpush3.bf16.msra.mxu0 %v20858_v1  ;;  %18219 = vmatprep.mubr.msk.f32.mxu0 %vm20320_vm0, %v20321_v4 }
0x3048   :  { %19671 = vmatprep.subr.bf16.mxu0 %v20319_v0 }
0x304b   :  { %19673 = vmatpush3.bf16.msra.mxu0 %v20871_v8 }
0x304c   :  { %19674 = vmatprep.subr.bf16.mxu0 %v20319_v0 }
0x304f   :  { %19676 = vmatpush3.bf16.msra.mxu0 %v20881_v14 }
0x3050   :  { %19677 = vmatprep.subr.bf16.mxu0 %v20319_v0 }
0x3053   :  { %19679 = vmatpush3.bf16.msra.mxu0 %v20891_v24 }
0x3054   :  { %19752 = vmatprep.subr.bf16.mxu0 %v20319_v0 }
0x3056   :  { %18220 = vmatmul.mubr.msk.f32.vlgmr.msra.gmra.mrb[18].mxu0 %vm4355_vm2, %v15300_v33 }
0x3057   :  { %19754 = vmatpush3.bf16.msra.mxu0 %v20858_v1  ;;  %18370 = vmatprep.mubr.msk.f32.mxu0 %vm20320_vm0, %v20321_v4 }
0x3058   :  { %19755 = vmatprep.subr.bf16.mxu0 %v20319_v0 }
0x305b   :  { %19757 = vmatpush3.bf16.msra.mxu0 %v20871_v8 }
0x305c   :  { %19758 = vmatprep.subr.bf16.mxu0 %v20319_v0 }
0x305f   :  { %19760 = vmatpush3.bf16.msra.mxu0 %v20881_v14 }
0x3060   :  { %19761 = vmatprep.subr.bf16.mxu0 %v20319_v0 }
0x3063   :  { %19763 = vmatpush3.bf16.msra.mxu0 %v20891_v24 }
0x3064   :  { %19764 = vmatprep.subr.bf16.mxu0 %v20319_v0 }
0x3129   :  { %v12679_v19 = vpop.f32.mrb[18].mxu0 }
0x312a   :  { %v19919_v26 = vadd.f32 %v21639_v32, %v12679_v19  ;;  %v18221_v36 = vpop.f32.mrb[19].mxu0 }
0x312c   :  { %v13168_v37 = vadd.f32 %v21914_v47, %v19919_v26 }
0x312e   :  { %v15304_v34 = vmul.f32 -1.442695, %v13168_v37 }
0x3130   :  { %20301 = vpow2.f32 %v15304_v34 }
0x313a   :  { %v20302_v23 = vpop.eup %20301 }
0x313b   :  { %v13172_v35 = vadd.f32 1.0, %v20302_v23 }
0x313d   :  { %20303 = vrcp.f32 %v13172_v35 }
0x3147   :  { %v20304_v42 = vpop.eup %20303 }
0x3148   :  { %v13179_v44 = vmul.f32 %v20304_v42, %v13177_v41  ;;  %v13186_v32 = vsub.f32 1.0, %v20304_v42  ;;  %v13192_v47 = vmul.f32 %v20304_v42, %v21821_v22 }
0x314a   :  { %13181 = vrot.lane.b32.xlu1 %v13179_v44, %s20323_s28 }
0x31bc   :  { %v13182_v46 = vpop.permute.xlu1 %13181 }
0x31bd   :  { %v13184_v48 = vadd.f32 %v19919_v26, %v13182_v46 }
0x31bf   :  { %20305 = vtanh.f32 %v13184_v48 }
0x31c9   :  { %v20306_v50 = vpop.eup %20305 }
0x31ca   :  { %13188 = vrot.lane.b32.xlu0 %v20306_v50, %s20324_s12 }
0x323c   :  { %v13189_v51 = vpop.permute.xlu0 %13188 }
0x323d   :  { %v13191_v12 = vmul.f32 %v13189_v51, %v13186_v32 }
0x323f   :  { %v21991_v29 = vadd.f32 %v13192_v47, %v13191_v12 }
0x3241   :  { %13195 = vrot.lane.b32.xlu1 %v21991_v29, %s20324_s12 }
0x32b3   :  { %v13196_v30 = vpop.permute.xlu1 %13195 }
0x32b4   :  { %v13197_v6 = vsel %vm50_vm1, %v13196_v30, 0 }
0x32b5   :  { %v21996_v55 = vand.u32 4294901760, %v13197_v6 }
0x32b7   :  { %v13269_v33 = vsub.f32 %v13197_v6, %v21996_v55 }
0x32b9   :  { %v13270_v7 = vand.u32 4294901760, %v13269_v33 }
0x32bb   :  { %v13271_v40 = vsub.f32 %v13269_v33, %v13270_v7 }
0x32bd   :  { %v13272_v18 = vand.u32 4294901760, %v13271_v40 }
0x32bf   :  { %18297 = vmatmul.mubr.f32.vlgmr.msra.gmra.mrb[30].mxu1 %v13272_v18 }
0x32c0   :  { %19724 = vmatpush3.bf16.msra.mxu1 %v21101_v43  ;;  %18307 = vmatprep.mubr.msk.f32.mxu1 %vm20320_vm0, %v20321_v4 }
0x32c1   :  { %19725 = vmatprep.subr.bf16.mxu1 %v20319_v0 }
0x32c4   :  { %19727 = vmatpush3.bf16.msra.mxu1 %v21107_v52 }
0x32c5   :  { %19728 = vmatprep.subr.bf16.mxu1 %v20319_v0 }
0x32c7   :  { %18308 = vmatmul.mubr.f32.vlgmr.msra.gmra.mrb[30].mxu1 %v21996_v55 }
0x32c8   :  { %19730 = vmatpush3.bf16.msra.mxu1 %v21109_v53  ;;  %18318 = vmatprep.mubr.msk.f32.mxu1 %vm20320_vm0, %v20321_v4 }
0x32c9   :  { %19731 = vmatprep.subr.bf16.mxu1 %v20319_v0 }
0x32cc   :  { %19733 = vmatpush3.bf16.msra.mxu1 %v21111_v54 }
0x32cd   :  { %19734 = vmatprep.subr.bf16.mxu1 %v20319_v0 }
0x32cf   :  { %18319 = vmatmul.mubr.f32.vlgmr.msra.gmra.mrb[30].mxu1 %v13269_v33 }
0x32d0   :  { %19736 = vmatpush3.bf16.msra.mxu1 %v21086_v10  ;;  %18329 = vmatprep.mubr.msk.f32.mxu1 %vm20320_vm0, %v20321_v4 }
0x32d1   :  { %19737 = vmatprep.subr.bf16.mxu1 %v20319_v0 }
0x32d4   :  { %19739 = vmatpush3.bf16.msra.mxu1 %v21096_v15 }
0x32d5   :  { %19740 = vmatprep.subr.bf16.mxu1 %v20319_v0 }
0x32d7   :  { %18330 = vmatmul.mubr.f32.vlgmr.msra.gmra.mrb[30].mxu1 %v13270_v7 }
0x32d8   :  { %19742 = vmatpush3.bf16.msra.mxu1 %v21113_v45  ;;  %18340 = vmatprep.mubr.msk.f32.mxu1 %vm20320_vm0, %v20321_v4 }
0x32d9   :  { %19743 = vmatprep.subr.bf16.mxu1 %v20319_v0 }
0x32dc   :  { %19745 = vmatpush3.bf16.msra.mxu1 %v21115_v28 }
0x32dd   :  { %19746 = vmatprep.subr.bf16.mxu1 %v20319_v0 }
0x32df   :  { %18341 = vmatmul.mubr.f32.vlgmr.msra.gmra.mrb[30].mxu1 %v21996_v55 }
0x32e0   :  { %19748 = vmatpush3.bf16.msra.mxu1 %v21086_v10  ;;  %18351 = vmatprep.mubr.msk.f32.mxu1 %vm20320_vm0, %v20321_v4 }
0x32e1   :  { %19749 = vmatprep.subr.bf16.mxu1 %v20319_v0 }
0x32e4   :  { %19751 = vmatpush3.bf16.msra.mxu1 %v21096_v15 }
0x32e5   :  { %19824 = vmatprep.subr.bf16.mxu1 %v20319_v0 }
0x32e7   :  { %18352 = vmatmul.mubr.f32.vlgmr.msra.gmra.mrb[30].mxu1 %v21996_v55 }
0x32e8   :  { %19826 = vmatpush3.bf16.msra.mxu1 %v20997_v27  ;;  %18476 = vmatprep.mubr.msk.f32.mxu1 %vm20320_vm0, %v20321_v4 }
0x32e9   :  { %19827 = vmatprep.subr.bf16.mxu1 %v20319_v0 }
0x32ec   :  { %19829 = vmatpush3.bf16.msra.mxu1 %v21010_v56 }
0x32ed   :  { %19830 = vmatprep.subr.bf16.mxu1 %v20319_v0 }
0x32ef   :  { %18477 = vmatmul.mubr.f32.vlgmr.msra.gmra.mrb[32].mxu1 %v13272_v18 }
0x32f0   :  { %19832 = vmatpush3.bf16.msra.mxu1 %v21018_v5  ;;  %18487 = vmatprep.mubr.msk.f32.mxu1 %vm20320_vm0, %v20321_v4 }
0x32f1   :  { %19833 = vmatprep.subr.bf16.mxu1 %v20319_v0 }
0x32f4   :  { %19835 = vmatpush3.bf16.msra.mxu1 %v21022_v9 }
0x32f5   :  { %19836 = vmatprep.subr.bf16.mxu1 %v20319_v0 }
0x32f7   :  { %18488 = vmatmul.mubr.f32.vlgmr.msra.gmra.mrb[32].mxu1 %v21996_v55 }
0x32f8   :  { %19838 = vmatpush3.bf16.msra.mxu1 %v21024_v11  ;;  %18498 = vmatprep.mubr.msk.f32.mxu1 %vm20320_vm0, %v20321_v4 }
0x32f9   :  { %19839 = vmatprep.subr.bf16.mxu1 %v20319_v0 }
0x32fc   :  { %19841 = vmatpush3.bf16.msra.mxu1 %v21026_v13  ;;  %v20317_v13 = vld [vmem:[%s22197_s8] ss:$0 sm:$0xff] }
0x32fd   :  { %19842 = vmatprep.subr.bf16.mxu1 %v20319_v0 }
0x32ff   :  { %18499 = vmatmul.mubr.f32.vlgmr.msra.gmra.mrb[32].mxu1 %v13269_v33 }
0x3300   :  { %19844 = vmatpush3.bf16.msra.mxu1 %v20997_v27  ;;  %18509 = vmatprep.mubr.msk.f32.mxu1 %vm20320_vm0, %v20321_v4 }
0x3301   :  { %19845 = vmatprep.subr.bf16.mxu1 %v20319_v0 }
0x3304   :  { %19847 = vmatpush3.bf16.msra.mxu1 %v21010_v56 }
0x3305   :  { %19848 = vmatprep.subr.bf16.mxu1 %v20319_v0 }
0x3307   :  { %18510 = vmatmul.mubr.f32.vlgmr.msra.gmra.mrb[32].mxu1 %v13270_v7 }
0x3308   :  { %19850 = vmatpush3.bf16.msra.mxu1 %v21028_v16  ;;  %18520 = vmatprep.mubr.msk.f32.mxu1 %vm20320_vm0, %v20321_v4 }
0x3309   :  { %19851 = vmatprep.subr.bf16.mxu1 %v20319_v0 }
0x330c   :  { %19853 = vmatpush3.bf16.msra.mxu1 %v21030_v17 }
0x330d   :  { %19854 = vmatprep.subr.bf16.mxu1 %v20319_v0 }
0x330f   :  { %18521 = vmatmul.mubr.f32.vlgmr.msra.gmra.mrb[32].mxu1 %v21996_v55 }
0x3310   :  { %19856 = vmatpush3.bf16.msra.mxu1 %v20997_v27  ;;  %18531 = vmatprep.mubr.msk.f32.mxu1 %vm20320_vm0, %v20321_v4 }
0x3311   :  { %19857 = vmatprep.subr.bf16.mxu1 %v20319_v0 }
0x3314   :  { %19859 = vmatpush3.bf16.msra.mxu1 %v21010_v56 }
0x3315   :  { %19860 = vmatprep.subr.bf16.mxu1 %v20319_v0 }
0x3317   :  { %18532 = vmatmul.mubr.f32.vlgmr.msra.gmra.mrb[32].mxu1 %v21996_v55 }
0x3318   :  { %19862 = vmatpush3.bf16.msra.mxu1 %v21086_v10  ;;  %18542 = vmatprep.mubr.msk.f32.mxu1 %vm20320_vm0, %v20321_v4 }
0x3319   :  { %19863 = vmatprep.subr.bf16.mxu1 %v20319_v0 }
0x331c   :  { %19865 = vmatpush3.bf16.msra.mxu1 %v21096_v15 }
0x331d   :  { %19866 = vmatprep.subr.bf16.mxu1 %v20319_v0 }
0x33ba   :  { %v13680_v27 = vpop.f32.mrb[30].mxu1 }
0x33bb   :  { %v19921_v5 = vadd.f32 %v21735_v38, %v13680_v27  ;;  %v18353_v9 = vpop.f32.mrb[31].mxu1 }
0x33bd   :  { %15305 = vst.msk [vmem:[%s22200_s11 + $0xc] sm:$0x3] %vm4347_vm4, %v19921_v5  ;;  %v13686_v56 = vsel %vm4347_vm4, %v19921_v5, -inf }
0x33be   :  { %13687 = vmax.xlane.f32.xlu0 %v13686_v56 }
0x33ea   :  { %v14718_v11 = vpop.f32.mrb[32].mxu1 }
0x33eb   :  { %v22086_v16 = vadd.f32 %v20317_v13, %v14718_v11  ;;  %v18533_v17 = vpop.f32.mrb[33].mxu1 }
0x33ed   :  { %14730 = vrot.lane.b32.xlu0 %v22086_v16, %s20323_s28 }
0x344b   :  { %v13688_v22 = vpop.xlane.xlu0 %13687 }
0x344c   :  { %vm13689_vm15 = vcmp.eq.f32.partialorder %v19921_v5, %v13688_v22 }
0x344d   :  { %v13690_v20 = vsel %vm13689_vm15, %v21221_v25, 64.0 }
0x344e   :  { %v13691_v21 = vsel %vm4347_vm4, %v13690_v20, inf }
0x344f   :  { %13692 = vmin.xlane.f32.xlu1 %v13691_v21 }
0x34dc   :  { %v13693_v19 = vpop.xlane.xlu1 %13692 }
0x34dd   :  { %vm13694_vm3 = vcmp.eq.f32.partialorder %v21221_v25, %v13693_v19 }
0x34de   :  { %v15306_v26 = vsel %vm13694_vm3, 1.0, %v20321_v4 }
0x34df   :  { %v13698_v36 = vsel %vm4355_vm2, %v15306_v26, 0 }
0x34e0   :  { %v13774_v37 = vsub.f32 %v13698_v36, %v13698_v36 }
0x34e2   :  { %v13775_v34 = vand.u32 4294901760, %v13774_v37 }
0x34e4   :  { %v13776_v23 = vsub.f32 %v13774_v37, %v13775_v34 }
0x34e6   :  { %v13777_v35 = vand.u32 4294901760, %v13776_v23 }
0x34e8   :  { %18371 = vmatmul.mubr.f32.vlgmr.msra.gmra.mrb[20].mxu0 %v13777_v35 }
0x34e9   :  { %19766 = vmatpush3.bf16.msra.mxu0 %v20895_v39  ;;  %18389 = vmatprep.mubr.msk.f32.mxu0 %vm20320_vm0, %v20321_v4 }
0x34ea   :  { %19767 = vmatprep.subr.bf16.mxu0 %v20319_v0 }
0x34ed   :  { %19769 = vmatpush3.bf16.msra.mxu0 %v20897_v49 }
0x34ee   :  { %19770 = vmatprep.subr.bf16.mxu0 %v20319_v0 }
0x34f1   :  { %19772 = vmatpush3.bf16.msra.mxu0 %v20899_v31 }
0x34f2   :  { %19773 = vmatprep.subr.bf16.mxu0 %v20319_v0 }
0x34f5   :  { %19775 = vmatpush3.bf16.msra.mxu0 %v20901_v57 }
0x34f6   :  { %19776 = vmatprep.subr.bf16.mxu0 %v20319_v0 }
0x34f8   :  { %18390 = vmatmul.mubr.msk.f32.vlgmr.msra.gmra.mrb[20].mxu0 %vm4355_vm2, %v15306_v26 }
0x34f9   :  { %19778 = vmatpush3.bf16.msra.mxu0 %v20903_v58  ;;  %18408 = vmatprep.mubr.msk.f32.mxu0 %vm20320_vm0, %v20321_v4 }
0x34fa   :  { %19779 = vmatprep.subr.bf16.mxu0 %v20319_v0 }
0x34fd   :  { %19781 = vmatpush3.bf16.msra.mxu0 %v20905_v59 }
0x34fe   :  { %19782 = vmatprep.subr.bf16.mxu0 %v20319_v0 }
0x3501   :  { %19784 = vmatpush3.bf16.msra.mxu0 %v20907_v60  ;;  %v14731_v60 = vpop.permute.xlu0 %14730 }
0x3502   :  { %19785 = vmatprep.subr.bf16.mxu0 %v20319_v0 }
0x3505   :  { %19787 = vmatpush3.bf16.msra.mxu0 %v20909_v61 }
0x3506   :  { %19788 = vmatprep.subr.bf16.mxu0 %v20319_v0 }
0x3508   :  { %18409 = vmatmul.mubr.f32.vlgmr.msra.gmra.mrb[20].mxu0 %v13774_v37 }
0x3509   :  { %19790 = vmatpush3.bf16.msra.mxu0 %v20858_v1  ;;  %18427 = vmatprep.mubr.msk.f32.mxu0 %vm20320_vm0, %v20321_v4 }
0x350a   :  { %19791 = vmatprep.subr.bf16.mxu0 %v20319_v0 }
0x350d   :  { %19793 = vmatpush3.bf16.msra.mxu0 %v20871_v8 }
0x350e   :  { %19794 = vmatprep.subr.bf16.mxu0 %v20319_v0 }
0x3511   :  { %19796 = vmatpush3.bf16.msra.mxu0 %v20881_v14 }
0x3512   :  { %19797 = vmatprep.subr.bf16.mxu0 %v20319_v0 }
0x3515   :  { %19799 = vmatpush3.bf16.msra.mxu0 %v20891_v24 }
0x3516   :  { %19800 = vmatprep.subr.bf16.mxu0 %v20319_v0 }
0x3518   :  { %18428 = vmatmul.mubr.f32.vlgmr.msra.gmra.mrb[20].mxu0 %v13775_v34 }
0x3519   :  { %19802 = vmatpush3.bf16.msra.mxu0 %v20911_v62  ;;  %18446 = vmatprep.mubr.msk.f32.mxu0 %vm20320_vm0, %v20321_v4 }
0x351a   :  { %19803 = vmatprep.subr.bf16.mxu0 %v20319_v0 }
0x351d   :  { %19805 = vmatpush3.bf16.msra.mxu0 %v20913_v63 }
0x351e   :  { %19806 = vmatprep.subr.bf16.mxu0 %v20319_v0 }
0x3521   :  { %19808 = vmatpush3.bf16.msra.mxu0 %v20915_v2 }
0x3522   :  { %19809 = vmatprep.subr.bf16.mxu0 %v20319_v0 }
0x3525   :  { %19811 = vmatpush3.bf16.msra.mxu0 %v20917_v3 }
0x3526   :  { %19812 = vmatprep.subr.bf16.mxu0 %v20319_v0 }
0x3528   :  { %18447 = vmatmul.mubr.msk.f32.vlgmr.msra.gmra.mrb[20].mxu0 %vm4355_vm2, %v15306_v26 }
0x3529   :  { %19814 = vmatpush3.bf16.msra.mxu0 %v20858_v1  ;;  %18465 = vmatprep.mubr.msk.f32.mxu0 %vm20320_vm0, %v20321_v4  ;;  %v20318_v1 = vld [vmem:[%s22198_s7] ss:$0 sm:$0xff] }
0x352a   :  { %19815 = vmatprep.subr.bf16.mxu0 %v20319_v0 }
0x352d   :  { %19817 = vmatpush3.bf16.msra.mxu0 %v20871_v8 }
0x352e   :  { %19818 = vmatprep.subr.bf16.mxu0 %v20319_v0 }
0x3531   :  { %19820 = vmatpush3.bf16.msra.mxu0 %v20881_v14 }
0x3532   :  { %19821 = vmatprep.subr.bf16.mxu0 %v20319_v0 }
0x3535   :  { %19823 = vmatpush3.bf16.msra.mxu0 %v20891_v24 }
0x3538   :  { %18466 = vmatmul.mubr.msk.f32.vlgmr.msra.gmra.mrb[20].mxu0 %vm4355_vm2, %v15306_v26 }
0x360b   :  { %v14233_v39 = vpop.f32.mrb[20].mxu0 }
0x360c   :  { %v19922_v49 = vadd.f32 %v20318_v1, %v14233_v39  ;;  %v18467_v31 = vpop.f32.mrb[21].mxu0 }
0x360e   :  { %v14722_v57 = vadd.f32 %v22086_v16, %v19922_v49 }
0x3610   :  { %v15310_v8 = vmul.f32 -1.442695, %v14722_v57 }
0x3612   :  { %20307 = vpow2.f32 %v15310_v8 }
0x361c   :  { %v20308_v58 = vpop.eup %20307 }
0x361d   :  { %v14726_v59 = vadd.f32 1.0, %v20308_v58 }
0x361f   :  { %20309 = vrcp.f32 %v14726_v59 }
0x3629   :  { %v20310_v14 = vpop.eup %20309 }
0x362a   :  { %v14733_v61 = vmul.f32 %v20310_v14, %v14731_v60  ;;  %v14740_v2 = vsub.f32 1.0, %v20310_v14  ;;  %v14746_v25 = vmul.f32 %v20310_v14, %v21991_v29 }
0x362c   :  { %14735 = vrot.lane.b32.xlu1 %v14733_v61, %s20323_s28 }
0x369e   :  { %v14736_v24 = vpop.permute.xlu1 %14735 }
0x369f   :  { %v14738_v62 = vadd.f32 %v19922_v49, %v14736_v24 }
0x36a1   :  { %20311 = vtanh.f32 %v14738_v62 }
0x36ab   :  { %v20312_v63 = vpop.eup %20311 }
0x36ac   :  { %14742 = vrot.lane.b32.xlu0 %v20312_v63, %s20324_s12 }
0x371e   :  { %v14743_v3 = vpop.permute.xlu0 %14742 }
0x371f   :  { %v14745_v42 = vmul.f32 %v14743_v3, %v14740_v2 }
0x3721   :  { %v14747_v41 = vadd.f32 %v14746_v25, %v14745_v42 }
0x3723   :  { %14749 = vrot.lane.b32.xlu1 %v14747_v41, %s20324_s12 }
0x3795   :  { %v14750_v44 = vpop.permute.xlu1 %14749 }
0x3796   :  { %v14751_v46 = vsel %vm50_vm1, %v14750_v44, 0 }
0x3797   :  { %v14822_v48 = vand.u32 4294901760, %v14751_v46 }
0x3799   :  { %v14823_v50 = vsub.f32 %v14751_v46, %v14822_v48 }
0x379b   :  { %v14824_v32 = vand.u32 4294901760, %v14823_v50 }
0x379d   :  { %v14825_v51 = vsub.f32 %v14823_v50, %v14824_v32 }
0x379f   :  { %v14826_v47 = vand.u32 4294901760, %v14825_v51 }
0x37a1   :  { %18543 = vmatmul.mubr.f32.vlgmr.msra.gmra.mrb[34].mxu1 %v14826_v47 }
0x37a2   :  { %19868 = vmatpush3.bf16.msra.mxu1 %v21101_v43  ;;  %18553 = vmatprep.mubr.msk.f32.mxu1 %vm20320_vm0, %v20321_v4 }
0x37a3   :  { %19869 = vmatprep.subr.bf16.mxu1 %v20319_v0 }
0x37a6   :  { %19871 = vmatpush3.bf16.msra.mxu1 %v21107_v52 }
0x37a7   :  { %19872 = vmatprep.subr.bf16.mxu1 %v20319_v0 }
0x37a9   :  { %18554 = vmatmul.mubr.f32.vlgmr.msra.gmra.mrb[34].mxu1 %v14822_v48 }
0x37aa   :  { %19874 = vmatpush3.bf16.msra.mxu1 %v21109_v53  ;;  %18564 = vmatprep.mubr.msk.f32.mxu1 %vm20320_vm0, %v20321_v4 }
0x37ab   :  { %19875 = vmatprep.subr.bf16.mxu1 %v20319_v0 }
0x37ae   :  { %19877 = vmatpush3.bf16.msra.mxu1 %v21111_v54 }
0x37af   :  { %19878 = vmatprep.subr.bf16.mxu1 %v20319_v0 }
0x37b1   :  { %18565 = vmatmul.mubr.f32.vlgmr.msra.gmra.mrb[34].mxu1 %v14823_v50 }
0x37b2   :  { %19880 = vmatpush3.bf16.msra.mxu1 %v21086_v10  ;;  %18575 = vmatprep.mubr.msk.f32.mxu1 %vm20320_vm0, %v20321_v4 }
0x37b3   :  { %19881 = vmatprep.subr.bf16.mxu1 %v20319_v0 }
0x37b6   :  { %19883 = vmatpush3.bf16.msra.mxu1 %v21096_v15 }
0x37b7   :  { %19884 = vmatprep.subr.bf16.mxu1 %v20319_v0 }
0x37b9   :  { %18576 = vmatmul.mubr.f32.vlgmr.msra.gmra.mrb[34].mxu1 %v14824_v32 }
0x37ba   :  { %19886 = vmatpush3.bf16.msra.mxu1 %v21113_v45  ;;  %18586 = vmatprep.mubr.msk.f32.mxu1 %vm20320_vm0, %v20321_v4 }
0x37bb   :  { %19887 = vmatprep.subr.bf16.mxu1 %v20319_v0 }
0x37be   :  { %19889 = vmatpush3.bf16.msra.mxu1 %v21115_v28 }
0x37bf   :  { %19890 = vmatprep.subr.bf16.mxu1 %v20319_v0 }
0x37c1   :  { %18587 = vmatmul.mubr.f32.vlgmr.msra.gmra.mrb[34].mxu1 %v14822_v48 }
0x37c2   :  { %19892 = vmatpush3.bf16.msra.mxu1 %v21086_v10  ;;  %18597 = vmatprep.mubr.msk.f32.mxu1 %vm20320_vm0, %v20321_v4 }
0x37c3   :  { %19893 = vmatprep.subr.bf16.mxu1 %v20319_v0 }
0x37c6   :  { %19895 = vmatpush3.bf16.msra.mxu1 %v21096_v15 }
0x37c9   :  { %18598 = vmatmul.mubr.f32.vlgmr.msra.gmra.mrb[34].mxu1 %v14822_v48 }
0x389c   :  { %v15234_v43 = vpop.f32.mrb[34].mxu1 }
0x389d   :  { %v19924_v52 = vadd.f32 %v21735_v38, %v15234_v43  ;;  %v18599_v53 = vpop.f32.mrb[35].mxu1 }
0x389f   :  { %15311 = vst.msk [vmem:[%s22200_s11 + $0xe] sm:$0x3] %vm4347_vm4, %v19924_v52 }

</bundles_post_ra>
